<compile_context>
chip_gen: v5e
topology: v5e:2x2
jax: 0.10.0
libtpu: 0.0.40
codegen_flags: <defaults>
</compile_context>

<pallas_src>
import jax
import jax.numpy as jnp
from jax.experimental import pallas as pl
from jax.experimental.pallas import tpu as pltpu

HIDDEN = 768       # BERT hidden size (pooler / fc1 input)
FC1_DIM = 512      # fc1 output
NUM_LABELS = 2     # out output (logical)
LANE_PAD = 128     # lane-dense padding for the final projection / logits tile
BIAS_LEN = HIDDEN + FC1_DIM + LANE_PAD   # 1408, a multiple of 128
TM_MAX = 256       # batch tile (multiple of 256 for v6e/v7x MXU, of 128 for v5e)


def _round_up(x, m):
    return ((x + m - 1) // m) * m


# ----------------------------- Pallas kernel -------------------------------

def fused_head_loss_kernel(x_ref, wp_ref, w1_ref, w2_ref, b_ref, labels_ref,
                           logits_ref, loss_ref):
    """Per batch tile:
       pooled = tanh(x @ Wp + bp); h = relu(pooled @ W1 + b1);
       logits = h @ W2p + b2p  (lane-padded to 128, written unmasked);
       loss_ref[0,0] = sum over valid rows of per-row cross-entropy."""
    x = x_ref[...]                                                     # [tm, 768] bf16

    # concatenated biases, sliced at 128-aligned offsets
    bp = b_ref[:, :HIDDEN]                                             # [1, 768] f32
    b1 = b_ref[:, HIDDEN:HIDDEN + FC1_DIM]                             # [1, 512] f32
    b2 = b_ref[:, HIDDEN + FC1_DIM:]                                   # [1, 128] f32

    # pooler dense + tanh (f32 accumulation, f32 elementwise -- v5e safe)
    pooled = jnp.tanh(
        jnp.dot(x, wp_ref[...], preferred_element_type=jnp.float32) + bp
    )                                                                  # [tm, 768] f32

    # fc1 + relu
    h = jnp.maximum(
        jnp.dot(pooled.astype(jnp.bfloat16), w1_ref[...],
                preferred_element_type=jnp.float32) + b1,
        0.0,
    )                                                                  # [tm, 512] f32

    # out projection, lane-dense (padded to 128 output lanes)
    logits_p = (
        jnp.dot(h.astype(jnp.bfloat16), w2_ref[...],
                preferred_element_type=jnp.float32) + b2
    )                                                                  # [tm, 128] f32
    logits_ref[...] = logits_p

    # fused cross-entropy partial sum over valid rows / valid NUM_LABELS columns
    labels = labels_ref[...]                                           # [tm, 1] int32 (-1 = pad)
    col = jax.lax.broadcasted_iota(jnp.int32, logits_p.shape, 1)       # [tm, 128]
    valid_col = col < NUM_LABELS
    masked = jnp.where(valid_col, logits_p, -1e30)
    m = jnp.max(masked, axis=-1, keepdims=True)                        # [tm, 1]
    e = jnp.where(valid_col, jnp.exp(masked - m), 0.0)
    lse = jnp.log(jnp.sum(e, axis=-1, keepdims=True)) + m              # [tm, 1]
    onehot = (col == labels).astype(jnp.float32)
    picked = jnp.sum(logits_p * onehot, axis=-1, keepdims=True)        # [tm, 1]
    row_valid = (labels >= 0).astype(jnp.float32)                      # [tm, 1]
    loss_ref[0, 0] = jnp.sum((lse - picked) * row_valid)               # partial sum (SMEM)


# ----------------------------- wrapper --------------------------------------

def classifier_head_and_loss(first_tok_bf16, params, labels):
    """Runs the fused pooler + fc1 + out + CE-loss kernel over a batch grid.

    Returns (logits [B, NUM_LABELS] f32, loss scalar f32)."""
    B = first_tok_bf16.shape[0]
    tm = min(TM_MAX, _round_up(B, 8))          # batch tile: sublane-aligned, caps at 256
    num_tiles = pl.cdiv(B, tm)
    b_pad = num_tiles * tm

    x = jnp.zeros((b_pad, HIDDEN), jnp.bfloat16).at[:B].set(first_tok_bf16)
    lab = jnp.full((b_pad, 1), -1, jnp.int32).at[:B, 0].set(labels.astype(jnp.int32))

    logits_p, loss_parts = pl.pallas_call(
        fused_head_loss_kernel,
        out_shape=(
            jax.ShapeDtypeStruct((b_pad, LANE_PAD), jnp.float32),
            jax.ShapeDtypeStruct((num_tiles, 1), jnp.float32),
        ),
        grid=(num_tiles,),
        in_specs=[
            pl.BlockSpec((tm, HIDDEN), lambda i: (i, 0)),            # x tile (bf16, streamed)
            pl.BlockSpec((HIDDEN, HIDDEN), lambda i: (0, 0)),        # wp (bf16, VMEM-resident)
            pl.BlockSpec((HIDDEN, FC1_DIM), lambda i: (0, 0)),       # w1 (bf16, VMEM-resident)
            pl.BlockSpec((FC1_DIM, LANE_PAD), lambda i: (0, 0)),     # w2 padded (bf16, resident)
            pl.BlockSpec((1, BIAS_LEN), lambda i: (0, 0)),           # concatenated biases (f32)
            pl.BlockSpec((tm, 1), lambda i: (i, 0)),                 # labels tile (int32)
        ],
        out_specs=[
            pl.BlockSpec((tm, LANE_PAD), lambda i: (i, 0)),          # lane-dense logits tile
            pl.BlockSpec((1, 1), lambda i: (i, 0),
                         memory_space=pltpu.SMEM),                   # per-tile partial CE sum
        ],
        compiler_params=pltpu.CompilerParams(
            dimension_semantics=("parallel",),                       # megacore on v7x
            vmem_limit_bytes=32 * 1024 * 1024),
    )(
        x,
        params["wp"], params["w1"], params["w2p"], params["biases"],
        lab,
    )
    logits = logits_p[:B, :NUM_LABELS]
    loss = jnp.sum(loss_parts) / B                                   # mean over real rows
    return logits, loss


# --------------------- synthetic "BERT" + parameter init --------------------

def init_params(key, vocab_size=32, max_pos=64, type_vocab=2, scale=0.02):
    ks = jax.random.split(key, 6)
    w2 = scale * jax.random.normal(ks[5], (FC1_DIM, NUM_LABELS), jnp.float32)
    w2p = jnp.zeros((FC1_DIM, LANE_PAD), jnp.float32).at[:, :NUM_LABELS].set(w2)
    # biases (bp | b1 | b2-padded) concatenated into one lane-aligned row
    biases = jnp.concatenate(
        [jnp.zeros((1, HIDDEN), jnp.float32),
         jnp.zeros((1, FC1_DIM), jnp.float32),
         jnp.zeros((1, LANE_PAD), jnp.float32)], axis=1)             # [1, 1408]
    p = {
        # synthetic embedding tables standing in for the pretrained encoder
        "word_emb": scale * jax.random.normal(ks[0], (vocab_size, HIDDEN), jnp.float32),
        "pos_emb": scale * jax.random.normal(ks[1], (max_pos, HIDDEN), jnp.float32),
        "type_emb": scale * jax.random.normal(ks[2], (type_vocab, HIDDEN), jnp.float32),
        # BERT pooler dense (tanh) -- produces outputs[1]; bf16 for half weight DMA
        "wp": (scale * jax.random.normal(ks[3], (HIDDEN, HIDDEN), jnp.float32)
               ).astype(jnp.bfloat16),
        # fc1: Linear(768, 512)
        "w1": (scale * jax.random.normal(ks[4], (HIDDEN, FC1_DIM), jnp.float32)
               ).astype(jnp.bfloat16),
        # out: Linear(512, 2), zero-padded to 128 output lanes (lane-dense MXU/store)
        "w2p": w2p.astype(jnp.bfloat16),
        "biases": biases,
    }
    return p


def forward(params, input_ids, attention_mask=None, token_type_ids=None, labels=None):
    """Mirrors BertWithLinearLayer.forward: returns (loss, logits) or (logits,)."""
    B, S = input_ids.shape
    if token_type_ids is None:
        token_type_ids = jnp.zeros((B, S), jnp.int32)
    # glue (plain JAX): gather only the [CLS] token of the synthetic
    # last_hidden_state (word + position-0 + type embeddings), directly in bf16.
    first_tok = (
        params["word_emb"][input_ids[:, 0]]
        + params["pos_emb"][0][None, :]
        + params["type_emb"][token_type_ids[:, 0]]
    ).astype(jnp.bfloat16)                                           # [B, 768] bf16

    if labels is not None:
        # num_labels == 2 -> CrossEntropyLoss branch (fused into the head kernel)
        logits, loss = classifier_head_and_loss(first_tok, params, labels)
        return (loss, logits)
    # labels=None path: run the same fused kernel with sentinel labels (-1),
    # partial-loss outputs are all zero and discarded.
    # TODO(synk): gate the CE tail with an SMEM flag once the kernel is
    # compute-bound (it is free filler under weight DMA today).
    dummy = jnp.full((B,), -1, jnp.int32)
    logits, _ = classifier_head_and_loss(first_tok, params, dummy)
    return (logits,)


if __name__ == "__main__":
    key = jax.random.PRNGKey(0)
    pkey, dkey = jax.random.split(key)
    params = init_params(pkey)

    B, S = 2, 8
    input_ids = jax.random.randint(dkey, (B, S), 0, 32, dtype=jnp.int32)
    attention_mask = jnp.ones((B, S), jnp.int32)
    token_type_ids = jnp.zeros((B, S), jnp.int32)
    labels = jnp.array([0, 1], jnp.int32)

    loss, logits = forward(params, input_ids, attention_mask, token_type_ids, labels)
    jax.block_until_ready((loss, logits))

    assert logits.shape == (B, NUM_LABELS)
    assert logits.dtype == jnp.float32
    assert loss.shape == ()
    assert bool(jnp.isfinite(loss))

    # inference path (labels=None) exercises the same kernel
    (logits_only,) = forward(params, input_ids, attention_mask, token_type_ids)
    jax.block_until_ready(logits_only)
    assert logits_only.shape == (B, NUM_LABELS)

    print("KERNEL_OK")
</pallas_src>

<mosaic_0001>
module attributes {stable_mosaic.version = 11 : i64} {
  func.func @fused_head_loss_kernel(%arg0: i32, %arg1: memref<8x768xbf16, #tpu.memory_space<vmem>>, %arg2: memref<768x768xbf16, #tpu.memory_space<vmem>>, %arg3: memref<768x512xbf16, #tpu.memory_space<vmem>>, %arg4: memref<512x128xbf16, #tpu.memory_space<vmem>>, %arg5: memref<1x1408xf32, #tpu.memory_space<vmem>>, %arg6: memref<8x1xi32, #tpu.memory_space<vmem>>, %arg7: memref<8x128xf32, #tpu.memory_space<vmem>>, %arg8: memref<1x1xf32, #tpu.memory_space<smem>>) attributes {dimension_semantics = [#tpu.dimension_semantics<parallel>], iteration_bounds = array<i64: 1>, scalar_prefetch = 0 : i64, scratch_operands = 0 : i64, tpu.core_type = #tpu.core_type<tc>, window_params = [{transform_indices = @transform_0, window_bounds = array<i64: 8, 768>}, {pipeline_mode = #tpu.pipeline_mode<synchronous>, transform_indices = @transform_1, window_bounds = array<i64: 768, 768>}, {pipeline_mode = #tpu.pipeline_mode<synchronous>, transform_indices = @transform_2, window_bounds = array<i64: 768, 512>}, {pipeline_mode = #tpu.pipeline_mode<synchronous>, transform_indices = @transform_3, window_bounds = array<i64: 512, 128>}, {pipeline_mode = #tpu.pipeline_mode<synchronous>, transform_indices = @transform_4, window_bounds = array<i64: 1, 1408>}, {transform_indices = @transform_5, window_bounds = array<i64: 8, 1>}, {transform_indices = @transform_6, window_bounds = array<i64: 8, 128>}, {transform_indices = @transform_7, window_bounds = array<i64: 1, 1>}]} {
    %c0 = arith.constant 0 : index
    %c0_0 = arith.constant 0 : index
    %0 = vector.load %arg1[%c0, %c0_0] : memref<8x768xbf16, #tpu.memory_space<vmem>>, vector<8x768xbf16>
    %c0_1 = arith.constant 0 : index
    %c0_2 = arith.constant 0 : index
    %1 = vector.load %arg5[%c0_1, %c0_2] : memref<1x1408xf32, #tpu.memory_space<vmem>>, vector<1x768xf32>
    %c0_3 = arith.constant 0 : index
    %c768 = arith.constant 768 : index
    %2 = vector.load %arg5[%c0_3, %c768] : memref<1x1408xf32, #tpu.memory_space<vmem>>, vector<1x512xf32>
    %c0_4 = arith.constant 0 : index
    %c1280 = arith.constant 1280 : index
    %3 = vector.load %arg5[%c0_4, %c1280] : memref<1x1408xf32, #tpu.memory_space<vmem>>, vector<1x128xf32>
    %c0_5 = arith.constant 0 : index
    %c0_6 = arith.constant 0 : index
    %4 = vector.load %arg2[%c0_5, %c0_6] : memref<768x768xbf16, #tpu.memory_space<vmem>>, vector<768x768xbf16>
    %cst = arith.constant dense<0.000000e+00> : vector<8x768xf32>
    %5 = tpu.matmul %0, %4, %cst {dimension_numbers = #tpu.dot_dimension_numbers<[1], [0], [0], [1], [0, 0, 1, 1], [], []>} : vector<8x768xbf16>, vector<768x768xbf16>, vector<8x768xf32> -> vector<8x768xf32>
    %6 = vector.broadcast %1 : vector<1x768xf32> to vector<8x768xf32>
    %7 = arith.addf %5, %6 : vector<8x768xf32>
    %8 = math.tanh %7 : vector<8x768xf32>
    %9 = arith.truncf %8 : vector<8x768xf32> to vector<8x768xbf16>
    %c0_7 = arith.constant 0 : index
    %c0_8 = arith.constant 0 : index
    %10 = vector.load %arg3[%c0_7, %c0_8] : memref<768x512xbf16, #tpu.memory_space<vmem>>, vector<768x512xbf16>
    %cst_9 = arith.constant dense<0.000000e+00> : vector<8x512xf32>
    %11 = tpu.matmul %9, %10, %cst_9 {dimension_numbers = #tpu.dot_dimension_numbers<[1], [0], [0], [1], [0, 0, 1, 1], [], []>} : vector<8x768xbf16>, vector<768x512xbf16>, vector<8x512xf32> -> vector<8x512xf32>
    %12 = vector.broadcast %2 : vector<1x512xf32> to vector<8x512xf32>
    %13 = arith.addf %11, %12 : vector<8x512xf32>
    %cst_10 = arith.constant 0.000000e+00 : f32
    %14 = vector.broadcast %cst_10 : f32 to vector<8x512xf32>
    %15 = arith.maximumf %13, %14 : vector<8x512xf32>
    %16 = arith.truncf %15 : vector<8x512xf32> to vector<8x512xbf16>
    %c0_11 = arith.constant 0 : index
    %c0_12 = arith.constant 0 : index
    %17 = vector.load %arg4[%c0_11, %c0_12] : memref<512x128xbf16, #tpu.memory_space<vmem>>, vector<512x128xbf16>
    %cst_13 = arith.constant dense<0.000000e+00> : vector<8x128xf32>
    %18 = tpu.matmul %16, %17, %cst_13 {dimension_numbers = #tpu.dot_dimension_numbers<[1], [0], [0], [1], [0, 0, 1, 1], [], []>} : vector<8x512xbf16>, vector<512x128xbf16>, vector<8x128xf32> -> vector<8x128xf32>
    %19 = vector.broadcast %3 : vector<1x128xf32> to vector<8x128xf32>
    %20 = arith.addf %18, %19 : vector<8x128xf32>
    %c0_14 = arith.constant 0 : index
    %c0_15 = arith.constant 0 : index
    %21 = vector.load %arg7[%c0_14, %c0_15] : memref<8x128xf32, #tpu.memory_space<vmem>>, vector<8x128xf32>
    tpu.vector_store %arg7[%c0_14, %c0_15], %20 {strides = array<i32>} : memref<8x128xf32, #tpu.memory_space<vmem>>, vector<8x128xf32>,
    %c0_16 = arith.constant 0 : index
    %c0_17 = arith.constant 0 : index
    %22 = vector.load %arg6[%c0_16, %c0_17] : memref<8x1xi32, #tpu.memory_space<vmem>>, vector<8x1xi32>
    %23 = tpu.iota {dimensions = array<i32: 1>} : vector<8x128xi32>
    %c2_i32 = arith.constant 2 : i32
    %24 = vector.broadcast %c2_i32 : i32 to vector<8x128xi32>
    %25 = arith.cmpi slt, %23, %24 : vector<8x128xi32>
    %cst_18 = arith.constant -1.000000e+30 : f32
    %26 = vector.broadcast %cst_18 : f32 to vector<8x128xf32>
    %27 = arith.select %25, %20, %26 : vector<8x128xi1>, vector<8x128xf32>
    %cst_19 = arith.constant dense<0xFF800000> : vector<8xf32>
    %28 = vector.multi_reduction <maximumf>, %27, %cst_19 [1] : vector<8x128xf32> to vector<8xf32>
    %29 = vector.shape_cast %28 : vector<8xf32> to vector<8x1xf32>
    %30 = vector.broadcast %29 : vector<8x1xf32> to vector<8x128xf32>
    %31 = arith.subf %27, %30 : vector<8x128xf32>
    %32 = math.exp %31 : vector<8x128xf32>
    %cst_20 = arith.constant 0.000000e+00 : f32
    %33 = vector.broadcast %cst_20 : f32 to vector<8x128xf32>
    %34 = arith.select %25, %32, %33 : vector<8x128xi1>, vector<8x128xf32>
    %cst_21 = arith.constant dense<0.000000e+00> : vector<8xf32>
    %35 = vector.multi_reduction <add>, %34, %cst_21 [1] : vector<8x128xf32> to vector<8xf32>
    %36 = vector.shape_cast %35 : vector<8xf32> to vector<8x1xf32>
    %37 = math.log %36 : vector<8x1xf32>
    %38 = arith.addf %37, %29 : vector<8x1xf32>
    %39 = vector.broadcast %22 : vector<8x1xi32> to vector<8x128xi32>
    %40 = arith.cmpi eq, %23, %39 : vector<8x128xi32>
    %41 = arith.extui %40 : vector<8x128xi1> to vector<8x128xi32>
    %42 = arith.sitofp %41 : vector<8x128xi32> to vector<8x128xf32>
    %43 = arith.mulf %20, %42 : vector<8x128xf32>
    %cst_22 = arith.constant dense<0.000000e+00> : vector<8xf32>
    %44 = vector.multi_reduction <add>, %43, %cst_22 [1] : vector<8x128xf32> to vector<8xf32>
    %45 = vector.shape_cast %44 : vector<8xf32> to vector<8x1xf32>
    %c0_i32 = arith.constant 0 : i32
    %46 = vector.broadcast %c0_i32 : i32 to vector<8x1xi32>
    %47 = arith.cmpi sge, %22, %46 : vector<8x1xi32>
    %48 = arith.extui %47 : vector<8x1xi1> to vector<8x1xi32>
    %49 = arith.sitofp %48 : vector<8x1xi32> to vector<8x1xf32>
    %50 = arith.subf %38, %45 : vector<8x1xf32>
    %51 = arith.mulf %50, %49 : vector<8x1xf32>
    %52 = vector.shape_cast %51 : vector<8x1xf32> to vector<1x8x1xf32>
    %cst_23 = arith.constant dense<0.000000e+00> : vector<1xf32>
    %53 = vector.multi_reduction <add>, %52, %cst_23 [1, 2] : vector<1x8x1xf32> to vector<1xf32>
    %54 = vector.shape_cast %53 : vector<1xf32> to vector<1x1x1xf32>
    %55 = vector.extract %54[0, 0, 0] : f32 from vector<1x1x1xf32>
    %c0_24 = arith.constant 0 : index
    %c0_25 = arith.constant 0 : index
    %56 = memref.load %arg8[%c0_24, %c0_25] : memref<1x1xf32, #tpu.memory_space<smem>>
    memref.store %55, %arg8[%c0_24, %c0_25] : memref<1x1xf32, #tpu.memory_space<smem>>
    return
  }
  func.func @transform_0(%arg0: i32) -> (i32, i32) {
    %c0_i32 = arith.constant 0 : i32
    %c0_i32_0 = arith.constant 0 : i32
    return %arg0, %c0_i32 : i32, i32
  }
  func.func @transform_1(%arg0: i32) -> (i32, i32) {
    %c0_i32 = arith.constant 0 : i32
    %c0_i32_0 = arith.constant 0 : i32
    %c0_i32_1 = arith.constant 0 : i32
    return %c0_i32, %c0_i32_0 : i32, i32
  }
  func.func @transform_2(%arg0: i32) -> (i32, i32) {
    %c0_i32 = arith.constant 0 : i32
    %c0_i32_0 = arith.constant 0 : i32
    %c0_i32_1 = arith.constant 0 : i32
    return %c0_i32, %c0_i32_0 : i32, i32
  }
  func.func @transform_3(%arg0: i32) -> (i32, i32) {
    %c0_i32 = arith.constant 0 : i32
    %c0_i32_0 = arith.constant 0 : i32
    %c0_i32_1 = arith.constant 0 : i32
    return %c0_i32, %c0_i32_0 : i32, i32
  }
  func.func @transform_4(%arg0: i32) -> (i32, i32) {
    %c0_i32 = arith.constant 0 : i32
    %c0_i32_0 = arith.constant 0 : i32
    %c0_i32_1 = arith.constant 0 : i32
    return %c0_i32, %c0_i32_0 : i32, i32
  }
  func.func @transform_5(%arg0: i32) -> (i32, i32) {
    %c0_i32 = arith.constant 0 : i32
    %c0_i32_0 = arith.constant 0 : i32
    return %arg0, %c0_i32 : i32, i32
  }
  func.func @transform_6(%arg0: i32) -> (i32, i32) {
    %c0_i32 = arith.constant 0 : i32
    %c0_i32_0 = arith.constant 0 : i32
    return %arg0, %c0_i32 : i32, i32
  }
  func.func @transform_7(%arg0: i32) -> (i32, i32) {
    %c0_i32 = arith.constant 0 : i32
    %c0_i32_0 = arith.constant 0 : i32
    return %arg0, %c0_i32 : i32, i32
  }
}

</mosaic_0001>

<bundles_post_ra>
// kernel: tpu_custom_call.1
= control target key start
LH: loop header
LB: loop body
LE: loop exit
PB: predicated region body
PF: predicated region fallthrough
CT: control target
= control target key end

     0   :  { %13 = vsyncpa [#allocation3], 0  ;;  %s7225_s0 = inlined_call_operand.hbm [shape: bf16[8,768], index: 0, kind: input, shape index: {}]   ;;  %s7226_s1 = inlined_call_operand.hbm [shape: bf16[768,768], index: 1, kind: input, shape index: {}]   ;;  %s7227_s2 = inlined_call_operand.hbm [shape: bf16[768,512], index: 2, kind: input, shape index: {}]   ;;  %s7228_s3 = inlined_call_operand.hbm [shape: bf16[512,128], index: 3, kind: input, shape index: {}]   ;;  %s7229_s4 = inlined_call_operand.hbm [shape: f32[1,1408], index: 4, kind: input, shape index: {}]   ;;  %s7230_s5 = inlined_call_operand.vmem [shape: s32[8,1], index: 5, kind: input, shape index: {}]   ;;  %s7231_s6 = inlined_call_operand.hbm [shape: f32[8,128], index: 6, kind: output, shape index: {0}]   ;;  %s7232_s7 = inlined_call_operand.hbm [shape: f32[1,1], index: 7, kind: output, shape index: {1}]  }
   0x1   :  { %14 = vsyncpa [#allocation7], 0 }
   0x2   :  { %15 = vsyncpa [#allocation10], 0 }
   0x3   :  { %16 = vsyncpa [#allocation4], 0  ;;  %s33_s26 = sshll.u32 %s7226_s1, 4  ;;  %s34_s26 = int_to_ptr.hbm [resolvable:$true] %s33_s26 }
   0x4   :  { %17 = vsyncpa [#allocation5], 0  ;;  %s6983_s27 = smov [#allocation6]   ;;  %s59_s8 = sshll.u32 %s7228_s3, 4  ;;  %s60_s8 = int_to_ptr.hbm [resolvable:$true] %s59_s8 }
   0x5   :  { %s35_s28 = sshll.u32 %s6983_s27, 4  ;;  %s6984_s9 = smov 384   ;;  %s36_s28 = int_to_ptr.vmem [resolvable:$true] %s35_s28 }
   0x6   :  { %s6985_s10 = smov 24   ;;  %s6986_s11 = smov [#allocation9]  }
   0x7   :  { %41 = dma.hbm_to_vmem [thread:$0]  %s34_s26, 36864, %s36_s28, [#allocation7], %s6984_s9, %s6984_s9, %s6985_s10  }
   0x8   :  { %s61_s12 = sshll.u32 %s6986_s11, 4  ;;  %s6987_s13 = smov 64   ;;  %s62_s12 = int_to_ptr.vmem [resolvable:$true] %s61_s12 }
   0x9   :  { %s6988_s14 = smov 4   ;;  %s23_s16 = sshll.u32 %s7225_s0, 4  ;;  %s24_s16 = int_to_ptr.hbm [resolvable:$true] %s23_s16 }
   0xa   :  { %67 = dma.hbm_to_vmem [thread:$0]  %s60_s8, 4096, %s62_s12, [#allocation10], %s6987_s13, %s6987_s13, %s6988_s14  }
   0xb   :  { %s6989_s17 = smov [#allocation2]   ;;  %s46_s20 = sshll.u32 %s7227_s2, 4  ;;  %s47_s20 = int_to_ptr.hbm [resolvable:$true] %s46_s20 }
   0xc   :  { %s25_s18 = sshll.u32 %s6989_s17, 4  ;;  %s6990_s21 = smov [#allocation8]   ;;  %s26_s18 = int_to_ptr.vmem [resolvable:$true] %s25_s18 }
   0xd   :  { %28 = dma.hbm_to_vmem [thread:$0]  %s24_s16, 384, %s26_s18, [#allocation3]  }
   0xe   :  { %s48_s22 = sshll.u32 %s6990_s21, 4  ;;  %s6991_s23 = smov 256   ;;  %s49_s22 = int_to_ptr.vmem [resolvable:$true] %s48_s22 }
   0xf   :  { %s6992_s24 = smov 16   ;;  %s73_s0 = sshll.u32 %s7229_s4, 4  ;;  %s74_s0 = int_to_ptr.hbm [resolvable:$true] %s73_s0 }
  0x10   :  { %54 = dma.hbm_to_vmem [thread:$0]  %s47_s20, 24576, %s49_s22, [#allocation7], %s6991_s23, %s6991_s23, %s6992_s24  }
  0x11   :  { %s6993_s27 = smov [#allocation11]  }
  0x12   :  { %s75_s28 = sshll.u32 %s6993_s27, 4  ;;  %s76_s28 = int_to_ptr.vmem [resolvable:$true] %s75_s28 }
  0x13   :  { %78 = dma.hbm_to_vmem [thread:$0]  %s74_s0, 176, %s76_s28, [#allocation10]  }
  0x14   :  { %6973 = dma.done.wait [#allocation3], 384  }
  0x15   :  { %6974 = vsyncadd [#allocation3], 4294966912 }
  0x16   :  { %6975 = dma.done.wait [#allocation7], 61440  }
  0x17   :  { %6976 = vsyncadd [#allocation7], 4294905856 }
  0x18   :  { %6977 = dma.done.wait [#allocation10], 4272  }
  0x19   :  { %6978 = vsyncadd [#allocation10], 4294963024  ;;  %v4389_v0 = vld [vmem:[#allocation6 + $0x150] sm:$0xf]  ;;  %v6314_v1 = vld [vmem:[#allocation6 + $0x164] sm:$0xf0] }
  0x1a   :  { %v4581_v2 = vld [vmem:[#allocation6 + $0x2d0] sm:$0xf]  ;;  %v4390_v3 = vor.u32 %v6314_v1, %v4389_v0  ;;  %v6362_v4 = vld [vmem:[#allocation6 + $0x2e4] sm:$0xf0]  ;;  %v4365_v11 = vld [vmem:[#allocation6 + $0x120] sm:$0xf] }
  0x1b   :  { %v4773_v5 = vld [vmem:[#allocation6 + $0x450] sm:$0xf]  ;;  %v6410_v6 = vld [vmem:[#allocation6 + $0x464] sm:$0xf0]  ;;  %v4582_v7 = vor.u32 %v6362_v4, %v4581_v2  ;;  %v6308_v13 = vld [vmem:[#allocation6 + $0x134] sm:$0xf0] }
  0x1c   :  { %v4774_v8 = vor.u32 %v6410_v6, %v4773_v5  ;;  %v4965_v9 = vld [vmem:[#allocation6 + $0x5d0] sm:$0xf]  ;;  %v6458_v10 = vld [vmem:[#allocation6 + $0x5e4] sm:$0xf0]  ;;  %1869 = vmatpush.bf16.msra.mxu0 %v4390_v3  ;;  %v4557_v14 = vld [vmem:[#allocation6 + $0x2a0] sm:$0xf]  ;;  %v4366_v16 = vor.u32 %v6308_v13, %v4365_v11 }
  0x1d   :  { %v4966_v12 = vor.u32 %v6458_v10, %v4965_v9  ;;  %v6356_v15 = vld [vmem:[#allocation6 + $0x2b4] sm:$0xf0]  ;;  %1882 = vmatpush.bf16.msra.mxu1 %v4582_v7  ;;  %v4749_v18 = vld [vmem:[#allocation6 + $0x420] sm:$0xf]  ;;  %v4341_v23 = vld [vmem:[#allocation6 + $0xf0] sm:$0xf] }
  0x1e   :  { %1895 = vmatpush.bf16.msra.mxu2 %v4774_v8  ;;  %v4558_v17 = vor.u32 %v6356_v15, %v4557_v14  ;;  %v6404_v19 = vld [vmem:[#allocation6 + $0x434] sm:$0xf0]  ;;  %v4941_v20 = vld [vmem:[#allocation6 + $0x5a0] sm:$0xf]  ;;  %v6302_v24 = vld [vmem:[#allocation6 + $0x104] sm:$0xf0] }
  0x1f   :  { %1908 = vmatpush.bf16.msra.mxu3 %v4966_v12  ;;  %v4750_v21 = vor.u32 %v6404_v19, %v4749_v18  ;;  %v6452_v22 = vld [vmem:[#allocation6 + $0x5b4] sm:$0xf0]  ;;  %v4533_v26 = vld [vmem:[#allocation6 + $0x270] sm:$0xf]  ;;  %v6350_v27 = vld [vmem:[#allocation6 + $0x284] sm:$0xf0]  ;;  %v4342_v29 = vor.u32 %v6302_v24, %v4341_v23 }
  0x20   :  { %v4942_v25 = vor.u32 %v6452_v22, %v4941_v20  ;;  %v4725_v28 = vld [vmem:[#allocation6 + $0x3f0] sm:$0xf]  ;;  %1870 = vmatpush.bf16.msra.mxu0 %v4366_v16  ;;  %v6398_v30 = vld [vmem:[#allocation6 + $0x404] sm:$0xf0]  ;;  %v4534_v33 = vor.u32 %v6350_v27, %v4533_v26  ;;  %v4317_v35 = vld [vmem:[#allocation6 + $0xc0] sm:$0xf] }
  0x21   :  { %v4917_v31 = vld [vmem:[#allocation6 + $0x570] sm:$0xf]  ;;  %v6446_v32 = vld [vmem:[#allocation6 + $0x584] sm:$0xf0]  ;;  %1883 = vmatpush.bf16.msra.mxu1 %v4558_v17  ;;  %v4726_v34 = vor.u32 %v6398_v30, %v4725_v28  ;;  %v6296_v36 = vld [vmem:[#allocation6 + $0xd4] sm:$0xf0] }
  0x22   :  { %1896 = vmatpush.bf16.msra.mxu2 %v4750_v21  ;;  %v4509_v37 = vld [vmem:[#allocation6 + $0x240] sm:$0xf]  ;;  %v4918_v38 = vor.u32 %v6446_v32, %v4917_v31  ;;  %v6344_v39 = vld [vmem:[#allocation6 + $0x254] sm:$0xf0]  ;;  %v4318_v44 = vor.u32 %v6296_v36, %v4317_v35  ;;  %v4293_v47 = vld [vmem:[#allocation6 + $0x90] sm:$0xf] }
  0x23   :  { %1909 = vmatpush.bf16.msra.mxu3 %v4942_v25  ;;  %v4701_v40 = vld [vmem:[#allocation6 + $0x3c0] sm:$0xf]  ;;  %v6392_v41 = vld [vmem:[#allocation6 + $0x3d4] sm:$0xf0]  ;;  %v4510_v45 = vor.u32 %v6344_v39, %v4509_v37  ;;  %v6290_v48 = vld [vmem:[#allocation6 + $0xa4] sm:$0xf0] }
  0x24   :  { %v4893_v42 = vld [vmem:[#allocation6 + $0x540] sm:$0xf]  ;;  %v6440_v43 = vld [vmem:[#allocation6 + $0x554] sm:$0xf0]  ;;  %1871 = vmatpush.bf16.msra.mxu0 %v4342_v29  ;;  %v4702_v46 = vor.u32 %v6392_v41, %v4701_v40  ;;  %v4485_v49 = vld [vmem:[#allocation6 + $0x210] sm:$0xf]  ;;  %v4294_v56 = vor.u32 %v6290_v48, %v4293_v47 }
  0x25   :  { %1884 = vmatpush.bf16.msra.mxu1 %v4534_v33  ;;  %v4894_v50 = vor.u32 %v6440_v43, %v4893_v42  ;;  %v6338_v51 = vld [vmem:[#allocation6 + $0x224] sm:$0xf0]  ;;  %v4677_v52 = vld [vmem:[#allocation6 + $0x390] sm:$0xf]  ;;  %v4269_v59 = vld [vmem:[#allocation6 + $0x60] sm:$0xf] }
  0x26   :  { %1897 = vmatpush.bf16.msra.mxu2 %v4726_v34  ;;  %v6386_v53 = vld [vmem:[#allocation6 + $0x3a4] sm:$0xf0]  ;;  %v4869_v54 = vld [vmem:[#allocation6 + $0x510] sm:$0xf]  ;;  %v4486_v57 = vor.u32 %v6338_v51, %v4485_v49  ;;  %v6284_v60 = vld [vmem:[#allocation6 + $0x74] sm:$0xf0] }
  0x27   :  { %1910 = vmatpush.bf16.msra.mxu3 %v4918_v38  ;;  %v6434_v55 = vld [vmem:[#allocation6 + $0x524] sm:$0xf0]  ;;  %v4678_v58 = vor.u32 %v6386_v53, %v4677_v52  ;;  %v4461_v61 = vld [vmem:[#allocation6 + $0x1e0] sm:$0xf]  ;;  %v6332_v63 = vld [vmem:[#allocation6 + $0x1f4] sm:$0xf0]  ;;  %v4270_v4 = vor.u32 %v6284_v60, %v4269_v59 }
  0x28   :  { %1872 = vmatpush.bf16.msra.mxu0 %v4318_v44  ;;  %v4870_v62 = vor.u32 %v6434_v55, %v4869_v54  ;;  %v4653_v0 = vld [vmem:[#allocation6 + $0x360] sm:$0xf]  ;;  %v6380_v1 = vld [vmem:[#allocation6 + $0x374] sm:$0xf0]  ;;  %v4462_v5 = vor.u32 %v6332_v63, %v4461_v61  ;;  %v4245_v7 = vld [vmem:[#allocation6 + $0x30] sm:$0xf] }
  0x29   :  { %1885 = vmatpush.bf16.msra.mxu1 %v4510_v45  ;;  %v4845_v2 = vld [vmem:[#allocation6 + $0x4e0] sm:$0xf]  ;;  %v6428_v3 = vld [vmem:[#allocation6 + $0x4f4] sm:$0xf0]  ;;  %v4654_v6 = vor.u32 %v6380_v1, %v4653_v0  ;;  %v6278_v8 = vld [vmem:[#allocation6 + $0x44] sm:$0xf0] }
  0x2a   :  { %1898 = vmatpush.bf16.msra.mxu2 %v4702_v46  ;;  %v4437_v9 = vld [vmem:[#allocation6 + $0x1b0] sm:$0xf]  ;;  %v4846_v10 = vor.u32 %v6428_v3, %v4845_v2  ;;  %v6326_v11 = vld [vmem:[#allocation6 + $0x1c4] sm:$0xf0]  ;;  %v4246_v16 = vor.u32 %v6278_v8, %v4245_v7  ;;  %v4221_v17 = vld [vmem:[#allocation6] sm:$0xf] }
  0x2b   :  { %1911 = vmatpush.bf16.msra.mxu3 %v4894_v50  ;;  %v4629_v12 = vld [vmem:[#allocation6 + $0x330] sm:$0xf]  ;;  %v6374_v13 = vld [vmem:[#allocation6 + $0x344] sm:$0xf0]  ;;  %v6272_v18 = vld [vmem:[#allocation6 + $0x14] sm:$0xf0]  ;;  %v4438_v19 = vor.u32 %v6326_v11, %v4437_v9 }
  0x2c   :  { %1873 = vmatpush.bf16.msra.mxu0 %v4294_v56  ;;  %v4821_v14 = vld [vmem:[#allocation6 + $0x4b0] sm:$0xf]  ;;  %v6422_v15 = vld [vmem:[#allocation6 + $0x4c4] sm:$0xf0]  ;;  %v4630_v20 = vor.u32 %v6374_v13, %v4629_v12  ;;  %v4413_v21 = vld [vmem:[#allocation6 + $0x180] sm:$0xf]  ;;  %v4222_v31 = vor.u32 %v6272_v18, %v4221_v17 }
  0x2d   :  { %1886 = vmatpush.bf16.msra.mxu1 %v4486_v57  ;;  %v6320_v22 = vld [vmem:[#allocation6 + $0x194] sm:$0xf0]  ;;  %v4605_v23 = vld [vmem:[#allocation6 + $0x300] sm:$0xf]  ;;  %v4822_v24 = vor.u32 %v6422_v15, %v4821_v14  ;;  %v5157_v28 = vld [vmem:[#allocation6 + $0x750] sm:$0xf] }
  0x2e   :  { %1899 = vmatpush.bf16.msra.mxu2 %v4678_v58  ;;  %v6368_v25 = vld [vmem:[#allocation6 + $0x314] sm:$0xf0]  ;;  %v4797_v26 = vld [vmem:[#allocation6 + $0x480] sm:$0xf]  ;;  %v6506_v29 = vld [vmem:[#allocation6 + $0x764] sm:$0xf0]  ;;  %v4414_v35 = vor.u32 %v6320_v22, %v4413_v21 }
  0x2f   :  { %1912 = vmatpush.bf16.msra.mxu3 %v4870_v62  ;;  %v6416_v27 = vld [vmem:[#allocation6 + $0x494] sm:$0xf0]  ;;  %v5349_v30 = vld [vmem:[#allocation6 + $0x8d0] sm:$0xf]  ;;  %v6554_v32 = vld [vmem:[#allocation6 + $0x8e4] sm:$0xf0]  ;;  %v4606_v36 = vor.u32 %v6368_v25, %v4605_v23  ;;  %v5158_v40 = vor.u32 %v6506_v29, %v5157_v28 }
  0x30   :  { %1874 = vmatpush.bf16.msra.mxu0 %v4270_v4  ;;  %v6311_v33 = vld [vmem:[#allocation6 + $0x154] sm:$0xf]  ;;  %v4391_v34 = vld [vmem:[#allocation6 + $0x168] sm:$0xf0]  ;;  %v4798_v39 = vor.u32 %v6416_v27, %v4797_v26  ;;  %v5350_v41 = vor.u32 %v6554_v32, %v5349_v30  ;;  %v5133_v43 = vld [vmem:[#allocation6 + $0x720] sm:$0xf] }
  0x31   :  { %1887 = vmatpush.bf16.msra.mxu1 %v4462_v5  ;;  %v6359_v37 = vld [vmem:[#allocation6 + $0x2d4] sm:$0xf]  ;;  %v4583_v38 = vld [vmem:[#allocation6 + $0x2e8] sm:$0xf0]  ;;  %v4394_v42 = vor.u32 %v6311_v33, %v4391_v34  ;;  %v6500_v44 = vld [vmem:[#allocation6 + $0x734] sm:$0xf0] }
  0x32   :  { %1900 = vmatpush.bf16.msra.mxu2 %v4654_v6  ;;  %v5325_v45 = vld [vmem:[#allocation6 + $0x8a0] sm:$0xf]  ;;  %v4586_v46 = vor.u32 %v6359_v37, %v4583_v38  ;;  %v6548_v47 = vld [vmem:[#allocation6 + $0x8b4] sm:$0xf0]  ;;  %v6305_v48 = vld [vmem:[#allocation6 + $0x124] sm:$0xf]  ;;  %v5134_v52 = vor.u32 %v6500_v44, %v5133_v43 }
  0x33   :  { %1913 = vmatpush.bf16.msra.mxu3 %v4846_v10  ;;  %v4367_v49 = vld [vmem:[#allocation6 + $0x138] sm:$0xf0]  ;;  %v6353_v50 = vld [vmem:[#allocation6 + $0x2a4] sm:$0xf]  ;;  %v5109_v53 = vld [vmem:[#allocation6 + $0x6f0] sm:$0xf]  ;;  %v5326_v54 = vor.u32 %v6548_v47, %v5325_v45 }
  0x34   :  { %1875 = vmatpush.bf16.msra.mxu0 %v4246_v16  ;;  %v4559_v51 = vld [vmem:[#allocation6 + $0x2b8] sm:$0xf0]  ;;  %v4370_v55 = vor.u32 %v6305_v48, %v4367_v49  ;;  %v6494_v56 = vld [vmem:[#allocation6 + $0x704] sm:$0xf0]  ;;  %v5301_v57 = vld [vmem:[#allocation6 + $0x870] sm:$0xf] }
  0x35   :  { %1888 = vmatpush.bf16.msra.mxu1 %v4438_v19  ;;  %v6542_v58 = vld [vmem:[#allocation6 + $0x884] sm:$0xf0]  ;;  %v4562_v59 = vor.u32 %v6353_v50, %v4559_v51  ;;  %v6299_v60 = vld [vmem:[#allocation6 + $0xf4] sm:$0xf]  ;;  %v4343_v61 = vld [vmem:[#allocation6 + $0x108] sm:$0xf0]  ;;  %v5110_v0 = vor.u32 %v6494_v56, %v5109_v53 }
  0x36   :  { %1901 = vmatpush.bf16.msra.mxu2 %v4630_v20  ;;  %v6347_v62 = vld [vmem:[#allocation6 + $0x274] sm:$0xf]  ;;  %v4535_v63 = vld [vmem:[#allocation6 + $0x288] sm:$0xf0]  ;;  %v5302_v1 = vor.u32 %v6542_v58, %v5301_v57  ;;  %v4346_v4 = vor.u32 %v6299_v60, %v4343_v61  ;;  %v5085_v5 = vld [vmem:[#allocation6 + $0x6c0] sm:$0xf] }
  0x37   :  { %1914 = vmatpush.bf16.msra.mxu3 %v4822_v24  ;;  %v102_v2 = vld [vmem:[#allocation2 + $0x8] sm:$0xff]  ;;  %v101_v3 = vld [vmem:[#allocation2] sm:$0xff]  ;;  %v6488_v6 = vld [vmem:[#allocation6 + $0x6d4] sm:$0xf0]  ;;  %v4538_v11 = vor.u32 %v6347_v62, %v4535_v63  ;;  %vm4172_vm3 = vcmask 7168   ;;  %s4192_s9 = sshll.u32 %s7231_s6, 4  ;;  %s4193_s9 = int_to_ptr.hbm [resolvable:$true] %s4192_s9 }
  0x38   :  { %1876 = vmatpush.bf16.msra.mxu0 %v4222_v31  ;;  %v5277_v7 = vld [vmem:[#allocation6 + $0x840] sm:$0xf]  ;;  %v413_v8 = vunpack.c.l.b16 %v102_v2  ;;  %v411_v9 = vunpack.c.l.b16 %v101_v3  ;;  %v414_v10 = vunpack.c.h.b16 %v102_v2  ;;  %v6536_v12 = vld [vmem:[#allocation6 + $0x854] sm:$0xf0]  ;;  %v6293_v13 = vld [vmem:[#allocation6 + $0xc4] sm:$0xf]  ;;  %v412_v15 = vunpack.c.h.b16 %v101_v3 }
  0x39   :  { %1889 = vmatpush.bf16.msra.mxu1 %v4414_v35  ;;  %v4319_v14 = vld [vmem:[#allocation6 + $0xd8] sm:$0xf0]  ;;  %v6341_v16 = vld [vmem:[#allocation6 + $0x244] sm:$0xf]  ;;  %v5086_v21 = vor.u32 %v6488_v6, %v5085_v5  ;;  %v5278_v23 = vor.u32 %v6536_v12, %v5277_v7  ;;  %v5061_v25 = vld [vmem:[#allocation6 + $0x690] sm:$0xf] }
  0x3a   :  { %1902 = vmatpush.bf16.msra.mxu2 %v4606_v36  ;;  %v4511_v17 = vld [vmem:[#allocation6 + $0x258] sm:$0xf0]  ;;  %v7053_v18 = vpack.c.b16 %v413_v8, %v413_v8  ;;  %v7055_v19 = vpack.c.b16 %v411_v9, %v411_v9  ;;  %v7057_v20 = vpack.c.b16 %v414_v10, %v414_v10  ;;  %v7059_v22 = vpack.c.b16 %v412_v15, %v412_v15  ;;  %v6482_v26 = vld [vmem:[#allocation6 + $0x6a4] sm:$0xf0]  ;;  %v5253_v27 = vld [vmem:[#allocation6 + $0x810] sm:$0xf] }
  0x3b   :  { %1915 = vmatpush.bf16.msra.mxu3 %v4798_v39  ;;  %v4322_v24 = vor.u32 %v6293_v13, %v4319_v14  ;;  %v4514_v28 = vor.u32 %v6341_v16, %v4511_v17  ;;  %v6530_v29 = vld [vmem:[#allocation6 + $0x824] sm:$0xf0]  ;;  %v6287_v30 = vld [vmem:[#allocation6 + $0x94] sm:$0xf]  ;;  %v4295_v31 = vld [vmem:[#allocation6 + $0xa8] sm:$0xf0]  ;;  %v5062_v34 = vor.u32 %v6482_v26, %v5061_v25 }
  0x3c   :  { %1921 = vmatpush.bf16.msrb.mxu0 %v5158_v40  ;;  %v6335_v32 = vld [vmem:[#allocation6 + $0x214] sm:$0xf]  ;;  %v4487_v33 = vld [vmem:[#allocation6 + $0x228] sm:$0xf0]  ;;  %1890 = vmatmul.bf16.vlgmr.msra.gmra.mxu1 %v7059_v22  ;;  %v5254_v35 = vor.u32 %v6530_v29, %v5253_v27  ;;  %v4298_v36 = vor.u32 %v6287_v30, %v4295_v31  ;;  %v5037_v37 = vld [vmem:[#allocation6 + $0x660] sm:$0xf] }
  0x3d   :  { %1934 = vmatpush.bf16.msrb.mxu1 %v5350_v41  ;;  %1903 = vmatmul.bf16.vlgmr.msra.gmra.mxu2 %v7053_v18  ;;  %v6476_v38 = vld [vmem:[#allocation6 + $0x674] sm:$0xf0]  ;;  %v5229_v39 = vld [vmem:[#allocation6 + $0x7e0] sm:$0xf]  ;;  %v4490_v40 = vor.u32 %v6335_v32, %v4487_v33  ;;  %v4271_v43 = vld [vmem:[#allocation6 + $0x78] sm:$0xf0] }
  0x3e   :  { %1947 = vmatpush.bf16.msrb.mxu2 %v4394_v42  ;;  %1877 = vmatmul.bf16.vlgmr.msra.gmra.mxu0 %v7055_v19  ;;  %v6524_v41 = vld [vmem:[#allocation6 + $0x7f4] sm:$0xf0]  ;;  %v6281_v42 = vld [vmem:[#allocation6 + $0x64] sm:$0xf]  ;;  %v4463_v45 = vld [vmem:[#allocation6 + $0x1f8] sm:$0xf0] }
  0x3f   :  { %1960 = vmatpush.bf16.msrb.mxu3 %v4586_v46  ;;  %v6329_v44 = vld [vmem:[#allocation6 + $0x1e4] sm:$0xf]  ;;  %v5038_v46 = vor.u32 %v6476_v38, %v5037_v37  ;;  %v5230_v47 = vor.u32 %v6524_v41, %v5229_v39  ;;  %v4274_v48 = vor.u32 %v6281_v42, %v4271_v43  ;;  %v5013_v49 = vld [vmem:[#allocation6 + $0x630] sm:$0xf]  ;;  %v6470_v50 = vld [vmem:[#allocation6 + $0x644] sm:$0xf0] }
  0x40   :  { %1922 = vmatpush.bf16.msrb.mxu0 %v5134_v52  ;;  %1916 = vmatmul.bf16.vlgmr.msra.gmra.mxu3 %v7057_v20  ;;  %v5205_v51 = vld [vmem:[#allocation6 + $0x7b0] sm:$0xf]  ;;  %v4466_v52 = vor.u32 %v6329_v44, %v4463_v45  ;;  %v6518_v53 = vld [vmem:[#allocation6 + $0x7c4] sm:$0xf0]  ;;  %v6323_v56 = vld [vmem:[#allocation6 + $0x1b4] sm:$0xf]  ;;  %v5014_v58 = vor.u32 %v6470_v50, %v5013_v49 }
  0x41   :  { %1935 = vmatpush.bf16.msrb.mxu1 %v5326_v54  ;;  %v6275_v54 = vld [vmem:[#allocation6 + $0x34] sm:$0xf]  ;;  %v4439_v57 = vld [vmem:[#allocation6 + $0x1c8] sm:$0xf0]  ;;  %v6464_v60 = vld [vmem:[#allocation6 + $0x614] sm:$0xf0]  ;;  %v5206_v62 = vor.u32 %v6518_v53, %v5205_v51 }
  0x42   :  { %1948 = vmatpush.bf16.msrb.mxu2 %v4370_v55  ;;  %v4247_v55 = vld [vmem:[#allocation6 + $0x48] sm:$0xf0]  ;;  %v5181_v61 = vld [vmem:[#allocation6 + $0x780] sm:$0xf]  ;;  %v103_v2 = vld [vmem:[#allocation2 + $0x10] sm:$0xff]  ;;  %v4442_v3 = vor.u32 %v6323_v56, %v4439_v57  ;;  %s4201_s12 = sshll.u32 %s7232_s7, 4  ;;  %s4202_s12 = int_to_ptr.hbm [resolvable:$true] %s4201_s12 }
  0x43   :  { %1961 = vmatpush.bf16.msrb.mxu3 %v4562_v59  ;;  %v4989_v59 = vld [vmem:[#allocation6 + $0x600] sm:$0xf]  ;;  %v4250_v63 = vor.u32 %v6275_v54, %v4247_v55  ;;  %v6317_v5 = vld [vmem:[#allocation6 + $0x184] sm:$0xf]  ;;  %v4415_v6 = vld [vmem:[#allocation6 + $0x198] sm:$0xf0]  ;;  %v415_v14 = vunpack.c.l.b16 %v103_v2 }
  0x44   :  { %1923 = vmatpush.bf16.msrb.mxu0 %v5110_v0  ;;  %v6512_v0 = vld [vmem:[#allocation6 + $0x794] sm:$0xf0]  ;;  %v6407_v7 = vld [vmem:[#allocation6 + $0x454] sm:$0xf]  ;;  %v4775_v8 = vld [vmem:[#allocation6 + $0x468] sm:$0xf0]  ;;  %v4990_v10 = vor.u32 %v6464_v60, %v4989_v59 }
  0x45   :  { %1936 = vmatpush.bf16.msrb.mxu1 %v5302_v1  ;;  %v6269_v1 = vld [vmem:[#allocation6 + $0x4] sm:$0xf]  ;;  %v6455_v9 = vld [vmem:[#allocation6 + $0x5d4] sm:$0xf]  ;;  %v5159_v13 = vld [vmem:[#allocation6 + $0x768] sm:$0xf0]  ;;  %v5182_v15 = vor.u32 %v6512_v0, %v5181_v61  ;;  %v4778_v25 = vor.u32 %v6407_v7, %v4775_v8 }
  0x46   :  { %1949 = vmatpush.bf16.msrb.mxu2 %v4346_v4  ;;  %v4223_v4 = vld [vmem:[#allocation6 + $0x18] sm:$0xf0]  ;;  %v6503_v12 = vld [vmem:[#allocation6 + $0x754] sm:$0xf]  ;;  %v6449_v30 = vld [vmem:[#allocation6 + $0x5a4] sm:$0xf] }
  0x47   :  { %1962 = vmatpush.bf16.msrb.mxu3 %v4538_v11  ;;  %v4967_v11 = vld [vmem:[#allocation6 + $0x5e8] sm:$0xf0]  ;;  %v4226_v16 = vor.u32 %v6269_v1, %v4223_v4  ;;  %v6551_v17 = vld [vmem:[#allocation6 + $0x8d4] sm:$0xf]  ;;  %v5162_v27 = vor.u32 %v6503_v12, %v5159_v13  ;;  %v4751_v29 = vld [vmem:[#allocation6 + $0x438] sm:$0xf0] }
  0x48   :  { %1924 = vmatpush.bf16.msrb.mxu0 %v5086_v21  ;;  %v5351_v21 = vld [vmem:[#allocation6 + $0x8e8] sm:$0xf0]  ;;  %v4970_v26 = vor.u32 %v6455_v9, %v4967_v11  ;;  %v4943_v32 = vld [vmem:[#allocation6 + $0x5b8] sm:$0xf0]  ;;  %v6497_v33 = vld [vmem:[#allocation6 + $0x724] sm:$0xf] }
  0x49   :  { %1937 = vmatpush.bf16.msrb.mxu1 %v5278_v23  ;;  %v416_v23 = vunpack.c.h.b16 %v103_v2  ;;  %v5354_v31 = vor.u32 %v6551_v17, %v5351_v21  ;;  %v5327_v37 = vld [vmem:[#allocation6 + $0x8b8] sm:$0xf0]  ;;  %v6395_v42 = vld [vmem:[#allocation6 + $0x3f4] sm:$0xf]  ;;  %v4727_v43 = vld [vmem:[#allocation6 + $0x408] sm:$0xf0] }
  0x4a   :  { %1950 = vmatpush.bf16.msrb.mxu2 %v4322_v24  ;;  %v4418_v24 = vor.u32 %v6317_v5, %v4415_v6  ;;  %v6443_v44 = vld [vmem:[#allocation6 + $0x574] sm:$0xf]  ;;  %v5303_v50 = vld [vmem:[#allocation6 + $0x888] sm:$0xf0]  ;;  %v4730_v51 = vor.u32 %v6395_v42, %v4727_v43  ;;  %v6389_v54 = vld [vmem:[#allocation6 + $0x3c4] sm:$0xf] }
  0x4b   :  { %1963 = vmatpush.bf16.msrb.mxu3 %v4514_v28  ;;  %v6401_v28 = vld [vmem:[#allocation6 + $0x424] sm:$0xf]  ;;  %v7067_v38 = vpack.c.b16 %v416_v23, %v416_v23  ;;  %v6539_v49 = vld [vmem:[#allocation6 + $0x874] sm:$0xf]  ;;  %v4703_v55 = vld [vmem:[#allocation6 + $0x3d8] sm:$0xf0] }
  0x4c   :  { %1925 = vmatpush.bf16.msrb.mxu0 %v5062_v34  ;;  %v5135_v34 = vld [vmem:[#allocation6 + $0x738] sm:$0xf0]  ;;  %v4754_v39 = vor.u32 %v6401_v28, %v4751_v29  ;;  %v6437_v56 = vld [vmem:[#allocation6 + $0x544] sm:$0xf]  ;;  %v5306_v57 = vor.u32 %v6539_v49, %v5303_v50  ;;  %v6383_v2 = vld [vmem:[#allocation6 + $0x394] sm:$0xf] }
  0x4d   :  { %1938 = vmatpush.bf16.msrb.mxu1 %v5254_v35  ;;  %v7065_v35 = vpack.c.b16 %v415_v14, %v415_v14  ;;  %v5138_v41 = vor.u32 %v6497_v33, %v5135_v34  ;;  %v6485_v59 = vld [vmem:[#allocation6 + $0x6c4] sm:$0xf]  ;;  %v5087_v60 = vld [vmem:[#allocation6 + $0x6d8] sm:$0xf0]  ;;  %v6431_v4 = vld [vmem:[#allocation6 + $0x514] sm:$0xf] }
  0x4e   :  { %1951 = vmatpush.bf16.msrb.mxu2 %v4298_v36  ;;  %v6545_v36 = vld [vmem:[#allocation6 + $0x8a4] sm:$0xf]  ;;  %v5090_v1 = vor.u32 %v6485_v59, %v5087_v60  ;;  %v4871_v6 = vld [vmem:[#allocation6 + $0x528] sm:$0xf0]  ;;  %v6479_v7 = vld [vmem:[#allocation6 + $0x694] sm:$0xf] }
  0x4f   :  { %1964 = vmatpush.bf16.msrb.mxu3 %v4490_v40  ;;  %v4946_v40 = vor.u32 %v6449_v30, %v4943_v32  ;;  %v5330_v45 = vor.u32 %v6545_v36, %v5327_v37  ;;  %v6533_v61 = vld [vmem:[#allocation6 + $0x844] sm:$0xf]  ;;  %v5063_v8 = vld [vmem:[#allocation6 + $0x6a8] sm:$0xf0]  ;;  %v6527_v9 = vld [vmem:[#allocation6 + $0x814] sm:$0xf]  ;;  %v4874_v12 = vor.u32 %v6431_v4, %v4871_v6 }
  0x50   :  { %1926 = vmatpush.bf16.msrb.mxu0 %v5038_v46  ;;  %v4919_v46 = vld [vmem:[#allocation6 + $0x588] sm:$0xf0]  ;;  %v5066_v13 = vor.u32 %v6479_v7, %v5063_v8  ;;  %v6377_v14 = vld [vmem:[#allocation6 + $0x364] sm:$0xf]  ;;  %v4847_v21 = vld [vmem:[#allocation6 + $0x4f8] sm:$0xf0] }
  0x51   :  { %1939 = vmatpush.bf16.msrb.mxu1 %v5230_v47  ;;  %v6491_v47 = vld [vmem:[#allocation6 + $0x6f4] sm:$0xf]  ;;  %v6473_v23 = vld [vmem:[#allocation6 + $0x664] sm:$0xf]  ;;  %v4823_v34 = vld [vmem:[#allocation6 + $0x4c8] sm:$0xf0] }
  0x52   :  { %1952 = vmatpush.bf16.msrb.mxu2 %v4274_v48  ;;  %v5111_v48 = vld [vmem:[#allocation6 + $0x708] sm:$0xf0]  ;;  %v6371_v30 = vld [vmem:[#allocation6 + $0x334] sm:$0xf]  ;;  %v6365_v42 = vld [vmem:[#allocation6 + $0x304] sm:$0xf] }
  0x53   :  { %1965 = vmatpush.bf16.msrb.mxu3 %v4466_v52  ;;  %v4922_v52 = vor.u32 %v6443_v44, %v4919_v46  ;;  %v5114_v53 = vor.u32 %v6491_v47, %v5111_v48  ;;  %v6419_v32 = vld [vmem:[#allocation6 + $0x4b4] sm:$0xf]  ;;  %v5015_v37 = vld [vmem:[#allocation6 + $0x648] sm:$0xf0]  ;;  %v4607_v43 = vld [vmem:[#allocation6 + $0x318] sm:$0xf0] }
  0x54   :  { %1927 = vmatpush.bf16.msrb.mxu0 %v5014_v58  ;;  %v4895_v58 = vld [vmem:[#allocation6 + $0x558] sm:$0xf0]  ;;  %v6467_v36 = vld [vmem:[#allocation6 + $0x634] sm:$0xf]  ;;  %v4826_v44 = vor.u32 %v6419_v32, %v4823_v34  ;;  %v6413_v46 = vld [vmem:[#allocation6 + $0x484] sm:$0xf] }
  0x55   :  { %1940 = vmatpush.bf16.msrb.mxu1 %v5206_v62  ;;  %v5279_v62 = vld [vmem:[#allocation6 + $0x858] sm:$0xf0]  ;;  %v4898_v0 = vor.u32 %v6437_v56, %v4895_v58  ;;  %v6461_v48 = vld [vmem:[#allocation6 + $0x604] sm:$0xf]  ;;  %v4610_v56 = vor.u32 %v6365_v42, %v4607_v43  ;;  %v4781_v58 = vld [vmem:[#allocation6 + $0x458] sm:$0xf] }
  0x56   :  { %1953 = vmatpush.bf16.msrb.mxu2 %v4250_v63  ;;  %v4706_v63 = vor.u32 %v6389_v54, %v4703_v55  ;;  %v5282_v5 = vor.u32 %v6533_v61, %v5279_v62  ;;  %v4799_v47 = vld [vmem:[#allocation6 + $0x498] sm:$0xf0]  ;;  %v6315_v54 = vld [vmem:[#allocation6 + $0x16c] sm:$0xf0]  ;;  %v4589_v55 = vld [vmem:[#allocation6 + $0x2d8] sm:$0xf] }
  0x57   :  { %1966 = vmatpush.bf16.msrb.mxu3 %v4442_v3  ;;  %v4679_v3 = vld [vmem:[#allocation6 + $0x3a8] sm:$0xf0]  ;;  %v4991_v50 = vld [vmem:[#allocation6 + $0x618] sm:$0xf0]  ;;  %v6411_v59 = vld [vmem:[#allocation6 + $0x46c] sm:$0xf0]  ;;  %v4802_v60 = vor.u32 %v6413_v46, %v4799_v47 }
  0x58   :  { %1928 = vmatpush.bf16.msrb.mxu0 %v4990_v10  ;;  %v5255_v10 = vld [vmem:[#allocation6 + $0x828] sm:$0xf0]  ;;  %v4682_v11 = vor.u32 %v6383_v2, %v4679_v3  ;;  %v4994_v61 = vor.u32 %v6461_v48, %v4991_v50  ;;  %v4973_v62 = vld [vmem:[#allocation6 + $0x5d8] sm:$0xf]  ;;  %v4782_v3 = vor.u32 %v6411_v59, %v4781_v58  ;;  %v4373_v4 = vld [vmem:[#allocation6 + $0x128] sm:$0xf] }
  0x59   :  { %1941 = vmatpush.bf16.msrb.mxu1 %v5182_v15  ;;  %v4655_v15 = vld [vmem:[#allocation6 + $0x378] sm:$0xf0]  ;;  %v5258_v17 = vor.u32 %v6527_v9, %v5255_v10  ;;  %v4565_v6 = vld [vmem:[#allocation6 + $0x2a8] sm:$0xf]  ;;  %v6357_v8 = vld [vmem:[#allocation6 + $0x2bc] sm:$0xf0] }
  0x5a   :  { %1954 = vmatpush.bf16.msrb.mxu2 %v4226_v16  ;;  %v6425_v16 = vld [vmem:[#allocation6 + $0x4e4] sm:$0xf]  ;;  %v4757_v9 = vld [vmem:[#allocation6 + $0x428] sm:$0xf]  ;;  %v6405_v10 = vld [vmem:[#allocation6 + $0x43c] sm:$0xf0] }
  0x5b   :  { %1967 = vmatpush.bf16.msrb.mxu3 %v4418_v24  ;;  %1929 = vmatmul.bf16.vlgmr.msrb.gmra.mxu0 %v7065_v35  ;;  %v5039_v24 = vld [vmem:[#allocation6 + $0x678] sm:$0xf0]  ;;  %v4850_v28 = vor.u32 %v6425_v16, %v4847_v21  ;;  %v4349_v16 = vld [vmem:[#allocation6 + $0xf8] sm:$0xf]  ;;  %v4325_v32 = vld [vmem:[#allocation6 + $0xc8] sm:$0xf] }
  0x5c   :  { %1973 = vmatpush.bf16.msra.mxu0 %v4778_v25  ;;  %1942 = vmatmul.bf16.vlgmr.msrb.gmra.mxu1 %v7067_v38  ;;  %v6521_v25 = vld [vmem:[#allocation6 + $0x7e4] sm:$0xf]  ;;  %v5042_v29 = vor.u32 %v6473_v23, %v5039_v24  ;;  %v4541_v21 = vld [vmem:[#allocation6 + $0x278] sm:$0xf]  ;;  %v6351_v24 = vld [vmem:[#allocation6 + $0x28c] sm:$0xf0] }
  0x5d   :  { %1986 = vmatpush.bf16.msra.mxu1 %v4970_v26  ;;  %1955 = vmatmul.bf16.vlgmr.msrb.gmra.mxu2 %v7055_v19  ;;  %v5231_v26 = vld [vmem:[#allocation6 + $0x7f8] sm:$0xf0]  ;;  %v4517_v34 = vld [vmem:[#allocation6 + $0x248] sm:$0xf]  ;;  %v6441_v42 = vld [vmem:[#allocation6 + $0x55c] sm:$0xf0] }
  0x5e   :  { %1999 = vmatpush.bf16.msra.mxu2 %v5162_v27  ;;  %1968 = vmatmul.bf16.vlgmr.msrb.gmra.mxu3 %v7059_v22  ;;  %v4658_v27 = vor.u32 %v6377_v14, %v4655_v15  ;;  %v5234_v33 = vor.u32 %v6521_v25, %v5231_v26  ;;  %v4566_v14 = vor.u32 %v6357_v8, %v4565_v6  ;;  %v4733_v25 = vld [vmem:[#allocation6 + $0x3f8] sm:$0xf]  ;;  %v6399_v26 = vld [vmem:[#allocation6 + $0x40c] sm:$0xf0]  ;;  %v4277_v58 = vld [vmem:[#allocation6 + $0x68] sm:$0xf] }
  0x5f   :  { %2012 = vmatpush.bf16.msra.mxu3 %v5354_v31  ;;  %v4631_v31 = vld [vmem:[#allocation6 + $0x348] sm:$0xf0]  ;;  %v4758_v15 = vor.u32 %v6405_v10, %v4757_v9  ;;  %v4301_v46 = vld [vmem:[#allocation6 + $0x98] sm:$0xf]  ;;  %v6291_v47 = vld [vmem:[#allocation6 + $0xac] sm:$0xf0] }
  0x60   :  { %1974 = vmatpush.bf16.msra.mxu0 %v4754_v39  ;;  %v6515_v39 = vld [vmem:[#allocation6 + $0x7b4] sm:$0xf]  ;;  %v4493_v48 = vld [vmem:[#allocation6 + $0x218] sm:$0xf]  ;;  %v6339_v50 = vld [vmem:[#allocation6 + $0x22c] sm:$0xf0] }
  0x61   :  { %1987 = vmatpush.bf16.msra.mxu1 %v4946_v40  ;;  %v5207_v40 = vld [vmem:[#allocation6 + $0x7c8] sm:$0xf0]  ;;  %v6285_v59 = vld [vmem:[#allocation6 + $0x7c] sm:$0xf0]  ;;  %v4253_v6 = vld [vmem:[#allocation6 + $0x38] sm:$0xf] }
  0x62   :  { %2000 = vmatpush.bf16.msra.mxu2 %v5138_v41  ;;  %v4634_v41 = vor.u32 %v6371_v30, %v4631_v31  ;;  %v5210_v49 = vor.u32 %v6515_v39, %v5207_v40  ;;  %v4542_v30 = vor.u32 %v6351_v24, %v4541_v21  ;;  %v4734_v31 = vor.u32 %v6399_v26, %v4733_v25  ;;  %v4709_v39 = vld [vmem:[#allocation6 + $0x3c8] sm:$0xf]  ;;  %v6393_v40 = vld [vmem:[#allocation6 + $0x3dc] sm:$0xf0]  ;;  %v4445_v8 = vld [vmem:[#allocation6 + $0x1b8] sm:$0xf] }
  0x63   :  { %2013 = vmatpush.bf16.msra.mxu3 %v5330_v45  ;;  %v5018_v45 = vor.u32 %v6467_v36, %v5015_v37  ;;  %v6345_v37 = vld [vmem:[#allocation6 + $0x25c] sm:$0xf0]  ;;  %v6327_v10 = vld [vmem:[#allocation6 + $0x1cc] sm:$0xf0]  ;;  %v4421_v24 = vld [vmem:[#allocation6 + $0x188] sm:$0xf] }
  0x64   :  { %1975 = vmatpush.bf16.msra.mxu0 %v4730_v51  ;;  %v6509_v51 = vld [vmem:[#allocation6 + $0x784] sm:$0xf]  ;;  %v4446_v21 = vor.u32 %v6327_v10, %v4445_v8  ;;  %v6321_v25 = vld [vmem:[#allocation6 + $0x19c] sm:$0xf0]  ;;  %v4613_v26 = vld [vmem:[#allocation6 + $0x308] sm:$0xf] }
  0x65   :  { %1988 = vmatpush.bf16.msra.mxu1 %v4922_v52  ;;  %v5183_v52 = vld [vmem:[#allocation6 + $0x798] sm:$0xf0]  ;;  %v5093_v8 = vld [vmem:[#allocation6 + $0x6c8] sm:$0xf]  ;;  %s6997_s14 = smov [#allocation13]  }
  0x66   :  { %2001 = vmatpush.bf16.msra.mxu2 %v5114_v53  ;;  %v4397_v53 = vld [vmem:[#allocation6 + $0x158] sm:$0xf]  ;;  %v5285_v10 = vld [vmem:[#allocation6 + $0x848] sm:$0xf] }
  0x67   :  { %2014 = vmatpush.bf16.msra.mxu3 %v5306_v57  ;;  %v6363_v57 = vld [vmem:[#allocation6 + $0x2ec] sm:$0xf0] }
  0x68   :  { %1976 = vmatpush.bf16.msra.mxu0 %v4706_v63  ;;  %v6459_v63 = vld [vmem:[#allocation6 + $0x5ec] sm:$0xf0]  ;;  %v4590_v2 = vor.u32 %v6363_v57, %v4589_v55  ;;  %v4302_v55 = vor.u32 %v6291_v47, %v4301_v46 }
  0x69   :  { %1989 = vmatpush.bf16.msra.mxu1 %v4898_v0  ;;  %v5186_v0 = vor.u32 %v6509_v51, %v5183_v52  ;;  %v4974_v7 = vor.u32 %v6459_v63, %v4973_v62  ;;  %v4685_v51 = vld [vmem:[#allocation6 + $0x398] sm:$0xf]  ;;  %v6387_v52 = vld [vmem:[#allocation6 + $0x3ac] sm:$0xf0]  ;;  %v6333_v62 = vld [vmem:[#allocation6 + $0x1fc] sm:$0xf0] }
  0x6a   :  { %2002 = vmatpush.bf16.msra.mxu2 %v5090_v1  ;;  %v4398_v1 = vor.u32 %v6315_v54, %v4397_v53  ;;  %v4877_v53 = vld [vmem:[#allocation6 + $0x518] sm:$0xf]  ;;  %v6435_v54 = vld [vmem:[#allocation6 + $0x52c] sm:$0xf0]  ;;  %v4686_v57 = vor.u32 %v6387_v52, %v4685_v51  ;;  %v4661_v63 = vld [vmem:[#allocation6 + $0x368] sm:$0xf] }
  0x6b   :  { %2015 = vmatpush.bf16.msra.mxu3 %v5282_v5  ;;  %v6309_v5 = vld [vmem:[#allocation6 + $0x13c] sm:$0xf0] }
  0x6c   :  { %1977 = vmatpush.bf16.msra.mxu0 %v4682_v11  ;;  %v4949_v11 = vld [vmem:[#allocation6 + $0x5a8] sm:$0xf]  ;;  %v6549_v52 = vld [vmem:[#allocation6 + $0x8bc] sm:$0xf0] }
  0x6d   :  { %1990 = vmatpush.bf16.msra.mxu1 %v4874_v12  ;;  %v6453_v12 = vld [vmem:[#allocation6 + $0x5bc] sm:$0xf0] }
  0x6e   :  { %2003 = vmatpush.bf16.msra.mxu2 %v5066_v13  ;;  %v4374_v13 = vor.u32 %v6309_v5, %v4373_v4  ;;  %v4950_v23 = vor.u32 %v6453_v12, %v4949_v11  ;;  %v4637_v11 = vld [vmem:[#allocation6 + $0x338] sm:$0xf]  ;;  %v6375_v12 = vld [vmem:[#allocation6 + $0x34c] sm:$0xf0] }
  0x6f   :  { %2016 = vmatpush.bf16.msra.mxu3 %v5258_v17  ;;  %v6303_v17 = vld [vmem:[#allocation6 + $0x10c] sm:$0xf0] }
  0x70   :  { %1978 = vmatpush.bf16.msra.mxu0 %v4658_v27  ;;  %v4925_v27 = vld [vmem:[#allocation6 + $0x578] sm:$0xf] }
  0x71   :  { %1991 = vmatpush.bf16.msra.mxu1 %v4850_v28  ;;  %v6447_v28 = vld [vmem:[#allocation6 + $0x58c] sm:$0xf0] }
  0x72   :  { %2004 = vmatpush.bf16.msra.mxu2 %v5042_v29  ;;  %v4350_v29 = vor.u32 %v6303_v17, %v4349_v16  ;;  %v4926_v36 = vor.u32 %v6447_v28, %v4925_v27  ;;  %v4229_v16 = vld [vmem:[#allocation6 + $0x8] sm:$0xf]  ;;  %v6273_v17 = vld [vmem:[#allocation6 + $0x1c] sm:$0xf0] }
  0x73   :  { %2017 = vmatpush.bf16.msra.mxu3 %v5234_v33  ;;  %v6297_v33 = vld [vmem:[#allocation6 + $0xdc] sm:$0xf0] }
  0x74   :  { %1979 = vmatpush.bf16.msra.mxu0 %v4634_v41  ;;  %v4901_v41 = vld [vmem:[#allocation6 + $0x548] sm:$0xf]  ;;  %v4326_v43 = vor.u32 %v6297_v33, %v4325_v32  ;;  %v6369_v28 = vld [vmem:[#allocation6 + $0x31c] sm:$0xf0]  ;;  %v6507_v32 = vld [vmem:[#allocation6 + $0x76c] sm:$0xf0] }
  0x75   :  { %1992 = vmatpush.bf16.msra.mxu1 %v4826_v44  ;;  %v4518_v44 = vor.u32 %v6345_v37, %v4517_v34  ;;  %v5357_v33 = vld [vmem:[#allocation6 + $0x8d8] sm:$0xf]  ;;  %v4230_v34 = vor.u32 %v6273_v17, %v4229_v16  ;;  %v6312_v37 = vld [vmem:[#allocation6 + $0x15c] sm:$0xf]  ;;  %v4519_v16 = vld [vmem:[#allocation6 + $0x260] sm:$0xf0] }
  0x76   :  { %2005 = vmatpush.bf16.msra.mxu2 %v5018_v45  ;;  %v4710_v45 = vor.u32 %v6393_v40, %v4709_v39  ;;  %v4399_v39 = vld [vmem:[#allocation6 + $0x170] sm:$0xf0]  ;;  %v4422_v40 = vor.u32 %v6321_v25, %v4421_v24  ;;  %v5069_v24 = vld [vmem:[#allocation6 + $0x698] sm:$0xf]  ;;  %v6483_v25 = vld [vmem:[#allocation6 + $0x6ac] sm:$0xf0] }
  0x77   :  { %2018 = vmatpush.bf16.msra.mxu3 %v5210_v49  ;;  %v4902_v49 = vor.u32 %v6441_v42, %v4901_v41  ;;  %v4614_v41 = vor.u32 %v6369_v28, %v4613_v26  ;;  %v6360_v42 = vld [vmem:[#allocation6 + $0x2dc] sm:$0xf]  ;;  %v4402_v47 = vor.u32 %v6312_v37, %v4399_v39  ;;  %v5261_v26 = vld [vmem:[#allocation6 + $0x818] sm:$0xf]  ;;  %v6531_v28 = vld [vmem:[#allocation6 + $0x82c] sm:$0xf0] }
  0x78   :  { %1980 = vmatpush.bf16.msra.mxu0 %v4610_v56  ;;  %v4494_v56 = vor.u32 %v6339_v50, %v4493_v48  ;;  %v5141_v48 = vld [vmem:[#allocation6 + $0x728] sm:$0xf]  ;;  %v6477_v39 = vld [vmem:[#allocation6 + $0x67c] sm:$0xf0] }
  0x79   :  { %1993 = vmatpush.bf16.msra.mxu1 %v4802_v60  ;;  %v4469_v60 = vld [vmem:[#allocation6 + $0x1e8] sm:$0xf] }
  0x7a   :  { %2006 = vmatpush.bf16.msra.mxu2 %v4994_v61  ;;  %v4878_v61 = vor.u32 %v6435_v54, %v4877_v53  ;;  %v4470_v4 = vor.u32 %v6333_v62, %v4469_v60  ;;  %v5333_v50 = vld [vmem:[#allocation6 + $0x8a8] sm:$0xf]  ;;  %v6306_v53 = vld [vmem:[#allocation6 + $0x12c] sm:$0xf]  ;;  %v4375_v54 = vld [vmem:[#allocation6 + $0x140] sm:$0xf0] }
  0x7b   :  { %2019 = vmatpush.bf16.msra.mxu3 %v5186_v0  ;;  %1981 = vmatmul.bf16.vlgmr.msra.gmra.mxu0 %v7053_v18  ;;  %v6381_v0 = vld [vmem:[#allocation6 + $0x37c] sm:$0xf0]  ;;  %v5117_v60 = vld [vmem:[#allocation6 + $0x6f8] sm:$0xf]  ;;  %v5045_v37 = vld [vmem:[#allocation6 + $0x668] sm:$0xf] }
  0x7c   :  { %2025 = vmatpush.bf16.msrb.mxu0 %v4398_v1  ;;  %1994 = vmatmul.bf16.vlgmr.msra.gmra.mxu1 %v7057_v20  ;;  %v4853_v1 = vld [vmem:[#allocation6 + $0x4e8] sm:$0xf]  ;;  %v4662_v5 = vor.u32 %v6381_v0, %v4661_v63  ;;  %v5309_v62 = vld [vmem:[#allocation6 + $0x878] sm:$0xf]  ;;  %v6543_v0 = vld [vmem:[#allocation6 + $0x88c] sm:$0xf0] }
  0x7d   :  { %2038 = vmatpush.bf16.msrb.mxu1 %v4590_v2  ;;  %2007 = vmatmul.bf16.vlgmr.msra.gmra.mxu2 %v7065_v35  ;;  %v6429_v2 = vld [vmem:[#allocation6 + $0x4fc] sm:$0xf0] }
  0x7e   :  { %2051 = vmatpush.bf16.msrb.mxu2 %v4782_v3  ;;  %2020 = vmatmul.bf16.vlgmr.msra.gmra.mxu3 %v7067_v38  ;;  %v4278_v3 = vor.u32 %v6285_v59, %v4277_v58  ;;  %v4854_v9 = vor.u32 %v6429_v2, %v4853_v1  ;;  %v5334_v58 = vor.u32 %v6549_v52, %v5333_v50  ;;  %v6300_v1 = vld [vmem:[#allocation6 + $0xfc] sm:$0xf]  ;;  %v4351_v2 = vld [vmem:[#allocation6 + $0x110] sm:$0xf0]  ;;  %v5021_v50 = vld [vmem:[#allocation6 + $0x638] sm:$0xf] }
  0x7f   :  { %2064 = vmatpush.bf16.msrb.mxu3 %v4974_v7  ;;  %v6279_v7 = vld [vmem:[#allocation6 + $0x4c] sm:$0xf0]  ;;  %v4378_v59 = vor.u32 %v6306_v53, %v4375_v54  ;;  %v5213_v52 = vld [vmem:[#allocation6 + $0x7b8] sm:$0xf] }
  0x80   :  { %2026 = vmatpush.bf16.msrb.mxu0 %v4374_v13  ;;  %v4829_v13 = vld [vmem:[#allocation6 + $0x4b8] sm:$0xf]  ;;  %v6519_v54 = vld [vmem:[#allocation6 + $0x7cc] sm:$0xf0] }
  0x81   :  { %2039 = vmatpush.bf16.msrb.mxu1 %v4566_v14  ;;  %v6423_v14 = vld [vmem:[#allocation6 + $0x4cc] sm:$0xf0] }
  0x82   :  { %2052 = vmatpush.bf16.msrb.mxu2 %v4758_v15  ;;  %v4254_v15 = vor.u32 %v6279_v7, %v4253_v6  ;;  %v4830_v27 = vor.u32 %v6423_v14, %v4829_v13  ;;  %v5310_v6 = vor.u32 %v6543_v0, %v5309_v62  ;;  %v4354_v7 = vor.u32 %v6300_v1, %v4351_v2  ;;  %v6294_v13 = vld [vmem:[#allocation6 + $0xcc] sm:$0xf]  ;;  %v4327_v14 = vld [vmem:[#allocation6 + $0xe0] sm:$0xf0]  ;;  %v5189_v0 = vld [vmem:[#allocation6 + $0x788] sm:$0xf] }
  0x83   :  { %2065 = vmatpush.bf16.msrb.mxu3 %v4950_v23  ;;  %v4638_v23 = vor.u32 %v6375_v12, %v4637_v11  ;;  %v6537_v12 = vld [vmem:[#allocation6 + $0x85c] sm:$0xf0]  ;;  %v5214_v62 = vor.u32 %v6519_v54, %v5213_v52  ;;  %v6270_v2 = vld [vmem:[#allocation6 + $0xc] sm:$0xf] }
  0x84   :  { %2027 = vmatpush.bf16.msrb.mxu0 %v4350_v29  ;;  %v4805_v29 = vld [vmem:[#allocation6 + $0x488] sm:$0xf]  ;;  %v6513_v1 = vld [vmem:[#allocation6 + $0x79c] sm:$0xf0]  ;;  %v6390_v52 = vld [vmem:[#allocation6 + $0x3cc] sm:$0xf] }
  0x85   :  { %2040 = vmatpush.bf16.msrb.mxu1 %v4542_v30  ;;  %v6417_v30 = vld [vmem:[#allocation6 + $0x49c] sm:$0xf0]  ;;  %v6438_v54 = vld [vmem:[#allocation6 + $0x54c] sm:$0xf] }
  0x86   :  { %2053 = vmatpush.bf16.msrb.mxu2 %v4734_v31  ;;  %v5165_v31 = vld [vmem:[#allocation6 + $0x758] sm:$0xf] }
  0x87   :  { %2066 = vmatpush.bf16.msrb.mxu3 %v4926_v36  ;;  %v6555_v36 = vld [vmem:[#allocation6 + $0x8ec] sm:$0xf0] }
  0x88   :  { %2028 = vmatpush.bf16.msrb.mxu0 %v4326_v43  ;;  %v4591_v43 = vld [vmem:[#allocation6 + $0x2f0] sm:$0xf0]  ;;  %v5358_v46 = vor.u32 %v6555_v36, %v5357_v33  ;;  %v5070_v33 = vor.u32 %v6483_v25, %v5069_v24 }
  0x89   :  { %2041 = vmatpush.bf16.msrb.mxu1 %v4518_v44  ;;  %v4806_v44 = vor.u32 %v6417_v30, %v4805_v29  ;;  %v4594_v51 = vor.u32 %v6360_v42, %v4591_v43  ;;  %v6288_v29 = vld [vmem:[#allocation6 + $0x9c] sm:$0xf]  ;;  %v4303_v30 = vld [vmem:[#allocation6 + $0xb0] sm:$0xf0]  ;;  %v6525_v42 = vld [vmem:[#allocation6 + $0x7fc] sm:$0xf0] }
  0x8a   :  { %2054 = vmatpush.bf16.msrb.mxu2 %v4710_v45  ;;  %v5166_v45 = vor.u32 %v6507_v32, %v5165_v31  ;;  %v6336_v31 = vld [vmem:[#allocation6 + $0x21c] sm:$0xf]  ;;  %v4495_v32 = vld [vmem:[#allocation6 + $0x230] sm:$0xf0]  ;;  %v4306_v36 = vor.u32 %v6288_v29, %v4303_v30  ;;  %v6282_v43 = vld [vmem:[#allocation6 + $0x6c] sm:$0xf] }
  0x8b   :  { %2067 = vmatpush.bf16.msrb.mxu3 %v4902_v49  ;;  %v6501_v49 = vld [vmem:[#allocation6 + $0x73c] sm:$0xf0]  ;;  %v4951_v30 = vld [vmem:[#allocation6 + $0x5c0] sm:$0xf0] }
  0x8c   :  { %2029 = vmatpush.bf16.msrb.mxu0 %v4302_v55  ;;  %v6354_v55 = vld [vmem:[#allocation6 + $0x2ac] sm:$0xf] }
  0x8d   :  { %2042 = vmatpush.bf16.msrb.mxu1 %v4494_v56  ;;  %v4567_v56 = vld [vmem:[#allocation6 + $0x2c0] sm:$0xf0] }
  0x8e   :  { %2055 = vmatpush.bf16.msrb.mxu2 %v4686_v57  ;;  %v5142_v57 = vor.u32 %v6501_v49, %v5141_v48  ;;  %v4570_v63 = vor.u32 %v6354_v55, %v4567_v56  ;;  %v6276_v55 = vld [vmem:[#allocation6 + $0x3c] sm:$0xf]  ;;  %v4255_v56 = vld [vmem:[#allocation6 + $0x50] sm:$0xf0] }
  0x8f   :  { %2068 = vmatpush.bf16.msrb.mxu3 %v4878_v61  ;;  %v6495_v61 = vld [vmem:[#allocation6 + $0x70c] sm:$0xf0] }
  0x90   :  { %2030 = vmatpush.bf16.msrb.mxu0 %v4278_v3  ;;  %v6348_v3 = vld [vmem:[#allocation6 + $0x27c] sm:$0xf] }
  0x91   :  { %2043 = vmatpush.bf16.msrb.mxu1 %v4470_v4  ;;  %v4543_v4 = vld [vmem:[#allocation6 + $0x290] sm:$0xf0] }
  0x92   :  { %2056 = vmatpush.bf16.msrb.mxu2 %v4662_v5  ;;  %v5118_v5 = vor.u32 %v6495_v61, %v5117_v60  ;;  %v4546_v11 = vor.u32 %v6348_v3, %v4543_v4  ;;  %v4997_v60 = vld [vmem:[#allocation6 + $0x608] sm:$0xf]  ;;  %v6465_v61 = vld [vmem:[#allocation6 + $0x61c] sm:$0xf0]  ;;  %v4231_v4 = vld [vmem:[#allocation6 + $0x20] sm:$0xf0] }
  0x93   :  { %2069 = vmatpush.bf16.msrb.mxu3 %v4854_v9  ;;  %v6489_v9 = vld [vmem:[#allocation6 + $0x6dc] sm:$0xf0] }
  0x94   :  { %2031 = vmatpush.bf16.msrb.mxu0 %v4254_v15  ;;  %v6342_v15 = vld [vmem:[#allocation6 + $0x24c] sm:$0xf]  ;;  %v5094_v17 = vor.u32 %v6489_v9, %v5093_v8  ;;  %v4783_v8 = vld [vmem:[#allocation6 + $0x470] sm:$0xf0]  ;;  %v6456_v9 = vld [vmem:[#allocation6 + $0x5dc] sm:$0xf] }
  0x95   :  { %2044 = vmatpush.bf16.msrb.mxu1 %v4446_v21  ;;  %v5286_v21 = vor.u32 %v6537_v12, %v5285_v10  ;;  %v4998_v10 = vor.u32 %v6465_v61, %v4997_v60  ;;  %v6504_v12 = vld [vmem:[#allocation6 + $0x75c] sm:$0xf]  ;;  %v5287_v60 = vld [vmem:[#allocation6 + $0x860] sm:$0xf0] }
  0x96   :  { %2057 = vmatpush.bf16.msrb.mxu2 %v4638_v23  ;;  %v4330_v23 = vor.u32 %v6294_v13, %v4327_v14  ;;  %v5167_v13 = vld [vmem:[#allocation6 + $0x770] sm:$0xf0]  ;;  %v5190_v14 = vor.u32 %v6513_v1, %v5189_v0 }
  0x97   :  { %2070 = vmatpush.bf16.msrb.mxu3 %v4830_v27  ;;  %v4522_v27 = vor.u32 %v6342_v15, %v4519_v16  ;;  %v4234_v15 = vor.u32 %v6270_v2, %v4231_v4  ;;  %v6552_v16 = vld [vmem:[#allocation6 + $0x8dc] sm:$0xf]  ;;  %v5170_v25 = vor.u32 %v6504_v12, %v5167_v13  ;;  %v4687_v1 = vld [vmem:[#allocation6 + $0x3b0] sm:$0xf0] }
  0x98   :  { %2032 = vmatpush.bf16.msrb.mxu0 %v4230_v34  ;;  %v5262_v34 = vor.u32 %v6531_v28, %v5261_v26  ;;  %v6402_v26 = vld [vmem:[#allocation6 + $0x42c] sm:$0xf]  ;;  %v6432_v2 = vld [vmem:[#allocation6 + $0x51c] sm:$0xf] }
  0x99   :  { %2045 = vmatpush.bf16.msrb.mxu1 %v4422_v40  ;;  %v5237_v40 = vld [vmem:[#allocation6 + $0x7e8] sm:$0xf]  ;;  %v6450_v28 = vld [vmem:[#allocation6 + $0x5ac] sm:$0xf] }
  0x9a   :  { %2058 = vmatpush.bf16.msrb.mxu2 %v4614_v41  ;;  %v4498_v41 = vor.u32 %v6336_v31, %v4495_v32  ;;  %v5238_v48 = vor.u32 %v6525_v42, %v5237_v40  ;;  %v6498_v31 = vld [vmem:[#allocation6 + $0x72c] sm:$0xf]  ;;  %v5143_v32 = vld [vmem:[#allocation6 + $0x740] sm:$0xf0]  ;;  %v6396_v40 = vld [vmem:[#allocation6 + $0x3fc] sm:$0xf] }
  0x9b   :  { %2071 = vmatpush.bf16.msrb.mxu3 %v4806_v44  ;;  %2033 = vmatmul.bf16.vlgmr.msrb.gmra.mxu0 %v7055_v19  ;;  %v4279_v44 = vld [vmem:[#allocation6 + $0x80] sm:$0xf0]  ;;  %v6444_v42 = vld [vmem:[#allocation6 + $0x57c] sm:$0xf] }
  0x9c   :  { %2077 = vmatpush.bf16.msra.mxu0 %v5166_v45  ;;  %2046 = vmatmul.bf16.vlgmr.msrb.gmra.mxu1 %v7059_v22  ;;  %v6330_v45 = vld [vmem:[#allocation6 + $0x1ec] sm:$0xf]  ;;  %v4282_v49 = vor.u32 %v6282_v43, %v4279_v44  ;;  %v4927_v44 = vld [vmem:[#allocation6 + $0x590] sm:$0xf0] }
  0x9d   :  { %2090 = vmatpush.bf16.msra.mxu1 %v5358_v46  ;;  %2059 = vmatmul.bf16.vlgmr.msrb.gmra.mxu2 %v7053_v18  ;;  %v4471_v46 = vld [vmem:[#allocation6 + $0x200] sm:$0xf0] }
  0x9e   :  { %2103 = vmatpush.bf16.msra.mxu2 %v4402_v47  ;;  %2072 = vmatmul.bf16.vlgmr.msrb.gmra.mxu3 %v7057_v20  ;;  %v5046_v47 = vor.u32 %v6477_v39, %v5045_v37  ;;  %v4474_v53 = vor.u32 %v6330_v45, %v4471_v46  ;;  %v4954_v37 = vor.u32 %v6450_v28, %v4951_v30  ;;  %v6492_v45 = vld [vmem:[#allocation6 + $0x6fc] sm:$0xf]  ;;  %v5119_v46 = vld [vmem:[#allocation6 + $0x710] sm:$0xf0] }
  0x9f   :  { %2116 = vmatpush.bf16.msra.mxu3 %v4594_v51  ;;  %v6471_v51 = vld [vmem:[#allocation6 + $0x64c] sm:$0xf0]  ;;  %v5146_v39 = vor.u32 %v6498_v31, %v5143_v32  ;;  %v6372_v31 = vld [vmem:[#allocation6 + $0x33c] sm:$0xf]  ;;  %v4639_v32 = vld [vmem:[#allocation6 + $0x350] sm:$0xf0] }
  0xa0   :  { %2078 = vmatpush.bf16.msra.mxu0 %v5142_v57  ;;  %v6324_v57 = vld [vmem:[#allocation6 + $0x1bc] sm:$0xf] }
  0xa1   :  { %2091 = vmatpush.bf16.msra.mxu1 %v5334_v58  ;;  %v4447_v58 = vld [vmem:[#allocation6 + $0x1d0] sm:$0xf0] }
  0xa2   :  { %2104 = vmatpush.bf16.msra.mxu2 %v4378_v59  ;;  %v5022_v59 = vor.u32 %v6471_v51, %v5021_v50  ;;  %v4450_v3 = vor.u32 %v6324_v57, %v4447_v58  ;;  %v4930_v50 = vor.u32 %v6444_v42, %v4927_v44  ;;  %v5122_v51 = vor.u32 %v6492_v45, %v5119_v46  ;;  %v6486_v57 = vld [vmem:[#allocation6 + $0x6cc] sm:$0xf]  ;;  %v5095_v58 = vld [vmem:[#allocation6 + $0x6e0] sm:$0xf0]  ;;  %v6516_v42 = vld [vmem:[#allocation6 + $0x7bc] sm:$0xf] }
  0xa3   :  { %2117 = vmatpush.bf16.msra.mxu3 %v4570_v63  ;;  %v4258_v63 = vor.u32 %v6276_v55, %v4255_v56  ;;  %v4903_v56 = vld [vmem:[#allocation6 + $0x560] sm:$0xf0]  ;;  %v5098_v0 = vor.u32 %v6486_v57, %v5095_v58  ;;  %v4642_v45 = vor.u32 %v6372_v31, %v4639_v32  ;;  %v6366_v46 = vld [vmem:[#allocation6 + $0x30c] sm:$0xf] }
  0xa4   :  { %2079 = vmatpush.bf16.msra.mxu0 %v5118_v5  ;;  %v6318_v5 = vld [vmem:[#allocation6 + $0x18c] sm:$0xf]  ;;  %v5191_v57 = vld [vmem:[#allocation6 + $0x7a0] sm:$0xf0] }
  0xa5   :  { %2092 = vmatpush.bf16.msra.mxu1 %v5310_v6  ;;  %v4423_v6 = vld [vmem:[#allocation6 + $0x1a0] sm:$0xf0] }
  0xa6   :  { %2105 = vmatpush.bf16.msra.mxu2 %v4354_v7  ;;  %v6408_v7 = vld [vmem:[#allocation6 + $0x45c] sm:$0xf] }
  0xa7   :  { %2118 = vmatpush.bf16.msra.mxu3 %v4546_v11  ;;  %v4975_v11 = vld [vmem:[#allocation6 + $0x5f0] sm:$0xf0] }
  0xa8   :  { %2080 = vmatpush.bf16.msra.mxu0 %v5094_v17  ;;  %v5359_v17 = vld [vmem:[#allocation6 + $0x8f0] sm:$0xf0]  ;;  %v4978_v24 = vor.u32 %v6456_v9, %v4975_v11  ;;  %v6378_v11 = vld [vmem:[#allocation6 + $0x36c] sm:$0xf] }
  0xa9   :  { %2093 = vmatpush.bf16.msra.mxu1 %v5286_v21  ;;  %v4426_v21 = vor.u32 %v6318_v5, %v4423_v6  ;;  %v5362_v29 = vor.u32 %v6552_v16, %v5359_v17  ;;  %v6480_v5 = vld [vmem:[#allocation6 + $0x69c] sm:$0xf]  ;;  %v5071_v6 = vld [vmem:[#allocation6 + $0x6b0] sm:$0xf0] }
  0xaa   :  { %2106 = vmatpush.bf16.msra.mxu2 %v4330_v23  ;;  %v4786_v23 = vor.u32 %v6408_v7, %v4783_v8  ;;  %v7085_v7 = vld [vmem:[#allocation11] sm:$0x3f]  ;;  %v6528_v8 = vld [vmem:[#allocation6 + $0x81c] sm:$0xf]  ;;  %v5263_v9 = vld [vmem:[#allocation6 + $0x830] sm:$0xf0]  ;;  %v5074_v13 = vor.u32 %v6480_v5, %v5071_v6 }
  0xab   :  { %2119 = vmatpush.bf16.msra.mxu3 %v4522_v27  ;;  %v4759_v27 = vld [vmem:[#allocation6 + $0x440] sm:$0xf0]  ;;  %v396_v16 = vperm.slane %v7085_v7, 0  ;;  %v5266_v17 = vor.u32 %v6528_v8, %v5263_v9  ;;  %v4981_v8 = vld [vmem:[#allocation6 + $0x5e0] sm:$0xf] }
  0xac   :  { %2081 = vmatpush.bf16.msra.mxu0 %v5070_v33  ;;  %v6546_v33 = vld [vmem:[#allocation6 + $0x8ac] sm:$0xf]  ;;  %v6460_v9 = vld [vmem:[#allocation6 + $0x5f4] sm:$0xf0] }
  0xad   :  { %2094 = vmatpush.bf16.msra.mxu1 %v5262_v34  ;;  %v5335_v34 = vld [vmem:[#allocation6 + $0x8c0] sm:$0xf0] }
  0xae   :  { %2107 = vmatpush.bf16.msra.mxu2 %v4306_v36  ;;  %v4762_v36 = vor.u32 %v6402_v26, %v4759_v27  ;;  %v5338_v43 = vor.u32 %v6546_v33, %v5335_v34  ;;  %v5239_v26 = vld [vmem:[#allocation6 + $0x800] sm:$0xf0]  ;;  %v6420_v33 = vld [vmem:[#allocation6 + $0x4bc] sm:$0xf] }
  0xaf   :  { %2120 = vmatpush.bf16.msra.mxu3 %v4498_v41  ;;  %v4735_v41 = vld [vmem:[#allocation6 + $0x410] sm:$0xf0] }
  0xb0   :  { %2082 = vmatpush.bf16.msra.mxu0 %v5046_v47  ;;  %v6540_v47 = vld [vmem:[#allocation6 + $0x87c] sm:$0xf] }
  0xb1   :  { %2095 = vmatpush.bf16.msra.mxu1 %v5238_v48  ;;  %v5311_v48 = vld [vmem:[#allocation6 + $0x890] sm:$0xf0] }
  0xb2   :  { %2108 = vmatpush.bf16.msra.mxu2 %v4282_v49  ;;  %v4738_v49 = vor.u32 %v6396_v40, %v4735_v41  ;;  %v5314_v55 = vor.u32 %v6540_v47, %v5311_v48  ;;  %v6468_v40 = vld [vmem:[#allocation6 + $0x63c] sm:$0xf]  ;;  %v5023_v41 = vld [vmem:[#allocation6 + $0x650] sm:$0xf0]  ;;  %v4615_v47 = vld [vmem:[#allocation6 + $0x320] sm:$0xf0] }
  0xb3   :  { %2121 = vmatpush.bf16.msra.mxu3 %v4474_v53  ;;  %v4711_v53 = vld [vmem:[#allocation6 + $0x3e0] sm:$0xf0] }
  0xb4   :  { %2083 = vmatpush.bf16.msra.mxu0 %v5022_v59  ;;  %v6534_v59 = vld [vmem:[#allocation6 + $0x84c] sm:$0xf]  ;;  %v4714_v61 = vor.u32 %v6390_v52, %v4711_v53 }
  0xb5   :  { %2096 = vmatpush.bf16.msra.mxu1 %v5214_v62  ;;  %v6384_v62 = vld [vmem:[#allocation6 + $0x39c] sm:$0xf]  ;;  %v5290_v4 = vor.u32 %v6534_v59, %v5287_v60  ;;  %v6462_v52 = vld [vmem:[#allocation6 + $0x60c] sm:$0xf]  ;;  %v4405_v60 = vld [vmem:[#allocation6 + $0x160] sm:$0xf] }
  0xb6   :  { %2109 = vmatpush.bf16.msra.mxu2 %v4258_v63  ;;  %v4906_v63 = vor.u32 %v6438_v54, %v4903_v56  ;;  %v6510_v56 = vld [vmem:[#allocation6 + $0x78c] sm:$0xf] }
  0xb7   :  { %2122 = vmatpush.bf16.msra.mxu3 %v4450_v3  ;;  %v4879_v3 = vld [vmem:[#allocation6 + $0x530] sm:$0xf0] }
  0xb8   :  { %2084 = vmatpush.bf16.msra.mxu0 %v4998_v10  ;;  %v4690_v10 = vor.u32 %v6384_v62, %v4687_v1  ;;  %v4882_v12 = vor.u32 %v6432_v2, %v4879_v3  ;;  %v4597_v62 = vld [vmem:[#allocation6 + $0x2e0] sm:$0xf]  ;;  %v6412_v2 = vld [vmem:[#allocation6 + $0x474] sm:$0xf0] }
  0xb9   :  { %2097 = vmatpush.bf16.msra.mxu1 %v5190_v14  ;;  %v4663_v14 = vld [vmem:[#allocation6 + $0x380] sm:$0xf0]  ;;  %v4789_v1 = vld [vmem:[#allocation6 + $0x460] sm:$0xf] }
  0xba   :  { %2110 = vmatpush.bf16.msra.mxu2 %v4234_v15  ;;  %v6426_v15 = vld [vmem:[#allocation6 + $0x4ec] sm:$0xf]  ;;  %v4666_v27 = vor.u32 %v6378_v11, %v4663_v14  ;;  %v5194_v11 = vor.u32 %v6510_v56, %v5191_v57  ;;  %v4790_v14 = vor.u32 %v6412_v2, %v4789_v1  ;;  %v6340_v2 = vld [vmem:[#allocation6 + $0x234] sm:$0xf0] }
  0xbb   :  { %2123 = vmatpush.bf16.msra.mxu3 %v4426_v21  ;;  %2085 = vmatmul.bf16.vlgmr.msra.gmra.mxu0 %v7065_v35  ;;  %v4855_v21 = vld [vmem:[#allocation6 + $0x500] sm:$0xf0]  ;;  %v1878_v28 = vpop.f32.mrf.mxu0 }
  0xbc   :  { %2129 = vmatpush.bf16.msrb.mxu0 %v4786_v23  ;;  %2098 = vmatmul.bf16.vlgmr.msra.gmra.mxu1 %v7067_v38  ;;  %v6474_v23 = vld [vmem:[#allocation6 + $0x66c] sm:$0xf]  ;;  %v1879_v34 = vadd.f32 %v1878_v28, %v396_v16  ;;  %v6310_v16 = vld [vmem:[#allocation6 + $0x144] sm:$0xf0] }
  0xbd   :  { %2142 = vmatpush.bf16.msrb.mxu1 %v4978_v24  ;;  %2111 = vmatmul.bf16.vlgmr.msra.gmra.mxu2 %v7055_v19  ;;  %v5047_v24 = vld [vmem:[#allocation6 + $0x680] sm:$0xf0] }
  0xbe   :  { %2155 = vmatpush.bf16.msrb.mxu2 %v5170_v25  ;;  %2124 = vmatmul.bf16.vlgmr.msra.gmra.mxu3 %v7059_v22  ;;  %v6522_v25 = vld [vmem:[#allocation6 + $0x7ec] sm:$0xf]  ;;  %v5050_v30 = vor.u32 %v6474_v23, %v5047_v24  ;;  %v6358_v23 = vld [vmem:[#allocation6 + $0x2c4] sm:$0xf0]  ;;  %v4765_v24 = vld [vmem:[#allocation6 + $0x430] sm:$0xf] }
  0xbf   :  { %2168 = vmatpush.bf16.msrb.mxu3 %v5362_v29  ;;  %v4858_v29 = vor.u32 %v6426_v15, %v4855_v21  ;;  %v4381_v15 = vld [vmem:[#allocation6 + $0x130] sm:$0xf]  ;;  %v4982_v21 = vor.u32 %v6460_v9, %v4981_v8  ;;  %v4885_v8 = vld [vmem:[#allocation6 + $0x520] sm:$0xf]  ;;  %v6436_v9 = vld [vmem:[#allocation6 + $0x534] sm:$0xf0] }
  0xc0   :  { %2130 = vmatpush.bf16.msrb.mxu0 %v4762_v36  ;;  %v1891_v36 = vpop.f32.mrf.mxu1  ;;  %v1904_v53 = vpop.f32.mrf.mxu2 }
  0xc1   :  { %2143 = vmatpush.bf16.msrb.mxu1 %v4954_v37  ;;  %v5242_v37 = vor.u32 %v6522_v25, %v5239_v26  ;;  %v1892_v44 = vadd.f32 %v1891_v36, %v1879_v34  ;;  %v6406_v25 = vld [vmem:[#allocation6 + $0x444] sm:$0xf0]  ;;  %v4957_v26 = vld [vmem:[#allocation6 + $0x5b0] sm:$0xf]  ;;  %v6304_v34 = vld [vmem:[#allocation6 + $0x114] sm:$0xf0] }
  0xc2   :  { %2156 = vmatpush.bf16.msrb.mxu2 %v5146_v39  ;;  %v4831_v39 = vld [vmem:[#allocation6 + $0x4d0] sm:$0xf0]  ;;  %v4766_v32 = vor.u32 %v6406_v25, %v4765_v24  ;;  %v4549_v36 = vld [vmem:[#allocation6 + $0x280] sm:$0xf]  ;;  %v4861_v25 = vld [vmem:[#allocation6 + $0x4f0] sm:$0xf] }
  0xc3   :  { %2169 = vmatpush.bf16.msrb.mxu3 %v5338_v43  ;;  %v5215_v43 = vld [vmem:[#allocation6 + $0x7d0] sm:$0xf0]  ;;  %v4834_v48 = vor.u32 %v6420_v33, %v4831_v39  ;;  %v1905_v58 = vadd.f32 %v1904_v53, %v1892_v44  ;;  %v1917_v59 = vpop.f32.mrf.mxu3  ;;  %v4357_v33 = vld [vmem:[#allocation6 + $0x100] sm:$0xf]  ;;  %v6352_v39 = vld [vmem:[#allocation6 + $0x294] sm:$0xf0] }
  0xc4   :  { %2131 = vmatpush.bf16.msrb.mxu0 %v4738_v49  ;;  %v5026_v49 = vor.u32 %v6468_v40, %v5023_v41  ;;  %v5218_v54 = vor.u32 %v6516_v42, %v5215_v43  ;;  %v4741_v40 = vld [vmem:[#allocation6 + $0x400] sm:$0xf]  ;;  %v6400_v41 = vld [vmem:[#allocation6 + $0x414] sm:$0xf0]  ;;  %v4358_v44 = vor.u32 %v6304_v34, %v4357_v33  ;;  %v6394_v53 = vld [vmem:[#allocation6 + $0x3e4] sm:$0xf0] }
  0xc5   :  { %2144 = vmatpush.bf16.msrb.mxu1 %v4930_v50  ;;  %v6414_v50 = vld [vmem:[#allocation6 + $0x48c] sm:$0xf]  ;;  %v7088_v3 = vadd.f32 %v1917_v59, %v1905_v58  ;;  %v4933_v42 = vld [vmem:[#allocation6 + $0x580] sm:$0xf]  ;;  %v6448_v43 = vld [vmem:[#allocation6 + $0x594] sm:$0xf0] }
  0xc6   :  { %2157 = vmatpush.bf16.msrb.mxu2 %v5122_v51  ;;  %v4807_v51 = vld [vmem:[#allocation6 + $0x4a0] sm:$0xf0]  ;;  %v4261_v34 = vld [vmem:[#allocation6 + $0x40] sm:$0xf] }
  0xc7   :  { %2170 = vmatpush.bf16.msrb.mxu3 %v5314_v55  ;;  %v4999_v55 = vld [vmem:[#allocation6 + $0x620] sm:$0xf0]  ;;  %v4810_v5 = vor.u32 %v6414_v50, %v4807_v51  ;;  %v4934_v50 = vor.u32 %v6448_v43, %v4933_v42  ;;  %v6346_v51 = vld [vmem:[#allocation6 + $0x264] sm:$0xf0]  ;;  %v4645_v42 = vld [vmem:[#allocation6 + $0x340] sm:$0xf] }
  0xc8   :  { %2132 = vmatpush.bf16.msrb.mxu0 %v4714_v61  ;;  %v6316_v61 = vld [vmem:[#allocation6 + $0x174] sm:$0xf0]  ;;  %v5002_v6 = vor.u32 %v6462_v52, %v4999_v55  ;;  %v1906_v28 = vpop.f32.mrf.mxu2  ;;  %v4717_v52 = vld [vmem:[#allocation6 + $0x3d0] sm:$0xf]  ;;  %v6442_v55 = vld [vmem:[#allocation6 + $0x564] sm:$0xf0] }
  0xc9   :  { %2145 = vmatpush.bf16.msrb.mxu1 %v4906_v63  ;;  %v4618_v63 = vor.u32 %v6366_v46, %v4615_v47  ;;  %v4742_v46 = vor.u32 %v6400_v41, %v4741_v40  ;;  %v4333_v47 = vld [vmem:[#allocation6 + $0xd0] sm:$0xf]  ;;  %v6328_v41 = vld [vmem:[#allocation6 + $0x1d4] sm:$0xf0] }
  0xca   :  { %2158 = vmatpush.bf16.msrb.mxu2 %v5098_v0  ;;  %v6364_v0 = vld [vmem:[#allocation6 + $0x2f4] sm:$0xf0] }
  0xcb   :  { %2171 = vmatpush.bf16.msrb.mxu3 %v5290_v4  ;;  %v1880_v4 = vpop.f32.mrf.mxu0  ;;  %v6376_v43 = vld [vmem:[#allocation6 + $0x354] sm:$0xf0] }
  0xcc   :  { %2133 = vmatpush.bf16.msrb.mxu0 %v4690_v10  ;;  %v1893_v10 = vpop.f32.mrf.mxu1  ;;  %v4693_v4 = vld [vmem:[#allocation6 + $0x3a0] sm:$0xf] }
  0xcd   :  { %2146 = vmatpush.bf16.msrb.mxu1 %v4882_v12  ;;  %v4406_v12 = vor.u32 %v6316_v61, %v4405_v60  ;;  %v4718_v61 = vor.u32 %v6394_v53, %v4717_v52  ;;  %v397_v10 = vperm.slane %v7085_v7, 1  ;;  %v6322_v52 = vld [vmem:[#allocation6 + $0x1a4] sm:$0xf0]  ;;  %v4621_v53 = vld [vmem:[#allocation6 + $0x310] sm:$0xf] }
  0xce   :  { %2159 = vmatpush.bf16.msrb.mxu2 %v5074_v13  ;;  %v4598_v13 = vor.u32 %v6364_v0, %v4597_v62  ;;  %v4309_v62 = vld [vmem:[#allocation6 + $0xa0] sm:$0xf] }
  0xcf   :  { %2172 = vmatpush.bf16.msrb.mxu3 %v5266_v17  ;;  %v4573_v17 = vld [vmem:[#allocation6 + $0x2b0] sm:$0xf]  ;;  %v4501_v0 = vld [vmem:[#allocation6 + $0x220] sm:$0xf] }
  0xd0   :  { %2134 = vmatpush.bf16.msrb.mxu0 %v4666_v27  ;;  %v6454_v27 = vld [vmem:[#allocation6 + $0x5c4] sm:$0xf0]  ;;  %v4574_v31 = vor.u32 %v6358_v23, %v4573_v17 }
  0xd1   :  { %2147 = vmatpush.bf16.msrb.mxu1 %v4858_v29  ;;  %v4382_v29 = vor.u32 %v6310_v16, %v4381_v15  ;;  %v4477_v15 = vld [vmem:[#allocation6 + $0x1f0] sm:$0xf]  ;;  %v4886_v16 = vor.u32 %v6436_v9, %v4885_v8  ;;  %v6334_v17 = vld [vmem:[#allocation6 + $0x204] sm:$0xf0]  ;;  %v6361_v8 = vld [vmem:[#allocation6 + $0x2e4] sm:$0xf] }
  0xd2   :  { %2160 = vmatpush.bf16.msrb.mxu2 %v5050_v30  ;;  %v1919_v30 = vpop.f32.mrf.mxu3  ;;  %v6382_v23 = vld [vmem:[#allocation6 + $0x384] sm:$0xf0]  ;;  %v4599_v9 = vld [vmem:[#allocation6 + $0x2f8] sm:$0xf0] }
  0xd3   :  { %2173 = vmatpush.bf16.msrb.mxu3 %v5242_v37  ;;  %v4958_v37 = vor.u32 %v6454_v27, %v4957_v26  ;;  %v6430_v26 = vld [vmem:[#allocation6 + $0x504] sm:$0xf0] }
  0xd4   :  { %2135 = vmatpush.bf16.msrb.mxu0 %v4642_v45  ;;  %v4550_v45 = vor.u32 %v6352_v39, %v4549_v36  ;;  %v6280_v36 = vld [vmem:[#allocation6 + $0x54] sm:$0xf0]  ;;  %v4862_v40 = vor.u32 %v6430_v26, %v4861_v25  ;;  %v4575_v25 = vld [vmem:[#allocation6 + $0x2c8] sm:$0xf0] }
  0xd5   :  { %2148 = vmatpush.bf16.msrb.mxu1 %v4834_v48  ;;  %v6298_v48 = vld [vmem:[#allocation6 + $0xe4] sm:$0xf0] }
  0xd6   :  { %2161 = vmatpush.bf16.msrb.mxu2 %v5026_v49  ;;  %v4525_v49 = vld [vmem:[#allocation6 + $0x250] sm:$0xf]  ;;  %v4334_v57 = vor.u32 %v6298_v48, %v4333_v47  ;;  %v6274_v48 = vld [vmem:[#allocation6 + $0x24] sm:$0xf0] }
  0xd7   :  { %2174 = vmatpush.bf16.msrb.mxu3 %v5218_v54  ;;  %v4909_v54 = vld [vmem:[#allocation6 + $0x550] sm:$0xf]  ;;  %v4526_v60 = vor.u32 %v6346_v51, %v4525_v49 }
  0xd8   :  { %2136 = vmatpush.bf16.msrb.mxu0 %v4618_v63  ;;  %v1930_v56 = vpop.f32.mrf.mxu0  ;;  %v6292_v63 = vld [vmem:[#allocation6 + $0xb4] sm:$0xf0]  ;;  %v4910_v1 = vor.u32 %v6442_v55, %v4909_v54  ;;  %v4237_v47 = vld [vmem:[#allocation6 + $0x10] sm:$0xf]  ;;  %v6370_v55 = vld [vmem:[#allocation6 + $0x324] sm:$0xf0] }
  0xd9   :  { %2149 = vmatpush.bf16.msrb.mxu1 %v4810_v5  ;;  %v1931_v58 = vadd.f32 %v1930_v56, %v7088_v3  ;;  %v1943_v59 = vpop.f32.mrf.mxu1  ;;  %v6388_v5 = vld [vmem:[#allocation6 + $0x3b4] sm:$0xf0]  ;;  %v4310_v3 = vor.u32 %v6292_v63, %v4309_v62  ;;  %v4429_v51 = vld [vmem:[#allocation6 + $0x190] sm:$0xf]  ;;  %v4238_v63 = vor.u32 %v6274_v48, %v4237_v47  ;;  %v6538_v48 = vld [vmem:[#allocation6 + $0x864] sm:$0xf0] }
  0xda   :  { %2162 = vmatpush.bf16.msrb.mxu2 %v5002_v6  ;;  %v4813_v56 = vld [vmem:[#allocation6 + $0x490] sm:$0xf] }
  0xdb   :  { %2175 = vmatpush.bf16.msrb.mxu3 %v5194_v11  ;;  %2137 = vmatmul.bf16.vlgmr.msrb.gmra.mxu0 %v7053_v18  ;;  %v7095_v6 = vadd.f32 %v1943_v59, %v1931_v58  ;;  %v4502_v11 = vor.u32 %v6340_v2, %v4501_v0  ;;  %v5173_v59 = vld [vmem:[#allocation6 + $0x760] sm:$0xf]  ;;  %v6556_v0 = vld [vmem:[#allocation6 + $0x8f4] sm:$0xf0]  ;;  %v4407_v2 = vld [vmem:[#allocation6 + $0x178] sm:$0xf0] }
  0xdc   :  { %2181 = vmatpush.bf16.msra.mxu0 %v4406_v12  ;;  %2150 = vmatmul.bf16.vlgmr.msrb.gmra.mxu1 %v7057_v20  ;;  %v4694_v12 = vor.u32 %v6388_v5, %v4693_v4  ;;  %v4430_v4 = vor.u32 %v6322_v52, %v4429_v51  ;;  %v4622_v5 = vor.u32 %v6370_v55, %v4621_v53  ;;  %v6343_v51 = vld [vmem:[#allocation6 + $0x254] sm:$0xf]  ;;  %v4527_v52 = vld [vmem:[#allocation6 + $0x268] sm:$0xf0] }
  0xdd   :  { %2194 = vmatpush.bf16.msra.mxu1 %v4598_v13  ;;  %2163 = vmatmul.bf16.vlgmr.msrb.gmra.mxu2 %v7065_v35  ;;  %v4285_v13 = vld [vmem:[#allocation6 + $0x70] sm:$0xf] }
  0xde   :  { %2207 = vmatpush.bf16.msra.mxu2 %v4790_v14  ;;  %2176 = vmatmul.bf16.vlgmr.msrb.gmra.mxu3 %v7067_v38  ;;  %v6286_v14 = vld [vmem:[#allocation6 + $0x84] sm:$0xf0] }
  0xdf   :  { %2220 = vmatpush.bf16.msra.mxu3 %v4982_v21  ;;  %v4669_v21 = vld [vmem:[#allocation6 + $0x370] sm:$0xf]  ;;  %v4286_v30 = vor.u32 %v6286_v14, %v4285_v13  ;;  %v6502_v14 = vld [vmem:[#allocation6 + $0x744] sm:$0xf0] }
  0xe0   :  { %2182 = vmatpush.bf16.msra.mxu0 %v4382_v29  ;;  %v1956_v24 = vpop.f32.mrf.mxu2  ;;  %v1932_v29 = vpop.f32.mrf.mxu0  ;;  %v4670_v33 = vor.u32 %v6382_v23, %v4669_v21  ;;  %v5149_v13 = vld [vmem:[#allocation6 + $0x730] sm:$0xf]  ;;  %v6307_v21 = vld [vmem:[#allocation6 + $0x134] sm:$0xf]  ;;  %v4383_v23 = vld [vmem:[#allocation6 + $0x148] sm:$0xf0] }
  0xe1   :  { %2195 = vmatpush.bf16.msra.mxu1 %v4574_v31  ;;  %v1957_v27 = vadd.f32 %v1956_v24, %v397_v10  ;;  %v1969_v28 = vpop.f32.mrf.mxu3  ;;  %v1945_v31 = vpop.f32.mrf.mxu1  ;;  %v6355_v24 = vld [vmem:[#allocation6 + $0x2b4] sm:$0xf]  ;;  %v5150_v26 = vor.u32 %v6502_v14, %v5149_v13  ;;  %v5125_v29 = vld [vmem:[#allocation6 + $0x700] sm:$0xf]  ;;  %v6526_v14 = vld [vmem:[#allocation6 + $0x804] sm:$0xf0] }
  0xe2   :  { %2208 = vmatpush.bf16.msra.mxu2 %v4766_v32  ;;  %v4478_v32 = vor.u32 %v6334_v17, %v4477_v15  ;;  %v5341_v15 = vld [vmem:[#allocation6 + $0x8b0] sm:$0xf]  ;;  %v6550_v17 = vld [vmem:[#allocation6 + $0x8c4] sm:$0xf0]  ;;  %v5317_v31 = vld [vmem:[#allocation6 + $0x880] sm:$0xf] }
  0xe3   :  { %2221 = vmatpush.bf16.msra.mxu3 %v4958_v37  ;;  %v4453_v37 = vld [vmem:[#allocation6 + $0x1c0] sm:$0xf]  ;;  %v7098_v39 = vadd.f32 %v1969_v28, %v1957_v27  ;;  %v5342_v27 = vor.u32 %v6550_v17, %v5341_v15  ;;  %v4386_v28 = vor.u32 %v6307_v21, %v4383_v23  ;;  %v6283_v15 = vld [vmem:[#allocation6 + $0x74] sm:$0xf] }
  0xe4   :  { %2183 = vmatpush.bf16.msra.mxu0 %v4358_v44  ;;  %v4837_v44 = vld [vmem:[#allocation6 + $0x4c0] sm:$0xf]  ;;  %v4454_v49 = vor.u32 %v6328_v41, %v4453_v37  ;;  %v6349_v37 = vld [vmem:[#allocation6 + $0x284] sm:$0xf]  ;;  %v6331_v23 = vld [vmem:[#allocation6 + $0x1f4] sm:$0xf] }
  0xe5   :  { %2196 = vmatpush.bf16.msra.mxu1 %v4550_v45  ;;  %v6424_v45 = vld [vmem:[#allocation6 + $0x4d4] sm:$0xf0] }
  0xe6   :  { %2209 = vmatpush.bf16.msra.mxu2 %v4742_v46  ;;  %v4262_v46 = vor.u32 %v6280_v36, %v4261_v34  ;;  %v4838_v54 = vor.u32 %v6424_v45, %v4837_v44  ;;  %v6301_v34 = vld [vmem:[#allocation6 + $0x104] sm:$0xf]  ;;  %v4359_v36 = vld [vmem:[#allocation6 + $0x118] sm:$0xf0]  ;;  %v5101_v44 = vld [vmem:[#allocation6 + $0x6d0] sm:$0xf] }
  0xe7   :  { %2222 = vmatpush.bf16.msra.mxu3 %v4934_v50  ;;  %v4646_v50 = vor.u32 %v6376_v43, %v4645_v42  ;;  %v4362_v43 = vor.u32 %v6301_v34, %v4359_v36  ;;  %v6490_v45 = vld [vmem:[#allocation6 + $0x6e4] sm:$0xf0]  ;;  %v6520_v36 = vld [vmem:[#allocation6 + $0x7d4] sm:$0xf0] }
  0xe8   :  { %2184 = vmatpush.bf16.msra.mxu0 %v4334_v57  ;;  %v6418_v57 = vld [vmem:[#allocation6 + $0x4a4] sm:$0xf0]  ;;  %v1958_v58 = vpop.f32.mrf.mxu2  ;;  %v5102_v53 = vor.u32 %v6490_v45, %v5101_v44  ;;  %v5005_v44 = vld [vmem:[#allocation6 + $0x610] sm:$0xf] }
  0xe9   :  { %2197 = vmatpush.bf16.msra.mxu1 %v4526_v60  ;;  %v6508_v60 = vld [vmem:[#allocation6 + $0x774] sm:$0xf0]  ;;  %v1971_v62 = vpop.f32.mrf.mxu3  ;;  %v4814_v10 = vor.u32 %v6418_v57, %v4813_v56  ;;  %v5077_v57 = vld [vmem:[#allocation6 + $0x6a0] sm:$0xf]  ;;  %v6466_v45 = vld [vmem:[#allocation6 + $0x624] sm:$0xf0] }
  0xea   :  { %2210 = vmatpush.bf16.msra.mxu2 %v4718_v61  ;;  %v5365_v61 = vld [vmem:[#allocation6 + $0x8e0] sm:$0xf]  ;;  %v6484_v58 = vld [vmem:[#allocation6 + $0x6b4] sm:$0xf0]  ;;  %v4530_v62 = vor.u32 %v6343_v51, %v4527_v52 }
  0xeb   :  { %2223 = vmatpush.bf16.msra.mxu3 %v4910_v1  ;;  %v6313_v1 = vld [vmem:[#allocation6 + $0x164] sm:$0xf] }
  0xec   :  { %2185 = vmatpush.bf16.msra.mxu0 %v4310_v3  ;;  %v5174_v3 = vor.u32 %v6508_v60, %v5173_v59  ;;  %v5269_v59 = vld [vmem:[#allocation6 + $0x820] sm:$0xf] }
  0xed   :  { %2198 = vmatpush.bf16.msra.mxu1 %v4502_v11  ;;  %v5366_v11 = vor.u32 %v6556_v0, %v5365_v61  ;;  %v6289_v0 = vld [vmem:[#allocation6 + $0xa4] sm:$0xf] }
  0xee   :  { %2211 = vmatpush.bf16.msra.mxu2 %v4694_v12  ;;  %v4410_v12 = vor.u32 %v6313_v1, %v4407_v2  ;;  %v4311_v1 = vld [vmem:[#allocation6 + $0xb8] sm:$0xf0]  ;;  %v6337_v2 = vld [vmem:[#allocation6 + $0x224] sm:$0xf] }
  0xef   :  { %2224 = vmatpush.bf16.msra.mxu3 %v4886_v16  ;;  %v4602_v16 = vor.u32 %v6361_v8, %v4599_v9  ;;  %v5078_v8 = vor.u32 %v6484_v58, %v5077_v57  ;;  %v6409_v57 = vld [vmem:[#allocation6 + $0x464] sm:$0xf]  ;;  %v4791_v58 = vld [vmem:[#allocation6 + $0x478] sm:$0xf0] }
  0xf0   :  { %2186 = vmatpush.bf16.msra.mxu0 %v4286_v30  ;;  %v6496_v30 = vld [vmem:[#allocation6 + $0x714] sm:$0xf0] }
  0xf1   :  { %2199 = vmatpush.bf16.msra.mxu1 %v4478_v32  ;;  %v4578_v32 = vor.u32 %v6355_v24, %v4575_v25  ;;  %v5126_v41 = vor.u32 %v6496_v30, %v5125_v29  ;;  %v4479_v24 = vld [vmem:[#allocation6 + $0x208] sm:$0xf0]  ;;  %v5029_v30 = vld [vmem:[#allocation6 + $0x640] sm:$0xf] }
  0xf2   :  { %2212 = vmatpush.bf16.msra.mxu2 %v4670_v33  ;;  %v6544_v33 = vld [vmem:[#allocation6 + $0x894] sm:$0xf0]  ;;  %v4482_v34 = vor.u32 %v6331_v23, %v4479_v24 }
  0xf3   :  { %2225 = vmatpush.bf16.msra.mxu3 %v4862_v40  ;;  %v4551_v40 = vld [vmem:[#allocation6 + $0x298] sm:$0xf0]  ;;  %v5318_v42 = vor.u32 %v6544_v33, %v5317_v31  ;;  %v6472_v31 = vld [vmem:[#allocation6 + $0x654] sm:$0xf0] }
  0xf4   :  { %2187 = vmatpush.bf16.msra.mxu0 %v4262_v46  ;;  %v5293_v46 = vld [vmem:[#allocation6 + $0x850] sm:$0xf]  ;;  %v4554_v47 = vor.u32 %v6349_v37, %v4551_v40  ;;  %v6277_v37 = vld [vmem:[#allocation6 + $0x44] sm:$0xf]  ;;  %v4263_v40 = vld [vmem:[#allocation6 + $0x58] sm:$0xf0] }
  0xf5   :  { %2200 = vmatpush.bf16.msra.mxu1 %v4454_v49  ;;  %v6295_v49 = vld [vmem:[#allocation6 + $0xd4] sm:$0xf]  ;;  %v5294_v55 = vor.u32 %v6538_v48, %v5293_v46  ;;  %v5197_v48 = vld [vmem:[#allocation6 + $0x790] sm:$0xf] }
  0xf6   :  { %2213 = vmatpush.bf16.msra.mxu2 %v4646_v50  ;;  %v4335_v50 = vld [vmem:[#allocation6 + $0xe8] sm:$0xf0] }
  0xf7   :  { %2226 = vmatpush.bf16.msra.mxu3 %v4838_v54  ;;  %v4338_v56 = vor.u32 %v6295_v49, %v4335_v50  ;;  %v6514_v49 = vld [vmem:[#allocation6 + $0x7a4] sm:$0xf0]  ;;  %v6271_v50 = vld [vmem:[#allocation6 + $0x14] sm:$0xf] }
  0xf8   :  { %2188 = vmatpush.bf16.msra.mxu0 %v4238_v63  ;;  %v1982_v54 = vpop.f32.mrf.mxu0  ;;  %v6532_v63 = vld [vmem:[#allocation6 + $0x834] sm:$0xf0] }
  0xf9   :  { %2201 = vmatpush.bf16.msra.mxu1 %v4430_v4  ;;  %v1983_v60 = vadd.f32 %v1982_v54, %v7098_v39  ;;  %v1995_v61 = vpop.f32.mrf.mxu1  ;;  %v4503_v4 = vld [vmem:[#allocation6 + $0x238] sm:$0xf0]  ;;  %v5270_v9 = vor.u32 %v6532_v63, %v5269_v59  ;;  %v6319_v54 = vld [vmem:[#allocation6 + $0x194] sm:$0xf]  ;;  %v6457_v59 = vld [vmem:[#allocation6 + $0x5e4] sm:$0xf] }
  0xfa   :  { %2214 = vmatpush.bf16.msra.mxu2 %v4622_v5  ;;  %v4506_v39 = vor.u32 %v6337_v2, %v4503_v4  ;;  %v5175_v63 = vld [vmem:[#allocation6 + $0x778] sm:$0xf0]  ;;  %v6553_v2 = vld [vmem:[#allocation6 + $0x8e4] sm:$0xf] }
  0xfb   :  { %2227 = vmatpush.bf16.msra.mxu3 %v4814_v10  ;;  %2189 = vmatmul.bf16.vlgmr.msra.gmra.mxu0 %v7055_v19  ;;  %v1996_v5 = vadd.f32 %v1995_v61, %v1983_v60  ;;  %v4314_v10 = vor.u32 %v6289_v0, %v4311_v1  ;;  %v5006_v60 = vor.u32 %v6466_v45, %v5005_v44  ;;  %v4983_v61 = vld [vmem:[#allocation6 + $0x5f8] sm:$0xf0]  ;;  %v4911_v45 = vld [vmem:[#allocation6 + $0x568] sm:$0xf0] }
  0xfc   :  { %2233 = vmatpush.bf16.msrb.mxu0 %v5174_v3  ;;  %2202 = vmatmul.bf16.vlgmr.msra.gmra.mxu1 %v7059_v22  ;;  %v5053_v3 = vld [vmem:[#allocation6 + $0x670] sm:$0xf]  ;;  %v5198_v0 = vor.u32 %v6514_v49, %v5197_v48  ;;  %v5367_v4 = vld [vmem:[#allocation6 + $0x8f8] sm:$0xf0]  ;;  %v6535_v48 = vld [vmem:[#allocation6 + $0x854] sm:$0xf] }
  0xfd   :  { %2246 = vmatpush.bf16.msrb.mxu1 %v5366_v11  ;;  %2215 = vmatmul.bf16.vlgmr.msra.gmra.mxu2 %v7053_v18  ;;  %v6478_v11 = vld [vmem:[#allocation6 + $0x684] sm:$0xf0] }
  0xfe   :  { %2259 = vmatpush.bf16.msrb.mxu2 %v4410_v12  ;;  %2228 = vmatmul.bf16.vlgmr.msra.gmra.mxu3 %v7057_v20  ;;  %v5245_v12 = vld [vmem:[#allocation6 + $0x7f0] sm:$0xf]  ;;  %v5054_v25 = vor.u32 %v6478_v11, %v5053_v3  ;;  %v6403_v3 = vld [vmem:[#allocation6 + $0x434] sm:$0xf]  ;;  %v4767_v11 = vld [vmem:[#allocation6 + $0x448] sm:$0xf0] }
  0xff   :  { %2272 = vmatpush.bf16.msrb.mxu3 %v4602_v16  ;;  %v4287_v16 = vld [vmem:[#allocation6 + $0x88] sm:$0xf0] }
 0x100   :  { %2234 = vmatpush.bf16.msrb.mxu0 %v5150_v26  ;;  %v2008_v13 = vpop.f32.mrf.mxu2  ;;  %v4290_v29 = vor.u32 %v6283_v15, %v4287_v16  ;;  %v5151_v15 = vld [vmem:[#allocation6 + $0x748] sm:$0xf0]  ;;  %v6547_v16 = vld [vmem:[#allocation6 + $0x8b4] sm:$0xf] }
 0x101   :  { %2247 = vmatpush.bf16.msrb.mxu1 %v5342_v27  ;;  %v2009_v17 = vadd.f32 %v2008_v13, %v1996_v5  ;;  %v2021_v21 = vpop.f32.mrf.mxu3  ;;  %v1984_v27 = vpop.f32.mrf.mxu0  ;;  %v5370_v13 = vor.u32 %v6553_v2, %v5367_v4  ;;  %v4671_v2 = vld [vmem:[#allocation6 + $0x388] sm:$0xf0]  ;;  %v6427_v4 = vld [vmem:[#allocation6 + $0x4f4] sm:$0xf] }
 0x102   :  { %2260 = vmatpush.bf16.msrb.mxu2 %v4386_v28  ;;  %v5246_v28 = vor.u32 %v6526_v14, %v5245_v12  ;;  %v1997_v33 = vpop.f32.mrf.mxu1  ;;  %v6451_v12 = vld [vmem:[#allocation6 + $0x5b4] sm:$0xf]  ;;  %v4743_v27 = vld [vmem:[#allocation6 + $0x418] sm:$0xf0] }
 0x103   :  { %2273 = vmatpush.bf16.msrb.mxu3 %v4578_v32  ;;  %v7105_v26 = vadd.f32 %v2021_v21, %v2009_v17  ;;  %v5221_v32 = vld [vmem:[#allocation6 + $0x7c0] sm:$0xf]  ;;  %v6499_v14 = vld [vmem:[#allocation6 + $0x734] sm:$0xf]  ;;  %v5343_v17 = vld [vmem:[#allocation6 + $0x8c8] sm:$0xf0]  ;;  %v4770_v21 = vor.u32 %v6403_v3, %v4767_v11 }
 0x104   :  { %2235 = vmatpush.bf16.msrb.mxu0 %v5126_v41  ;;  %v6325_v41 = vld [vmem:[#allocation6 + $0x1c4] sm:$0xf]  ;;  %v5222_v46 = vor.u32 %v6520_v36, %v5221_v32  ;;  %v5154_v24 = vor.u32 %v6499_v14, %v5151_v15  ;;  %v5127_v32 = vld [vmem:[#allocation6 + $0x718] sm:$0xf0]  ;;  %v6523_v11 = vld [vmem:[#allocation6 + $0x7f4] sm:$0xf] }
 0x105   :  { %2248 = vmatpush.bf16.msrb.mxu1 %v5318_v42  ;;  %v4455_v42 = vld [vmem:[#allocation6 + $0x1d8] sm:$0xf0]  ;;  %v6541_v33 = vld [vmem:[#allocation6 + $0x884] sm:$0xf] }
 0x106   :  { %2261 = vmatpush.bf16.msrb.mxu2 %v4362_v43  ;;  %v5030_v43 = vor.u32 %v6472_v31, %v5029_v30  ;;  %v4458_v52 = vor.u32 %v6325_v41, %v4455_v42  ;;  %v4935_v30 = vld [vmem:[#allocation6 + $0x598] sm:$0xf0]  ;;  %v6493_v31 = vld [vmem:[#allocation6 + $0x704] sm:$0xf]  ;;  %v6391_v41 = vld [vmem:[#allocation6 + $0x3d4] sm:$0xf] }
 0x107   :  { %2274 = vmatpush.bf16.msrb.mxu3 %v4554_v47  ;;  %v4266_v47 = vor.u32 %v6277_v37, %v4263_v40  ;;  %v5130_v40 = vor.u32 %v6493_v31, %v5127_v32  ;;  %v4719_v42 = vld [vmem:[#allocation6 + $0x3e8] sm:$0xf0]  ;;  %v5223_v31 = vld [vmem:[#allocation6 + $0x7d8] sm:$0xf0] }
 0x108   :  { %2236 = vmatpush.bf16.msrb.mxu0 %v5102_v53  ;;  %v2010_v51 = vpop.f32.mrf.mxu2  ;;  %v4239_v53 = vld [vmem:[#allocation6 + $0x28] sm:$0xf0] }
 0x109   :  { %2249 = vmatpush.bf16.msrb.mxu1 %v5294_v55  ;;  %v4431_v55 = vld [vmem:[#allocation6 + $0x1a8] sm:$0xf0]  ;;  %v4242_v1 = vor.u32 %v6271_v50, %v4239_v53  ;;  %v4722_v50 = vor.u32 %v6391_v41, %v4719_v42  ;;  %v6385_v53 = vld [vmem:[#allocation6 + $0x3a4] sm:$0xf]  ;;  %v6463_v42 = vld [vmem:[#allocation6 + $0x614] sm:$0xf] }
 0x10a   :  { %2262 = vmatpush.bf16.msrb.mxu2 %v4338_v56  ;;  %v2023_v56 = vpop.f32.mrf.mxu3  ;;  %v4434_v5 = vor.u32 %v6319_v54, %v4431_v55  ;;  %v4695_v54 = vld [vmem:[#allocation6 + $0x3b8] sm:$0xf0]  ;;  %v6433_v55 = vld [vmem:[#allocation6 + $0x524] sm:$0xf]  ;;  %v4815_v41 = vld [vmem:[#allocation6 + $0x4a8] sm:$0xf0] }
 0x10b   :  { %2275 = vmatpush.bf16.msrb.mxu3 %v4530_v62  ;;  %v6505_v62 = vld [vmem:[#allocation6 + $0x764] sm:$0xf] }
 0x10c   :  { %2237 = vmatpush.bf16.msrb.mxu0 %v5078_v8  ;;  %v4794_v8 = vor.u32 %v6409_v57, %v4791_v58  ;;  %v4887_v57 = vld [vmem:[#allocation6 + $0x538] sm:$0xf0]  ;;  %v6481_v58 = vld [vmem:[#allocation6 + $0x6a4] sm:$0xf] }
 0x10d   :  { %2250 = vmatpush.bf16.msrb.mxu1 %v5270_v9  ;;  %v4986_v9 = vor.u32 %v6457_v59, %v4983_v61  ;;  %v5079_v59 = vld [vmem:[#allocation6 + $0x6b8] sm:$0xf0] }
 0x10e   :  { %2263 = vmatpush.bf16.msrb.mxu2 %v4314_v10  ;;  %v5178_v10 = vor.u32 %v6505_v62, %v5175_v63  ;;  %v5271_v61 = vld [vmem:[#allocation6 + $0x838] sm:$0xf0]  ;;  %v4698_v62 = vor.u32 %v6385_v53, %v4695_v54  ;;  %v4890_v63 = vor.u32 %v6433_v55, %v4887_v57  ;;  %v6619_v54 = vld [vmem:[#allocation8 + $0x1ec] sm:$0xf0]  ;;  %v5741_v55 = vld [vmem:[#allocation8 + $0x2e0] sm:$0xf] }
 0x10f   :  { %2276 = vmatpush.bf16.msrb.mxu3 %v4506_v39  ;;  %v4959_v39 = vld [vmem:[#allocation6 + $0x5c8] sm:$0xf0] }
 0x110   :  { %2238 = vmatpush.bf16.msrb.mxu0 %v5054_v25  ;;  %v4962_v23 = vor.u32 %v6451_v12, %v4959_v39  ;;  %v6397_v25 = vld [vmem:[#allocation6 + $0x404] sm:$0xf]  ;;  %v5247_v12 = vld [vmem:[#allocation6 + $0x808] sm:$0xf0] }
 0x111   :  { %2251 = vmatpush.bf16.msrb.mxu1 %v5246_v28  ;;  %v6445_v28 = vld [vmem:[#allocation6 + $0x584] sm:$0xf]  ;;  %v4746_v36 = vor.u32 %v6397_v25, %v4743_v27  ;;  %v5250_v25 = vor.u32 %v6523_v11, %v5247_v12  ;;  %v4839_v27 = vld [vmem:[#allocation6 + $0x4d8] sm:$0xf0]  ;;  %v5453_v11 = vld [vmem:[#allocation8 + $0xa0] sm:$0xf] }
 0x112   :  { %2264 = vmatpush.bf16.msrb.mxu2 %v4290_v29  ;;  %v5346_v29 = vor.u32 %v6547_v16, %v5343_v17  ;;  %v4938_v37 = vor.u32 %v6445_v28, %v4935_v30  ;;  %v6469_v28 = vld [vmem:[#allocation6 + $0x644] sm:$0xf]  ;;  %v6579_v12 = vld [vmem:[#allocation8 + $0xac] sm:$0xf0] }
 0x113   :  { %2277 = vmatpush.bf16.msrb.mxu3 %v4482_v34  ;;  %v5319_v34 = vld [vmem:[#allocation6 + $0x898] sm:$0xf0]  ;;  %v6517_v30 = vld [vmem:[#allocation6 + $0x7c4] sm:$0xf] }
 0x114   :  { %2239 = vmatpush.bf16.msrb.mxu0 %v5030_v43  ;;  %v6439_v43 = vld [vmem:[#allocation6 + $0x554] sm:$0xf]  ;;  %v5322_v44 = vor.u32 %v6541_v33, %v5319_v34  ;;  %v4623_v34 = vld [vmem:[#allocation6 + $0x328] sm:$0xf0] }
 0x115   :  { %2252 = vmatpush.bf16.msrb.mxu1 %v5222_v46  ;;  %v6487_v46 = vld [vmem:[#allocation6 + $0x6d4] sm:$0xf] }
 0x116   :  { %2265 = vmatpush.bf16.msrb.mxu2 %v4266_v47  ;;  %v5103_v47 = vld [vmem:[#allocation6 + $0x6e8] sm:$0xf0]  ;;  %v6367_v33 = vld [vmem:[#allocation6 + $0x314] sm:$0xf] }
 0x117   :  { %2278 = vmatpush.bf16.msrb.mxu3 %v4458_v52  ;;  %v5106_v52 = vor.u32 %v6487_v46, %v5103_v47  ;;  %v6511_v46 = vld [vmem:[#allocation6 + $0x794] sm:$0xf]  ;;  %v5199_v47 = vld [vmem:[#allocation6 + $0x7a8] sm:$0xf0]  ;;  %v4626_v53 = vor.u32 %v6367_v33, %v4623_v34  ;;  %v6675_v33 = vld [vmem:[#allocation8 + $0x3ac] sm:$0xf0] }
 0x118   :  { %2240 = vmatpush.bf16.msrb.mxu0 %v5006_v60  ;;  %v7111_v49 = vpop.f32.mrf.mxu0  ;;  %v6529_v60 = vld [vmem:[#allocation6 + $0x824] sm:$0xf]  ;;  %v6607_v34 = vld [vmem:[#allocation8 + $0x18c] sm:$0xf0] }
 0x119   :  { %2253 = vmatpush.bf16.msrb.mxu1 %v5198_v0  ;;  %v7113_v51 = vpop.f32.mrf.mxu1  ;;  %v5082_v0 = vor.u32 %v6481_v58, %v5079_v59  ;;  %v5202_v59 = vor.u32 %v6511_v46, %v5199_v47  ;;  %v5549_v46 = vld [vmem:[#allocation8 + $0x160] sm:$0xf] }
 0x11a   :  { %2266 = vmatpush.bf16.msrb.mxu2 %v4242_v1  ;;  %v6379_v1 = vld [vmem:[#allocation6 + $0x374] sm:$0xf]  ;;  %v5821_v47 = vld [vmem:[#allocation8 + $0x380] sm:$0xf] }
 0x11b   :  { %2279 = vmatpush.bf16.msrb.mxu3 %v4434_v5  ;;  %2241 = vmatmul.bf16.vlgmr.msrb.gmra.mxu0 %v7065_v35  ;;  %v5274_v5 = vor.u32 %v6529_v60, %v5271_v61  ;;  %v4674_v14 = vor.u32 %v6379_v1, %v4671_v2  ;;  %v5469_v61 = vld [vmem:[#allocation8 + $0xc0] sm:$0xf] }
 0x11c   :  { %2285 = vmatpush.bf16.msra.mxu0 %v4794_v8  ;;  %2254 = vmatmul.bf16.vlgmr.msrb.gmra.mxu1 %v7067_v38  ;;  %v4863_v8 = vld [vmem:[#allocation6 + $0x508] sm:$0xf0]  ;;  %v5597_v1 = vld [vmem:[#allocation8 + $0x1c0] sm:$0xf] }
 0x11d   :  { %2298 = vmatpush.bf16.msra.mxu1 %v4986_v9  ;;  %2267 = vmatmul.bf16.vlgmr.msrb.gmra.mxu2 %v7055_v19  ;;  %v5295_v19 = vld [vmem:[#allocation6 + $0x868] sm:$0xf0]  ;;  %v6475_v9 = vld [vmem:[#allocation6 + $0x674] sm:$0xf]  ;;  %v4866_v16 = vor.u32 %v6427_v4, %v4863_v8  ;;  %v5869_v2 = vld [vmem:[#allocation8 + $0x3e0] sm:$0xf] }
 0x11e   :  { %2311 = vmatpush.bf16.msra.mxu2 %v5178_v10  ;;  %2280 = vmatmul.bf16.vlgmr.msrb.gmra.mxu3 %v7059_v22  ;;  %v4914_v22 = vor.u32 %v6439_v43, %v4911_v45  ;;  %v5298_v56 = vor.u32 %v6535_v48, %v5295_v19  ;;  %v5055_v10 = vld [vmem:[#allocation6 + $0x688] sm:$0xf0]  ;;  %v398_v43 = vperm.slane %v7085_v7, 2  ;;  %v5485_v19 = vld [vmem:[#allocation8 + $0xe0] sm:$0xf] }
 0x11f   :  { %2324 = vmatpush.bf16.msra.mxu3 %v5370_v13  ;;  %v5058_v17 = vor.u32 %v6475_v9, %v5055_v10  ;;  %v5007_v45 = vld [vmem:[#allocation6 + $0x628] sm:$0xf0]  ;;  %v6683_v4 = vld [vmem:[#allocation8 + $0x3ec] sm:$0xf0]  ;;  %v5725_v8 = vld [vmem:[#allocation8 + $0x2c0] sm:$0xf] }
 0x120   :  { %2286 = vmatpush.bf16.msra.mxu0 %v4770_v21  ;;  %v7115_v3 = vpop.f32.mrf.mxu2  ;;  %v2036_v13 = vpop.f32.mrf.mxu0  ;;  %v6373_v21 = vld [vmem:[#allocation6 + $0x344] sm:$0xf]  ;;  %v5010_v58 = vor.u32 %v6463_v42, %v5007_v45  ;;  %v2035_v7 = vadd.f32 %v7111_v49, %v398_v43  ;;  %v6647_v9 = vld [vmem:[#allocation8 + $0x2cc] sm:$0xf0] }
 0x121   :  { %2299 = vmatpush.bf16.msra.mxu1 %v4962_v23  ;;  %v7117_v39 = vpop.f32.mrf.mxu3  ;;  %v2049_v15 = vpop.f32.mrf.mxu1  ;;  %v4647_v23 = vld [vmem:[#allocation6 + $0x358] sm:$0xf0]  ;;  %v5870_v13 = vor.u32 %v6683_v4, %v5869_v2 }
 0x122   :  { %2312 = vmatpush.bf16.msra.mxu2 %v5154_v24  ;;  %v6421_v24 = vld [vmem:[#allocation6 + $0x4c4] sm:$0xf]  ;;  %v4650_v32 = vor.u32 %v6373_v21, %v4647_v23  ;;  %v2048_v10 = vadd.f32 %v7113_v51, %v2035_v7  ;;  %v5726_v15 = vor.u32 %v6647_v9, %v5725_v8  ;;  %v6679_v21 = vld [vmem:[#allocation8 + $0x3cc] sm:$0xf0]  ;;  %v5805_v7 = vld [vmem:[#allocation8 + $0x360] sm:$0xf] }
 0x123   :  { %2325 = vmatpush.bf16.msra.mxu3 %v5346_v29  ;;  %v5031_v29 = vld [vmem:[#allocation6 + $0x658] sm:$0xf0]  ;;  %v6611_v23 = vld [vmem:[#allocation8 + $0x1ac] sm:$0xf0] }
 0x124   :  { %2287 = vmatpush.bf16.msra.mxu0 %v4746_v36  ;;  %v6415_v36 = vld [vmem:[#allocation6 + $0x494] sm:$0xf]  ;;  %v6643_v51 = vld [vmem:[#allocation8 + $0x2ac] sm:$0xf0] }
 0x125   :  { %2300 = vmatpush.bf16.msra.mxu1 %v4938_v37  ;;  %v4842_v37 = vor.u32 %v6421_v24, %v4839_v27  ;;  %v4818_v57 = vor.u32 %v6415_v36, %v4815_v41  ;;  %v5709_v24 = vld [vmem:[#allocation8 + $0x2a0] sm:$0xf]  ;;  %v5454_v27 = vor.u32 %v6579_v12, %v5453_v11  ;;  %v6571_v41 = vld [vmem:[#allocation8 + $0x6c] sm:$0xf0] }
 0x126   :  { %2313 = vmatpush.bf16.msra.mxu2 %v5130_v40  ;;  %v5034_v40 = vor.u32 %v6469_v28, %v5031_v29  ;;  %v5437_v28 = vld [vmem:[#allocation8 + $0x80] sm:$0xf]  ;;  %v6575_v29 = vld [vmem:[#allocation8 + $0x8c] sm:$0xf0] }
 0x127   :  { %2326 = vmatpush.bf16.msra.mxu3 %v5322_v44  ;;  %v5226_v44 = vor.u32 %v6517_v30, %v5223_v31  ;;  %v5710_v31 = vor.u32 %v6643_v51, %v5709_v24  ;;  %v5693_v36 = vld [vmem:[#allocation8 + $0x280] sm:$0xf]  ;;  %v6563_v8 = vld [vmem:[#allocation8 + $0x2c] sm:$0xf0] }
 0x128   :  { %2288 = vmatpush.bf16.msra.mxu0 %v4722_v50  ;;  %v2062_v48 = vpop.f32.mrf.mxu2  ;;  %v6587_v50 = vld [vmem:[#allocation8 + $0xec] sm:$0xf0]  ;;  %v5517_v12 = vld [vmem:[#allocation8 + $0x120] sm:$0xf] }
 0x129   :  { %2301 = vmatpush.bf16.msra.mxu1 %v4914_v22  ;;  %v5613_v22 = vld [vmem:[#allocation8 + $0x1e0] sm:$0xf]  ;;  %v5486_v60 = vor.u32 %v6587_v50, %v5485_v19  ;;  %v6671_v48 = vld [vmem:[#allocation8 + $0x38c] sm:$0xf0] }
 0x12a   :  { %2314 = vmatpush.bf16.msra.mxu2 %v5106_v52  ;;  %v2075_v52 = vpop.f32.mrf.mxu3  ;;  %v6603_v19 = vld [vmem:[#allocation8 + $0x16c] sm:$0xf0]  ;;  %v5677_v50 = vld [vmem:[#allocation8 + $0x260] sm:$0xf] }
 0x12b   :  { %2327 = vmatpush.bf16.msra.mxu3 %v5298_v56  ;;  %v6651_v56 = vld [vmem:[#allocation8 + $0x2ec] sm:$0xf0]  ;;  %v5501_v51 = vld [vmem:[#allocation8 + $0x100] sm:$0xf] }
 0x12c   :  { %2289 = vmatpush.bf16.msra.mxu0 %v4698_v62  ;;  %v6583_v62 = vld [vmem:[#allocation8 + $0xcc] sm:$0xf0] }
 0x12d   :  { %2302 = vmatpush.bf16.msra.mxu1 %v4890_v63  ;;  %v5614_v63 = vor.u32 %v6619_v54, %v5613_v22  ;;  %v5470_v49 = vor.u32 %v6583_v62, %v5469_v61  ;;  %v6635_v22 = vld [vmem:[#allocation8 + $0x26c] sm:$0xf0]  ;;  %v5661_v61 = vld [vmem:[#allocation8 + $0x240] sm:$0xf] }
 0x12e   :  { %2315 = vmatpush.bf16.msra.mxu2 %v5082_v0  ;;  %v5742_v0 = vor.u32 %v6651_v56, %v5741_v55  ;;  %v6567_v54 = vld [vmem:[#allocation8 + $0x4c] sm:$0xf0]  ;;  %v5822_v55 = vor.u32 %v6671_v48, %v5821_v47  ;;  %v5550_v56 = vor.u32 %v6603_v19, %v5549_v46  ;;  %v5757_v46 = vld [vmem:[#allocation8 + $0x300] sm:$0xf] }
 0x12f   :  { %2328 = vmatpush.bf16.msra.mxu3 %v5274_v5  ;;  %v6615_v5 = vld [vmem:[#allocation8 + $0x1cc] sm:$0xf0] }
 0x130   :  { %2290 = vmatpush.bf16.msra.mxu0 %v4674_v14  ;;  %v5598_v14 = vor.u32 %v6615_v5, %v5597_v1  ;;  %v6631_v62 = vld [vmem:[#allocation8 + $0x24c] sm:$0xf0]  ;;  %v5389_v5 = vld [vmem:[#allocation8 + $0x20] sm:$0xf] }
 0x131   :  { %2303 = vmatpush.bf16.msra.mxu1 %v4866_v16  ;;  %v5581_v16 = vld [vmem:[#allocation8 + $0x1a0] sm:$0xf]  ;;  %v5662_v11 = vor.u32 %v6631_v62, %v5661_v61  ;;  %v6559_v24 = vld [vmem:[#allocation8 + $0xc] sm:$0xf0]  ;;  %v5455_v61 = vld [vmem:[#allocation8 + $0xb0] sm:$0xf0] }
 0x132   :  { %2316 = vmatpush.bf16.msra.mxu2 %v5058_v17  ;;  %v5853_v17 = vld [vmem:[#allocation8 + $0x3c0] sm:$0xf]  ;;  %v6655_v47 = vld [vmem:[#allocation8 + $0x30c] sm:$0xf0]  ;;  %v6613_v62 = vld [vmem:[#allocation8 + $0x1c4] sm:$0xf] }
 0x133   :  { %2329 = vmatpush.bf16.msra.mxu3 %v5250_v25  ;;  %v2061_v25 = vadd.f32 %v7115_v3, %v2048_v10  ;;  %v5854_v30 = vor.u32 %v6679_v21, %v5853_v17  ;;  %v5438_v3 = vor.u32 %v6575_v29, %v5437_v28  ;;  %v6627_v17 = vld [vmem:[#allocation8 + $0x22c] sm:$0xf0]  ;;  %v5390_v21 = vor.u32 %v6563_v8, %v5389_v5 }
 0x134   :  { %2291 = vmatpush.bf16.msra.mxu0 %v4650_v32  ;;  %v5837_v32 = vld [vmem:[#allocation8 + $0x3a0] sm:$0xf]  ;;  %v6591_v29 = vld [vmem:[#allocation8 + $0x10c] sm:$0xf0] }
 0x135   :  { %2304 = vmatpush.bf16.msra.mxu1 %v4842_v37  ;;  %v5838_v43 = vor.u32 %v6675_v33, %v5837_v32  ;;  %v6585_v32 = vld [vmem:[#allocation8 + $0xe4] sm:$0xf]  ;;  %v5487_v33 = vld [vmem:[#allocation8 + $0xf0] sm:$0xf0]  ;;  %v6707_v5 = vld [vmem:[#allocation8 + $0x4ac] sm:$0xf0] }
 0x136   :  { %2317 = vmatpush.bf16.msra.mxu2 %v5034_v40  ;;  %v5421_v40 = vld [vmem:[#allocation8 + $0x60] sm:$0xf] }
 0x137   :  { %2330 = vmatpush.bf16.msra.mxu3 %v5226_v44 }
 0x138   :  { %2292 = vmatpush.bf16.msra.mxu0 %v4626_v53  ;;  %v2086_v37 = vpop.f32.mrf.mxu0  ;;  %v5405_v53 = vld [vmem:[#allocation8 + $0x40] sm:$0xf] }
 0x139   :  { %2305 = vmatpush.bf16.msra.mxu1 %v4818_v57  ;;  %v2099_v42 = vpop.f32.mrf.mxu1  ;;  %v5678_v57 = vor.u32 %v6635_v22, %v5677_v50  ;;  %v5406_v4 = vor.u32 %v6567_v54, %v5405_v53  ;;  %v5471_v50 = vld [vmem:[#allocation8 + $0xd0] sm:$0xf0]  ;;  %v6617_v22 = vld [vmem:[#allocation8 + $0x1e4] sm:$0xf]  ;;  %v5981_v53 = vld [vmem:[#allocation8 + $0x4c0] sm:$0xf] }
 0x13a   :  { %2318 = vmatpush.bf16.msra.mxu2 %v5010_v58  ;;  %v5533_v58 = vld [vmem:[#allocation8 + $0x140] sm:$0xf]  ;;  %v6711_v54 = vld [vmem:[#allocation8 + $0x4cc] sm:$0xf0] }
 0x13b   :  { %2331 = vmatpush.bf16.msra.mxu3 %v5202_v59  ;;  %2293 = vmatmul.bf16.vlgmr.msra.gmra.mxu0 %v7053_v18  ;;  %v5582_v18 = vor.u32 %v6611_v23, %v5581_v16  ;;  %v6667_v59 = vld [vmem:[#allocation8 + $0x36c] sm:$0xf0]  ;;  %v5645_v16 = vld [vmem:[#allocation8 + $0x220] sm:$0xf] }
 0x13c   :  { %3510 = vmatpush.bf16.msrb.mxu0 %v5486_v60  ;;  %2306 = vmatmul.bf16.vlgmr.msra.gmra.mxu1 %v7057_v20  ;;  %v5565_v20 = vld [vmem:[#allocation8 + $0x180] sm:$0xf]  ;;  %v6599_v60 = vld [vmem:[#allocation8 + $0x14c] sm:$0xf0]  ;;  %v5806_v9 = vor.u32 %v6667_v59, %v5805_v7  ;;  %v5646_v28 = vor.u32 %v6627_v17, %v5645_v16  ;;  %v6577_v7 = vld [vmem:[#allocation8 + $0xa4] sm:$0xf] }
 0x13d   :  { %3523 = vmatpush.bf16.msrb.mxu1 %v5614_v63  ;;  %2319 = vmatmul.bf16.vlgmr.msra.gmra.mxu2 %v7065_v35  ;;  %v6639_v35 = vld [vmem:[#allocation8 + $0x28c] sm:$0xf0]  ;;  %v5566_v44 = vor.u32 %v6607_v34, %v5565_v20  ;;  %v5373_v23 = vld [vmem:[#allocation8] sm:$0xf]  ;;  %v5458_v8 = vor.u32 %v6577_v7, %v5455_v61  ;;  %v6713_v7 = vld [vmem:[#allocation8 + $0x4e4] sm:$0xf] }
 0x13e   :  { %3536 = vmatpush.bf16.msrb.mxu2 %v5742_v0  ;;  %2332 = vmatmul.bf16.vlgmr.msra.gmra.mxu3 %v7067_v38  ;;  %v2074_v38 = vadd.f32 %v7117_v39, %v2061_v25  ;;  %v5694_v45 = vor.u32 %v6639_v35, %v5693_v36  ;;  %v5422_v39 = vor.u32 %v6571_v41, %v5421_v40  ;;  %v6623_v20 = vld [vmem:[#allocation8 + $0x20c] sm:$0xf0]  ;;  %v5997_v36 = vld [vmem:[#allocation8 + $0x4e0] sm:$0xf] }
 0x13f   :  { %3549 = vmatpush.bf16.msrb.mxu3 %v5870_v13  ;;  %v5789_v13 = vld [vmem:[#allocation8 + $0x340] sm:$0xf]  ;;  %v6715_v35 = vld [vmem:[#allocation8 + $0x4ec] sm:$0xf0] }
 0x140   :  { %3511 = vmatpush.bf16.msrb.mxu0 %v5470_v49  ;;  %v2087_v52 = vadd.f32 %v2086_v37, %v2074_v38  ;;  %v7128_v63 = vpop.f32.mrf.mxu2  ;;  %v2088_v2 = vpop.f32.mrf.mxu0  ;;  %v5534_v49 = vor.u32 %v6599_v60, %v5533_v58  ;;  %v5374_v38 = vor.u32 %v6559_v24, %v5373_v23  ;;  %v7134_v41 = vld [vmem:[#allocation11] sm:$0x3f]  ;;  %v5998_v48 = vor.u32 %v6715_v35, %v5997_v36  ;;  %v5551_v36 = vld [vmem:[#allocation8 + $0x170] sm:$0xf0] }
 0x141   :  { %3524 = vmatpush.bf16.msrb.mxu1 %v5598_v14  ;;  %v7130_v1 = vpop.f32.mrf.mxu3  ;;  %v2101_v10 = vpop.f32.mrf.mxu1  ;;  %v6663_v14 = vld [vmem:[#allocation8 + $0x34c] sm:$0xf0]  ;;  %v5982_v2 = vor.u32 %v6711_v54, %v5981_v53  ;;  %v6557_v54 = vld [vmem:[#allocation8 + $0x4] sm:$0xf] }
 0x142   :  { %3537 = vmatpush.bf16.msrb.mxu2 %v5726_v15  ;;  %v2100_v0 = vadd.f32 %v2099_v42, %v2087_v52  ;;  %v6595_v15 = vld [vmem:[#allocation8 + $0x12c] sm:$0xf0]  ;;  %v5790_v25 = vor.u32 %v6663_v14, %v5789_v13  ;;  %v399_v42 = vperm.slane %v7134_v41, 3  ;;  %v5615_v52 = vld [vmem:[#allocation8 + $0x1f0] sm:$0xf0] }
 0x143   :  { %3550 = vmatpush.bf16.msrb.mxu3 %v5854_v30  ;;  %v5773_v30 = vld [vmem:[#allocation8 + $0x320] sm:$0xf]  ;;  %v5618_v59 = vor.u32 %v6617_v22, %v5615_v52  ;;  %v6691_v52 = vld [vmem:[#allocation8 + $0x42c] sm:$0xf0] }
 0x144   :  { %3512 = vmatpush.bf16.msrb.mxu0 %v5454_v27  ;;  %6800 = vtanh.f32 %v2100_v0  ;;  %v5518_v27 = vor.u32 %v6595_v15, %v5517_v12  ;;  %v2113_v60 = vadd.f32 %v7128_v63, %v399_v42  ;;  %v5599_v0 = vld [vmem:[#allocation8 + $0x1d0] sm:$0xf0]  ;;  %v5949_v14 = vld [vmem:[#allocation8 + $0x480] sm:$0xf]  ;;  %v6703_v15 = vld [vmem:[#allocation8 + $0x48c] sm:$0xf0] }
 0x145   :  { %3525 = vmatpush.bf16.msrb.mxu1 %v5582_v18  ;;  %6802 = vtanh.f32 %v7095_v6  ;;  %v6659_v18 = vld [vmem:[#allocation8 + $0x32c] sm:$0xf0]  ;;  %v5602_v10 = vor.u32 %v6613_v62, %v5599_v0  ;;  %v5583_v12 = vld [vmem:[#allocation8 + $0x1b0] sm:$0xf0]  ;;  %v5901_v22 = vld [vmem:[#allocation8 + $0x420] sm:$0xf] }
 0x146   :  { %3538 = vmatpush.bf16.msrb.mxu2 %v5710_v31  ;;  %6804 = vtanh.f32 %v7105_v26  ;;  %v5629_v31 = vld [vmem:[#allocation8 + $0x200] sm:$0xf]  ;;  %v5774_v37 = vor.u32 %v6659_v18, %v5773_v30  ;;  %v2126_v63 = vadd.f32 %v7130_v1, %v2113_v60  ;;  %v5950_v1 = vor.u32 %v6703_v15, %v5949_v14  ;;  %v6699_v30 = vld [vmem:[#allocation8 + $0x46c] sm:$0xf0]  ;;  %v5519_v60 = vld [vmem:[#allocation8 + $0x130] sm:$0xf0] }
 0x147   :  { %3551 = vmatpush.bf16.msrb.mxu3 %v5838_v43  ;;  %v5630_v40 = vor.u32 %v6623_v20, %v5629_v31  ;;  %v6565_v20 = vld [vmem:[#allocation8 + $0x44] sm:$0xf]  ;;  %v5902_v62 = vor.u32 %v6691_v52, %v5901_v22  ;;  %v5999_v0 = vld [vmem:[#allocation8 + $0x4f0] sm:$0xf0] }
 0x148   :  { %3513 = vmatpush.bf16.msrb.mxu0 %v5438_v3  ;;  %v2114_v6 = vpop.f32.mrf.mxu2  ;;  %v5502_v3 = vor.u32 %v6591_v29, %v5501_v51  ;;  %v5933_v29 = vld [vmem:[#allocation8 + $0x460] sm:$0xf]  ;;  %v6002_v14 = vor.u32 %v6713_v7, %v5999_v0  ;;  %v5503_v15 = vld [vmem:[#allocation8 + $0x110] sm:$0xf0]  ;;  %v6697_v52 = vld [vmem:[#allocation8 + $0x464] sm:$0xf] }
 0x149   :  { %3526 = vmatpush.bf16.msrb.mxu1 %v5566_v44  ;;  %v2127_v34 = vpop.f32.mrf.mxu3  ;;  %v5490_v44 = vor.u32 %v6585_v32, %v5487_v33  ;;  %v5407_v33 = vld [vmem:[#allocation8 + $0x50] sm:$0xf0]  ;;  %v5934_v35 = vor.u32 %v6699_v30, %v5933_v29 }
 0x14a   :  { %3539 = vmatpush.bf16.msrb.mxu2 %v5694_v45  ;;  %v6801_v26 = vpop.eup %6800  ;;  %v6581_v45 = vld [vmem:[#allocation8 + $0xc4] sm:$0xf]  ;;  %v5410_v42 = vor.u32 %v6565_v20, %v5407_v33  ;;  %v6109_v20 = vld [vmem:[#allocation8 + $0x5c0] sm:$0xf]  ;;  %v5935_v7 = vld [vmem:[#allocation8 + $0x470] sm:$0xf0] }
 0x14b   :  { %3552 = vmatpush.bf16.msrb.mxu3 %v5822_v55  ;;  %v6803_v43 = vpop.eup %6802  ;;  %v5474_v58 = vor.u32 %v6581_v45, %v5471_v50  ;;  %v6601_v34 = vld [vmem:[#allocation8 + $0x164] sm:$0xf]  ;;  %v6079_v0 = vld [vmem:[#allocation8 + $0x590] sm:$0xf0] }
 0x14c   :  { %3514 = vmatpush.bf16.msrb.mxu0 %v5422_v39  ;;  %v6805_v19 = vpop.eup %6804  ;;  %v7137_v39 = vpack.c.bf16 %v6801_v26, %v6801_v26  ;;  %v7139_v55 = vpack.c.bf16 %v6803_v43, %v6803_v43  ;;  %v5917_v26 = vld [vmem:[#allocation8 + $0x440] sm:$0xf]  ;;  %v6561_v43 = vld [vmem:[#allocation8 + $0x24] sm:$0xf] }
 0x14d   :  { %3527 = vmatpush.bf16.msrb.mxu1 %v5550_v56  ;;  %v5758_v56 = vor.u32 %v6655_v47, %v5757_v46  ;;  %v5391_v46 = vld [vmem:[#allocation8 + $0x30] sm:$0xf0]  ;;  %v6597_v47 = vld [vmem:[#allocation8 + $0x144] sm:$0xf] }
 0x14e   :  { %3540 = vmatpush.bf16.msrb.mxu2 %v5678_v57  ;;  %v7141_v57 = vpack.c.bf16 %v6805_v19, %v6805_v19  ;;  %v5394_v53 = vor.u32 %v6561_v43, %v5391_v46  ;;  %v6739_v43 = vld [vmem:[#allocation8 + $0x5ac] sm:$0xf0] }
 0x14f   :  { %3553 = vmatpush.bf16.msrb.mxu3 %v5806_v9  ;;  %v6573_v9 = vld [vmem:[#allocation8 + $0x84] sm:$0xf] }
 0x150   :  { %3515 = vmatpush.bf16.msrb.mxu0 %v5406_v4  ;;  %v5965_v4 = vld [vmem:[#allocation8 + $0x4a0] sm:$0xf] }
 0x151   :  { %3528 = vmatpush.bf16.msrb.mxu1 %v5534_v49  ;;  %v5439_v49 = vld [vmem:[#allocation8 + $0x90] sm:$0xf0]  ;;  %v5966_v13 = vor.u32 %v6707_v5, %v5965_v4  ;;  %v5885_v4 = vld [vmem:[#allocation8 + $0x400] sm:$0xf]  ;;  %v6687_v5 = vld [vmem:[#allocation8 + $0x40c] sm:$0xf0] }
 0x152   :  { %3541 = vmatpush.bf16.msrb.mxu2 %v5662_v11  ;;  %v6609_v11 = vld [vmem:[#allocation8 + $0x1a4] sm:$0xf]  ;;  %v5442_v16 = vor.u32 %v6573_v9, %v5439_v49  ;;  %v5743_v9 = vld [vmem:[#allocation8 + $0x2f0] sm:$0xf0] }
 0x153   :  { %3554 = vmatpush.bf16.msrb.mxu3 %v5790_v25  ;;  %v5586_v23 = vor.u32 %v6609_v11, %v5583_v12  ;;  %v5423_v25 = vld [vmem:[#allocation8 + $0x70] sm:$0xf0]  ;;  %v6709_v49 = vld [vmem:[#allocation8 + $0x4c4] sm:$0xf] }
 0x154   :  { %3516 = vmatpush.bf16.msrb.mxu0 %v5390_v21  ;;  %v6569_v21 = vld [vmem:[#allocation8 + $0x64] sm:$0xf] }
 0x155   :  { %3529 = vmatpush.bf16.msrb.mxu1 %v5518_v27  ;;  %v6605_v27 = vld [vmem:[#allocation8 + $0x184] sm:$0xf]  ;;  %v5426_v31 = vor.u32 %v6569_v21, %v5423_v25  ;;  %v6747_v21 = vld [vmem:[#allocation8 + $0x5ec] sm:$0xf0] }
 0x156   :  { %3542 = vmatpush.bf16.msrb.mxu2 %v5646_v28  ;;  %v5567_v28 = vld [vmem:[#allocation8 + $0x190] sm:$0xf0]  ;;  %v6589_v12 = vld [vmem:[#allocation8 + $0x104] sm:$0xf] }
 0x157   :  { %3555 = vmatpush.bf16.msrb.mxu3 %v5774_v37  ;;  %v5570_v32 = vor.u32 %v6605_v27, %v5567_v28  ;;  %v6745_v25 = vld [vmem:[#allocation8 + $0x5e4] sm:$0xf]  ;;  %v6127_v27 = vld [vmem:[#allocation8 + $0x5f0] sm:$0xf0]  ;;  %v5506_v29 = vor.u32 %v6589_v12, %v5503_v15 }
 0x158   :  { %3517 = vmatpush.bf16.msrb.mxu0 %v5374_v38  ;;  %v2138_v17 = vpop.f32.mrf.mxu0  ;;  %v6645_v28 = vld [vmem:[#allocation8 + $0x2c4] sm:$0xf]  ;;  %v6063_v15 = vld [vmem:[#allocation8 + $0x570] sm:$0xf0] }
 0x159   :  { %3530 = vmatpush.bf16.msrb.mxu1 %v5502_v3  ;;  %v2139_v24 = vadd.f32 %v2138_v17, %v2126_v63  ;;  %v2151_v51 = vpop.f32.mrf.mxu1  ;;  %v6695_v3 = vld [vmem:[#allocation8 + $0x44c] sm:$0xf0]  ;;  %v6125_v17 = vld [vmem:[#allocation8 + $0x5e0] sm:$0xf] }
 0x15a   :  { %3543 = vmatpush.bf16.msrb.mxu2 %v5630_v40  ;;  %v5918_v50 = vor.u32 %v6695_v3, %v5917_v26  ;;  %v6701_v3 = vld [vmem:[#allocation8 + $0x484] sm:$0xf] }
 0x15b   :  { %3518 = vmatmul.bf16.vlgmr.msrb.gmra.mxu0 %v7139_v55  ;;  %3556 = vmatpush.bf16.msrb.mxu3 %v5758_v56  ;;  %v2152_v18 = vadd.f32 %v2151_v51, %v2139_v24  ;;  %v5375_v56 = vld [vmem:[#allocation8 + $0x10] sm:$0xf0]  ;;  %v6126_v51 = vor.u32 %v6747_v21, %v6125_v17 }
 0x15c   :  { %3562 = vmatpush.bf16.msra.mxu0 %v5998_v48  ;;  %3531 = vmatmul.bf16.vlgmr.msrb.gmra.mxu1 %v7141_v57  ;;  %v5535_v48 = vld [vmem:[#allocation8 + $0x150] sm:$0xf0]  ;;  %v5378_v63 = vor.u32 %v6557_v54, %v5375_v56  ;;  %v6077_v56 = vld [vmem:[#allocation8 + $0x580] sm:$0xf] }
 0x15d   :  { %3544 = vmatmul.bf16.vlgmr.msrb.gmra.mxu2 %v7137_v39  ;;  %3575 = vmatpush.bf16.msra.mxu1 %v6126_v51  ;;  %v5663_v17 = vld [vmem:[#allocation8 + $0x250] sm:$0xf0] }
 0x15e   :  { %3588 = vmatpush.bf16.msra.mxu2 %v5490_v44  ;;  %v5554_v44 = vor.u32 %v6601_v34, %v5551_v36  ;;  %v6741_v36 = vld [vmem:[#allocation8 + $0x5c4] sm:$0xf] }
 0x15f   :  { %3601 = vmatpush.bf16.msra.mxu3 %v5618_v59  ;;  %v6593_v59 = vld [vmem:[#allocation8 + $0x124] sm:$0xf] }
 0x160   :  { %3563 = vmatpush.bf16.msra.mxu0 %v5982_v2  ;;  %v2164_v6 = vpop.f32.mrf.mxu2  ;;  %v2140_v45 = vpop.f32.mrf.mxu0  ;;  %v5522_v11 = vor.u32 %v6593_v59, %v5519_v60 }
 0x161   :  { %v2165_v38 = vadd.f32 %v2164_v6, %v2152_v18  ;;  %v2177_v37 = vpop.f32.mrf.mxu3  ;;  %v2153_v19 = vpop.f32.mrf.mxu1  ;;  %v6705_v18 = vld [vmem:[#allocation8 + $0x4a4] sm:$0xf]  ;;  %v5967_v6 = vld [vmem:[#allocation8 + $0x4b0] sm:$0xf0] }
 0x162   :  { %3589 = vmatpush.bf16.msra.mxu2 %v5474_v58  ;;  %v5538_v58 = vor.u32 %v6597_v47, %v5535_v48  ;;  %v5970_v26 = vor.u32 %v6705_v18, %v5967_v6  ;;  %v6737_v47 = vld [vmem:[#allocation8 + $0x5a4] sm:$0xf]  ;;  %v6095_v48 = vld [vmem:[#allocation8 + $0x5b0] sm:$0xf0] }
 0x163   :  { %3602 = vmatpush.bf16.msra.mxu3 %v5602_v10  ;;  %v2178_v40 = vadd.f32 %v2177_v37, %v2165_v38  ;;  %v6641_v38 = vld [vmem:[#allocation8 + $0x2a4] sm:$0xf]  ;;  %v5711_v37 = vld [vmem:[#allocation8 + $0x2b0] sm:$0xf0]  ;;  %v6098_v54 = vor.u32 %v6737_v47, %v6095_v48 }
 0x164   :  { %3564 = vmatpush.bf16.msra.mxu0 %v5966_v13  ;;  %v5714_v45 = vor.u32 %v6641_v38, %v5711_v37  ;;  %v6637_v19 = vld [vmem:[#allocation8 + $0x284] sm:$0xf]  ;;  %v5887_v38 = vld [vmem:[#allocation8 + $0x410] sm:$0xf0] }
 0x165   :  { %6806 = vtanh.f32 %v2178_v40  ;;  %v6625_v6 = vld [vmem:[#allocation8 + $0x224] sm:$0xf]  ;;  %v5631_v48 = vld [vmem:[#allocation8 + $0x210] sm:$0xf0] }
 0x166   :  { %3590 = vmatpush.bf16.msra.mxu2 %v5458_v8  ;;  %v6649_v8 = vld [vmem:[#allocation8 + $0x2e4] sm:$0xf] }
 0x167   :  { %3603 = vmatpush.bf16.msra.mxu3 %v5586_v23  ;;  %v5983_v23 = vld [vmem:[#allocation8 + $0x4d0] sm:$0xf0]  ;;  %v5746_v24 = vor.u32 %v6649_v8, %v5743_v9  ;;  %v6693_v8 = vld [vmem:[#allocation8 + $0x444] sm:$0xf] }
 0x168   :  { %3565 = vmatpush.bf16.msra.mxu0 %v5950_v1  ;;  %v2166_v61 = vpop.f32.mrf.mxu2  ;;  %v5727_v1 = vld [vmem:[#allocation8 + $0x2d0] sm:$0xf0]  ;;  %v5986_v30 = vor.u32 %v6709_v49, %v5983_v23  ;;  %v6621_v47 = vld [vmem:[#allocation8 + $0x204] sm:$0xf] }
 0x169   :  { %v2179_v2 = vpop.f32.mrf.mxu3  ;;  %v5730_v33 = vor.u32 %v6645_v28, %v5727_v1  ;;  %v5919_v49 = vld [vmem:[#allocation8 + $0x450] sm:$0xf0]  ;;  %v6045_v28 = vld [vmem:[#allocation8 + $0x540] sm:$0xf]  ;;  %v6727_v1 = vld [vmem:[#allocation8 + $0x54c] sm:$0xf0] }
 0x16a   :  { %3591 = vmatpush.bf16.msra.mxu2 %v5442_v16  ;;  %v5886_v16 = vor.u32 %v6687_v5, %v5885_v4  ;;  %v6633_v2 = vld [vmem:[#allocation8 + $0x264] sm:$0xf]  ;;  %v5679_v4 = vld [vmem:[#allocation8 + $0x270] sm:$0xf0]  ;;  %v5938_v5 = vor.u32 %v6697_v52, %v5935_v7  ;;  %v5922_v23 = vor.u32 %v6693_v8, %v5919_v49  ;;  %v5733_v52 = vld [vmem:[#allocation8 + $0x2c8] sm:$0xf] }
 0x16b   :  { %3604 = vmatpush.bf16.msra.mxu3 %v5570_v32  ;;  %v6807_v10 = vpop.eup %6806  ;;  %v6743_v32 = vld [vmem:[#allocation8 + $0x5cc] sm:$0xf0]  ;;  %v6013_v7 = vld [vmem:[#allocation8 + $0x500] sm:$0xf]  ;;  %v5871_v8 = vld [vmem:[#allocation8 + $0x3f0] sm:$0xf0] }
 0x16c   :  { %3566 = vmatpush.bf16.msra.mxu0 %v5934_v35  ;;  %v7148_v13 = vpack.c.bf16 %v6807_v10, %v6807_v10  ;;  %v6110_v34 = vor.u32 %v6743_v32, %v6109_v20  ;;  %v6111_v35 = vld [vmem:[#allocation8 + $0x5d0] sm:$0xf0]  ;;  %v6061_v10 = vld [vmem:[#allocation8 + $0x560] sm:$0xf]  ;;  %v6725_v20 = vld [vmem:[#allocation8 + $0x544] sm:$0xf] }
 0x16d   :  { %v6114_v40 = vor.u32 %v6741_v36, %v6111_v35  ;;  %v6047_v32 = vld [vmem:[#allocation8 + $0x550] sm:$0xf0]  ;;  %v6685_v36 = vld [vmem:[#allocation8 + $0x404] sm:$0xf] }
 0x16e   :  { %3592 = vmatpush.bf16.msra.mxu2 %v5426_v31  ;;  %3557 = vmatmul.bf16.vlgmr.msrb.gmra.mxu3 %v7148_v13  ;;  %v6130_v31 = vor.u32 %v6745_v25, %v6127_v27  ;;  %v6050_v37 = vor.u32 %v6725_v20, %v6047_v32  ;;  %v6676_v20 = vld [vmem:[#allocation8 + $0x3b4] sm:$0xf0] }
 0x16f   :  { %3605 = vmatpush.bf16.msra.mxu3 %v5554_v44  ;;  %v5951_v44 = vld [vmem:[#allocation8 + $0x490] sm:$0xf0]  ;;  %3576 = vmatpush.bf16.msra.mxu1 %v6110_v34  ;;  %v400_v34 = vperm.slane %v7134_v41, 4 }
 0x170   :  { %3567 = vmatpush.bf16.msra.mxu0 %v5918_v50  ;;  %v5695_v50 = vld [vmem:[#allocation8 + $0x290] sm:$0xf0]  ;;  %v5954_v22 = vor.u32 %v6701_v3, %v5951_v44  ;;  %v6723_v3 = vld [vmem:[#allocation8 + $0x52c] sm:$0xf0]  ;;  %v6721_v44 = vld [vmem:[#allocation8 + $0x524] sm:$0xf] }
 0x171   :  { %v5698_v60 = vor.u32 %v6637_v19, %v5695_v50 }
 0x172   :  { %3593 = vmatpush.bf16.msra.mxu2 %v5410_v42  ;;  %v6093_v42 = vld [vmem:[#allocation8 + $0x5a0] sm:$0xf] }
 0x173   :  { %3606 = vmatpush.bf16.msra.mxu3 %v5538_v58  ;;  %v6094_v46 = vor.u32 %v6739_v43, %v6093_v42  ;;  %v6735_v58 = vld [vmem:[#allocation8 + $0x58c] sm:$0xf0] }
 0x174   :  { %3568 = vmatpush.bf16.msra.mxu0 %v5902_v62  ;;  %v6078_v61 = vor.u32 %v6735_v58, %v6077_v56  ;;  %v6733_v62 = vld [vmem:[#allocation8 + $0x584] sm:$0xf] }
 0x175   :  { %3577 = vmatpush.bf16.msra.mxu1 %v6094_v46  ;;  %v6082_v9 = vor.u32 %v6733_v62, %v6079_v0  ;;  %v6652_v46 = vld [vmem:[#allocation8 + $0x2f4] sm:$0xf0]  ;;  %v5634_v62 = vor.u32 %v6621_v47, %v5631_v48  ;;  %v6717_v0 = vld [vmem:[#allocation8 + $0x504] sm:$0xf]  ;;  %v5807_v48 = vld [vmem:[#allocation8 + $0x370] sm:$0xf0] }
 0x176   :  { %3594 = vmatpush.bf16.msra.mxu2 %v5394_v53  ;;  %v6665_v47 = vld [vmem:[#allocation8 + $0x364] sm:$0xf] }
 0x177   :  { %3607 = vmatpush.bf16.msra.mxu3 %v5522_v11  ;;  %v5682_v11 = vor.u32 %v6633_v2, %v5679_v4  ;;  %v6015_v2 = vld [vmem:[#allocation8 + $0x510] sm:$0xf0]  ;;  %v6681_v4 = vld [vmem:[#allocation8 + $0x3e4] sm:$0xf] }
 0x178   :  { %3569 = vmatpush.bf16.msra.mxu0 %v5886_v16  ;;  %v7152_v53 = vpop.f32.mrf.mxu0  ;;  %v6629_v16 = vld [vmem:[#allocation8 + $0x244] sm:$0xf]  ;;  %v6018_v49 = vor.u32 %v6717_v0, %v6015_v2  ;;  %v6628_v0 = vld [vmem:[#allocation8 + $0x234] sm:$0xf0]  ;;  %v5493_v2 = vld [vmem:[#allocation8 + $0xe8] sm:$0xf] }
 0x179   :  { %v7154_v59 = vpop.f32.mrf.mxu1  ;;  %3578 = vmatpush.bf16.msra.mxu1 %v6078_v61  ;;  %v5666_v18 = vor.u32 %v6629_v16, %v5663_v17  ;;  %v2191_v19 = vadd.f32 %v7152_v53, %v400_v34  ;;  %v5877_v53 = vld [vmem:[#allocation8 + $0x3e8] sm:$0xf]  ;;  %v5855_v16 = vld [vmem:[#allocation8 + $0x3d0] sm:$0xf0]  ;;  %v6644_v17 = vld [vmem:[#allocation8 + $0x2b4] sm:$0xf0] }
 0x17a   :  { %3595 = vmatpush.bf16.msra.mxu2 %v5378_v63  ;;  %v6731_v63 = vld [vmem:[#allocation8 + $0x56c] sm:$0xf0] }
 0x17b   :  { %3608 = vmatpush.bf16.msra.mxu3 %v5506_v29  ;;  %v6062_v12 = vor.u32 %v6731_v63, %v6061_v10  ;;  %v5903_v29 = vld [vmem:[#allocation8 + $0x430] sm:$0xf0]  ;;  %v2204_v10 = vadd.f32 %v7154_v59, %v2191_v19  ;;  %v5874_v63 = vor.u32 %v6681_v4, %v5871_v8  ;;  %v6632_v19 = vld [vmem:[#allocation8 + $0x254] sm:$0xf0] }
 0x17c   :  { %3614 = vmatpush.bf16.msrb.mxu0 %v5746_v24  ;;  %v6689_v24 = vld [vmem:[#allocation8 + $0x424] sm:$0xf]  ;;  %v6588_v4 = vld [vmem:[#allocation8 + $0xf4] sm:$0xf0] }
 0x17d   :  { %3596 = vmatmul.bf16.vlgmr.msra.gmra.mxu2 %v7139_v55  ;;  %3579 = vmatpush.bf16.msra.mxu1 %v6062_v12  ;;  %v5906_v35 = vor.u32 %v6689_v24, %v5903_v29  ;;  %v5717_v12 = vld [vmem:[#allocation8 + $0x2a8] sm:$0xf]  ;;  %v6680_v24 = vld [vmem:[#allocation8 + $0x3d4] sm:$0xf0]  ;;  %v6673_v29 = vld [vmem:[#allocation8 + $0x3a4] sm:$0xf] }
 0x17e   :  { %3640 = vmatpush.bf16.msrb.mxu2 %v6002_v14  ;;  %v6729_v14 = vld [vmem:[#allocation8 + $0x564] sm:$0xf]  ;;  %3609 = vmatmul.bf16.vlgmr.msra.gmra.mxu3 %v7141_v57  ;;  %v5718_v59 = vor.u32 %v6644_v17, %v5717_v12  ;;  %v5494_v12 = vor.u32 %v6588_v4, %v5493_v2  ;;  %v6570_v2 = vld [vmem:[#allocation8 + $0x6c] sm:$0xf]  ;;  %v5431_v4 = vld [vmem:[#allocation8 + $0x78] sm:$0xf0] }
 0x17f   :  { %3653 = vmatpush.bf16.msrb.mxu3 %v6130_v31  ;;  %v6066_v27 = vor.u32 %v6729_v14, %v6063_v15  ;;  %v6046_v31 = vor.u32 %v6727_v1, %v6045_v28  ;;  %v6677_v15 = vld [vmem:[#allocation8 + $0x3c4] sm:$0xf]  ;;  %v5701_v28 = vld [vmem:[#allocation8 + $0x288] sm:$0xf] }
 0x180   :  { %3615 = vmatpush.bf16.msrb.mxu0 %v5730_v33  ;;  %v7157_v21 = vpop.f32.mrf.mxu2  ;;  %v2192_v51 = vpop.f32.mrf.mxu0  ;;  %v5647_v33 = vld [vmem:[#allocation8 + $0x230] sm:$0xf0] }
 0x181   :  { %v7159_v25 = vpop.f32.mrf.mxu3  ;;  %v5650_v42 = vor.u32 %v6625_v6, %v5647_v33  ;;  %3580 = vmatpush.bf16.msra.mxu1 %v6046_v31  ;;  %v2217_v51 = vadd.f32 %v7157_v21, %v2204_v10  ;;  %v5845_v31 = vld [vmem:[#allocation8 + $0x3a8] sm:$0xf]  ;;  %v6664_v10 = vld [vmem:[#allocation8 + $0x354] sm:$0xf0] }
 0x182   :  { %3641 = vmatpush.bf16.msrb.mxu2 %v5986_v30  ;;  %v2205_v30 = vpop.f32.mrf.mxu1  ;;  %v5685_v21 = vld [vmem:[#allocation8 + $0x268] sm:$0xf]  ;;  %v5846_v34 = vor.u32 %v6676_v20, %v5845_v31  ;;  %v6653_v20 = vld [vmem:[#allocation8 + $0x304] sm:$0xf] }
 0x183   :  { %3654 = vmatpush.bf16.msrb.mxu3 %v6114_v40  ;;  %v5749_v40 = vld [vmem:[#allocation8 + $0x2e8] sm:$0xf]  ;;  %v5839_v30 = vld [vmem:[#allocation8 + $0x3b0] sm:$0xf0]  ;;  %v2230_v32 = vadd.f32 %v7159_v25, %v2217_v51  ;;  %v6586_v51 = vld [vmem:[#allocation8 + $0xec] sm:$0xf] }
 0x184   :  { %3616 = vmatpush.bf16.msrb.mxu0 %v5714_v45  ;;  %v6031_v45 = vld [vmem:[#allocation8 + $0x530] sm:$0xf0]  ;;  %v5750_v61 = vor.u32 %v6652_v46, %v5749_v40  ;;  %v5842_v6 = vor.u32 %v6673_v29, %v5839_v30  ;;  %v6660_v29 = vld [vmem:[#allocation8 + $0x334] sm:$0xf0] }
 0x185   :  { %v6034_v58 = vor.u32 %v6721_v44, %v6031_v45  ;;  %v5669_v45 = vld [vmem:[#allocation8 + $0x248] sm:$0xf] }
 0x186   :  { %3642 = vmatpush.bf16.msrb.mxu2 %v5970_v26  ;;  %v6029_v26 = vld [vmem:[#allocation8 + $0x520] sm:$0xf] }
 0x187   :  { %3655 = vmatpush.bf16.msrb.mxu3 %v6098_v54  ;;  %v6030_v43 = vor.u32 %v6723_v3, %v6029_v26  ;;  %v6648_v54 = vld [vmem:[#allocation8 + $0x2d4] sm:$0xf0]  ;;  %v5829_v26 = vld [vmem:[#allocation8 + $0x388] sm:$0xf] }
 0x188   :  { %3617 = vmatpush.bf16.msrb.mxu0 %v5698_v60  ;;  %v2218_v50 = vpop.f32.mrf.mxu2  ;;  %v6719_v60 = vld [vmem:[#allocation8 + $0x50c] sm:$0xf0]  ;;  %v6672_v3 = vld [vmem:[#allocation8 + $0x394] sm:$0xf0] }
 0x189   :  { %v2231_v56 = vpop.f32.mrf.mxu3  ;;  %3581 = vmatpush.bf16.msra.mxu1 %v6030_v43  ;;  %v5830_v46 = vor.u32 %v6672_v3, %v5829_v26  ;;  %v5813_v50 = vld [vmem:[#allocation8 + $0x368] sm:$0xf]  ;;  %v6656_v3 = vld [vmem:[#allocation8 + $0x314] sm:$0xf0] }
 0x18a   :  { %3643 = vmatpush.bf16.msrb.mxu2 %v5954_v22  ;;  %v5890_v22 = vor.u32 %v6685_v36, %v5887_v38  ;;  %v6669_v36 = vld [vmem:[#allocation8 + $0x384] sm:$0xf]  ;;  %v5765_v26 = vld [vmem:[#allocation8 + $0x308] sm:$0xf] }
 0x18b   :  { %3656 = vmatpush.bf16.msrb.mxu3 %v6082_v9  ;;  %v6684_v9 = vld [vmem:[#allocation8 + $0x3f4] sm:$0xf0] }
 0x18c   :  { %3618 = vmatpush.bf16.msrb.mxu0 %v5682_v11  ;;  %v5734_v11 = vor.u32 %v6648_v54, %v5733_v52  ;;  %v5878_v14 = vor.u32 %v6684_v9, %v5877_v53  ;;  %v5810_v52 = vor.u32 %v6665_v47, %v5807_v48  ;;  %v5670_v54 = vor.u32 %v6632_v19, %v5669_v45  ;;  %v5797_v9 = vld [vmem:[#allocation8 + $0x348] sm:$0xf]  ;;  %v6578_v45 = vld [vmem:[#allocation8 + $0xac] sm:$0xf] }
 0x18d   :  { %v401_v47 = vperm.slane %v7134_v41, 5 }
 0x18e   :  { %3644 = vmatpush.bf16.msrb.mxu2 %v5938_v5  ;;  %v6014_v5 = vor.u32 %v6719_v60, %v6013_v7  ;;  %v6661_v60 = vld [vmem:[#allocation8 + $0x344] sm:$0xf] }
 0x18f   :  { %3657 = vmatpush.bf16.msrb.mxu3 %v6066_v27  ;;  %v5858_v27 = vor.u32 %v6677_v15, %v5855_v16  ;;  %v6657_v15 = vld [vmem:[#allocation8 + $0x324] sm:$0xf]  ;;  %v5775_v16 = vld [vmem:[#allocation8 + $0x330] sm:$0xf0] }
 0x190   :  { %3619 = vmatpush.bf16.msrb.mxu0 %v5666_v18  ;;  %3582 = vmatpush.bf16.msra.mxu1 %v6014_v5  ;;  %v6640_v18 = vld [vmem:[#allocation8 + $0x294] sm:$0xf0] }
 0x191   :  { %v5702_v33 = vor.u32 %v6640_v18, %v5701_v28  ;;  %v5778_v28 = vor.u32 %v6657_v15, %v5775_v16  ;;  %v5381_v15 = vld [vmem:[#allocation8 + $0x8] sm:$0xf]  ;;  %v6560_v16 = vld [vmem:[#allocation8 + $0x14] sm:$0xf0] }
 0x192   :  { %3645 = vmatpush.bf16.msrb.mxu2 %v5922_v23  ;;  %v5861_v23 = vld [vmem:[#allocation8 + $0x3c8] sm:$0xf] }
 0x193   :  { %3658 = vmatpush.bf16.msrb.mxu3 %v6050_v37  ;;  %v5862_v1 = vor.u32 %v6680_v24, %v5861_v23  ;;  %v6636_v37 = vld [vmem:[#allocation8 + $0x274] sm:$0xf0]  ;;  %v5477_v23 = vld [vmem:[#allocation8 + $0xc8] sm:$0xf] }
 0x194   :  { %3620 = vmatpush.bf16.msrb.mxu0 %v5650_v42  ;;  %3627 = vmatpush.bf16.msrb.mxu1 %v5874_v63  ;;  %v5686_v25 = vor.u32 %v6636_v37, %v5685_v21  ;;  %v5637_v63 = vld [vmem:[#allocation8 + $0x208] sm:$0xf]  ;;  %v6584_v24 = vld [vmem:[#allocation8 + $0xd4] sm:$0xf0] }
 0x195   :  { %v5478_v18 = vor.u32 %v6584_v24, %v5477_v23  ;;  %v5461_v21 = vld [vmem:[#allocation8 + $0xa8] sm:$0xf]  ;;  %v6562_v23 = vld [vmem:[#allocation8 + $0x2c] sm:$0xf] }
 0x196   :  { %3646 = vmatpush.bf16.msrb.mxu2 %v5906_v35  ;;  %v5823_v35 = vld [vmem:[#allocation8 + $0x390] sm:$0xf0] }
 0x197   :  { %3659 = vmatpush.bf16.msrb.mxu3 %v6034_v58  ;;  %v5826_v43 = vor.u32 %v6669_v36, %v5823_v35  ;;  %v5653_v58 = vld [vmem:[#allocation8 + $0x228] sm:$0xf]  ;;  %v6582_v36 = vld [vmem:[#allocation8 + $0xcc] sm:$0xf] }
 0x198   :  { %3621 = vmatpush.bf16.msrb.mxu0 %v5634_v62  ;;  %3628 = vmatpush.bf16.msrb.mxu1 %v5858_v27  ;;  %v2242_v38 = vpop.f32.mrf.mxu0  ;;  %v5798_v27 = vor.u32 %v6664_v10, %v5797_v9  ;;  %v5397_v10 = vld [vmem:[#allocation8 + $0x28] sm:$0xf] }
 0x199   :  { %v2243_v40 = vadd.f32 %v2242_v38, %v2230_v32  ;;  %v2255_v42 = vpop.f32.mrf.mxu1  ;;  %v5759_v32 = vld [vmem:[#allocation8 + $0x310] sm:$0xf0]  ;;  %v5479_v38 = vld [vmem:[#allocation8 + $0xd8] sm:$0xf0] }
 0x19a   :  { %3647 = vmatpush.bf16.msrb.mxu2 %v5890_v22  ;;  %v6668_v22 = vld [vmem:[#allocation8 + $0x374] sm:$0xf0]  ;;  %v5762_v37 = vor.u32 %v6653_v20, %v5759_v32 }
 0x19b   :  { %3660 = vmatpush.bf16.msrb.mxu3 %v6018_v49  ;;  %v2256_v44 = vadd.f32 %v2255_v42, %v2243_v40  ;;  %v5814_v7 = vor.u32 %v6668_v22, %v5813_v50  ;;  %v5482_v42 = vor.u32 %v6582_v36, %v5479_v38  ;;  %v5429_v50 = vld [vmem:[#allocation8 + $0x68] sm:$0xf]  ;;  %v6572_v22 = vld [vmem:[#allocation8 + $0x74] sm:$0xf0]  ;;  %v6714_v36 = vld [vmem:[#allocation8 + $0x4ec] sm:$0xf] }
 0x19c   :  { %3629 = vmatpush.bf16.msrb.mxu1 %v5842_v6 }
 0x19d   :  { %6808 = vtanh.f32 %v2256_v44  ;;  %v6576_v44 = vld [vmem:[#allocation8 + $0x94] sm:$0xf0] }
 0x19e   :  { %3692 = vmatpush.bf16.msra.mxu2 %v5750_v61  ;;  %v5791_v61 = vld [vmem:[#allocation8 + $0x350] sm:$0xf0] }
 0x19f   :  { %3705 = vmatpush.bf16.msra.mxu3 %v5878_v14  ;;  %v5794_v53 = vor.u32 %v6661_v60, %v5791_v61  ;;  %v6624_v14 = vld [vmem:[#allocation8 + $0x214] sm:$0xf0]  ;;  %v5413_v61 = vld [vmem:[#allocation8 + $0x48] sm:$0xf] }
 0x1a0   :  { %3630 = vmatpush.bf16.msrb.mxu1 %v5826_v43  ;;  %v7166_v56 = vpop.f32.mrf.mxu2  ;;  %v2244_v5 = vpop.f32.mrf.mxu0  ;;  %v5638_v30 = vor.u32 %v6624_v14, %v5637_v63  ;;  %v5445_v43 = vld [vmem:[#allocation8 + $0x88] sm:$0xf]  ;;  %v6564_v63 = vld [vmem:[#allocation8 + $0x34] sm:$0xf0] }
 0x1a1   :  { %v7168_v62 = vpop.f32.mrf.mxu3  ;;  %v2257_v8 = vpop.f32.mrf.mxu1  ;;  %v5446_v48 = vor.u32 %v6576_v44, %v5445_v43  ;;  %v6620_v43 = vld [vmem:[#allocation8 + $0x1f4] sm:$0xf0]  ;;  %v6618_v44 = vld [vmem:[#allocation8 + $0x1ec] sm:$0xf] }
 0x1a2   :  { %3693 = vmatpush.bf16.msra.mxu2 %v5734_v11  ;;  %v5654_v11 = vor.u32 %v6628_v0, %v5653_v58  ;;  %v2269_v58 = vadd.f32 %v7166_v56, %v401_v47  ;;  %v6568_v0 = vld [vmem:[#allocation8 + $0x54] sm:$0xf0]  ;;  %v5434_v56 = vor.u32 %v6570_v2, %v5431_v4  ;;  %v6710_v47 = vld [vmem:[#allocation8 + $0x4cc] sm:$0xf]  ;;  %v5957_v2 = vld [vmem:[#allocation8 + $0x488] sm:$0xf] }
 0x1a3   :  { %3706 = vmatpush.bf16.msra.mxu3 %v5862_v1  ;;  %v6809_v49 = vpop.eup %6808  ;;  %v5781_v1 = vld [vmem:[#allocation8 + $0x328] sm:$0xf]  ;;  %v6704_v4 = vld [vmem:[#allocation8 + $0x494] sm:$0xf0] }
 0x1a4   :  { %3631 = vmatpush.bf16.msrb.mxu1 %v5810_v52  ;;  %v7170_v17 = vpack.c.bf16 %v6809_v49, %v6809_v49  ;;  %v5782_v35 = vor.u32 %v6660_v29, %v5781_v1  ;;  %v6574_v52 = vld [vmem:[#allocation8 + $0x8c] sm:$0xf]  ;;  %v2282_v41 = vadd.f32 %v7168_v62, %v2269_v58  ;;  %v5605_v58 = vld [vmem:[#allocation8 + $0x1c8] sm:$0xf] }
 0x1a5   :  { %v6566_v49 = vld [vmem:[#allocation8 + $0x4c] sm:$0xf] }
 0x1a6   :  { %3694 = vmatpush.bf16.msra.mxu2 %v5718_v59  ;;  %v5495_v59 = vld [vmem:[#allocation8 + $0xf8] sm:$0xf0]  ;;  %3570 = vmatmul.bf16.vlgmr.msra.gmra.mxu0 %v7170_v17 }
 0x1a7   :  { %3707 = vmatpush.bf16.msra.mxu3 %v5846_v34  ;;  %3648 = vmatmul.bf16.vlgmr.msrb.gmra.mxu2 %v7170_v17  ;;  %v5498_v6 = vor.u32 %v6586_v51, %v5495_v59  ;;  %v6580_v34 = vld [vmem:[#allocation8 + $0xb4] sm:$0xf0]  ;;  %v6005_v59 = vld [vmem:[#allocation8 + $0x4e8] sm:$0xf] }
 0x1a8   :  { %3632 = vmatpush.bf16.msrb.mxu1 %v5794_v53  ;;  %3666 = vmatpush.bf16.msra.mxu0 %v5494_v12  ;;  %v2270_v31 = vpop.f32.mrf.mxu2  ;;  %v5462_v40 = vor.u32 %v6580_v34, %v5461_v21  ;;  %v5414_v53 = vor.u32 %v6568_v0, %v5413_v61  ;;  %v5398_v12 = vor.u32 %v6564_v63, %v5397_v10  ;;  %v5989_v21 = vld [vmem:[#allocation8 + $0x4c8] sm:$0xf]  ;;  %v6712_v34 = vld [vmem:[#allocation8 + $0x4d4] sm:$0xf0]  ;;  %v5607_v0 = vld [vmem:[#allocation8 + $0x1d8] sm:$0xf0] }
 0x1a9   :  { %v6612_v10 = vld [vmem:[#allocation8 + $0x1b4] sm:$0xf0]  ;;  %v6610_v63 = vld [vmem:[#allocation8 + $0x1ac] sm:$0xf] }
 0x1aa   :  { %3695 = vmatpush.bf16.msra.mxu2 %v5702_v33  ;;  %v2283_v33 = vpop.f32.mrf.mxu3 }
 0x1ab   :  { %3708 = vmatpush.bf16.msra.mxu3 %v5830_v46  ;;  %v5463_v46 = vld [vmem:[#allocation8 + $0xb8] sm:$0xf0] }
 0x1ac   :  { %3633 = vmatpush.bf16.msrb.mxu1 %v5778_v28  ;;  %3667 = vmatpush.bf16.msra.mxu0 %v5478_v18  ;;  %v5466_v19 = vor.u32 %v6578_v45, %v5463_v46  ;;  %v6716_v28 = vld [vmem:[#allocation8 + $0x4f4] sm:$0xf0]  ;;  %v5382_v18 = vor.u32 %v6560_v16, %v5381_v15  ;;  %v5383_v33 = vld [vmem:[#allocation8 + $0x18] sm:$0xf0]  ;;  %v5973_v45 = vld [vmem:[#allocation8 + $0x4a8] sm:$0xf] }
 0x1ad   :  { %v6006_v32 = vor.u32 %v6716_v28, %v6005_v59  ;;  %v6708_v46 = vld [vmem:[#allocation8 + $0x4b4] sm:$0xf0]  ;;  %v6702_v15 = vld [vmem:[#allocation8 + $0x48c] sm:$0xf]  ;;  %v5959_v16 = vld [vmem:[#allocation8 + $0x498] sm:$0xf0] }
 0x1ae   :  { %3696 = vmatpush.bf16.msra.mxu2 %v5686_v25  ;;  %v5766_v25 = vor.u32 %v6656_v3, %v5765_v26  ;;  %v6608_v59 = vld [vmem:[#allocation8 + $0x194] sm:$0xf0]  ;;  %v6606_v28 = vld [vmem:[#allocation8 + $0x18c] sm:$0xf] }
 0x1af   :  { %3709 = vmatpush.bf16.msra.mxu3 %v5814_v7  ;;  %v5430_v7 = vor.u32 %v6572_v22, %v5429_v50 }
 0x1b0   :  { %3634 = vmatpush.bf16.msrb.mxu1 %v5762_v37  ;;  %3668 = vmatpush.bf16.msra.mxu0 %v5462_v40  ;;  %v5990_v37 = vor.u32 %v6712_v34, %v5989_v21 }
 0x1b2   :  { %3697 = vmatpush.bf16.msra.mxu2 %v5670_v54  ;;  %v5447_v54 = vld [vmem:[#allocation8 + $0x98] sm:$0xf0] }
 0x1b3   :  { %3710 = vmatpush.bf16.msra.mxu3 %v5798_v27  ;;  %v5450_v60 = vor.u32 %v6574_v52, %v5447_v54  ;;  %v5399_v27 = vld [vmem:[#allocation8 + $0x38] sm:$0xf0]  ;;  %v5974_v54 = vor.u32 %v6708_v46, %v5973_v45  ;;  %v5541_v46 = vld [vmem:[#allocation8 + $0x148] sm:$0xf] }
 0x1b4   :  { %3669 = vmatpush.bf16.msra.mxu0 %v5446_v48  ;;  %v5402_v20 = vor.u32 %v6562_v23, %v5399_v27  ;;  %v5991_v48 = vld [vmem:[#allocation8 + $0x4d8] sm:$0xf0]  ;;  %v5573_v27 = vld [vmem:[#allocation8 + $0x188] sm:$0xf] }
 0x1b5   :  { %v5994_v61 = vor.u32 %v6710_v47, %v5991_v48  ;;  %v5574_v21 = vor.u32 %v6608_v59, %v5573_v27  ;;  %v5509_v27 = vld [vmem:[#allocation8 + $0x108] sm:$0xf]  ;;  %v6592_v59 = vld [vmem:[#allocation8 + $0x114] sm:$0xf0] }
 0x1b6   :  { %3698 = vmatpush.bf16.msra.mxu2 %v5654_v11  ;;  %3622 = vmatmul.bf16.vlgmr.msrb.gmra.mxu0 %v7137_v39  ;;  %v5415_v11 = vld [vmem:[#allocation8 + $0x58] sm:$0xf0] }
 0x1b7   :  { %3711 = vmatpush.bf16.msra.mxu3 %v5782_v35  ;;  %v5418_v62 = vor.u32 %v6566_v49, %v5415_v11  ;;  %v6007_v35 = vld [vmem:[#allocation8 + $0x4f8] sm:$0xf0]  ;;  %v7185_v49 = vld [vmem:[#allocation11 + $0x6] sm:$0xf] }
 0x1b8   :  { %v2294_v5 = vpop.f32.mrf.mxu0  ;;  %3670 = vmatpush.bf16.msra.mxu0 %v5430_v7  ;;  %v6010_v40 = vor.u32 %v6714_v36, %v6007_v35  ;;  %v6616_v7 = vld [vmem:[#allocation8 + $0x1d4] sm:$0xf0]  ;;  %v5557_v35 = vld [vmem:[#allocation8 + $0x168] sm:$0xf] }
 0x1b9   :  { %v2307_v8 = vpop.f32.mrf.mxu1  ;;  %v2295_v9 = vadd.f32 %v2294_v5, %v2282_v41  ;;  %v6706_v41 = vld [vmem:[#allocation8 + $0x4ac] sm:$0xf]  ;;  %v5975_v5 = vld [vmem:[#allocation8 + $0x4b8] sm:$0xf0] }
 0x1ba   :  { %3699 = vmatpush.bf16.msra.mxu2 %v5638_v30  ;;  %v5978_v11 = vor.u32 %v6706_v41, %v5975_v5  ;;  %v6650_v41 = vld [vmem:[#allocation8 + $0x2ec] sm:$0xf]  ;;  %v5751_v5 = vld [vmem:[#allocation8 + $0x2f8] sm:$0xf0] }
 0x1bb   :  { %3712 = vmatpush.bf16.msra.mxu3 %v5766_v25  ;;  %v2308_v14 = vadd.f32 %v2307_v8, %v2295_v9  ;;  %v5623_v25 = vld [vmem:[#allocation8 + $0x1f8] sm:$0xf0]  ;;  %v5606_v8 = vor.u32 %v6616_v7, %v5605_v58  ;;  %v5893_v7 = vld [vmem:[#allocation8 + $0x408] sm:$0xf] }
 0x1bc   :  { %3671 = vmatpush.bf16.msra.mxu0 %v5414_v53  ;;  %v5626_v52 = vor.u32 %v6618_v44, %v5623_v25  ;;  %v5589_v53 = vld [vmem:[#allocation8 + $0x1a8] sm:$0xf]  ;;  %v6694_v44 = vld [vmem:[#allocation8 + $0x44c] sm:$0xf]  ;;  %v5927_v25 = vld [vmem:[#allocation8 + $0x458] sm:$0xf0] }
 0x1bd   :  { %3700 = vmatmul.bf16.vlgmr.msra.gmra.mxu2 %v7137_v39  ;;  %v5590_v23 = vor.u32 %v6612_v10, %v5589_v53  ;;  %v5930_v58 = vor.u32 %v6694_v44, %v5927_v25  ;;  %v5525_v10 = vld [vmem:[#allocation8 + $0x128] sm:$0xf]  ;;  %v5703_v44 = vld [vmem:[#allocation8 + $0x298] sm:$0xf0] }
 0x1be   :  { %3744 = vmatpush.bf16.msrb.mxu2 %v5498_v6  ;;  %v6558_v6 = vld [vmem:[#allocation8 + $0xc] sm:$0xf] }
 0x1bf   :  { %v5386_v38 = vor.u32 %v6558_v6, %v5383_v33 }
 0x1c0   :  { %v2320_v24 = vpop.f32.mrf.mxu2  ;;  %v2296_v29 = vpop.f32.mrf.mxu0  ;;  %3672 = vmatpush.bf16.msra.mxu0 %v5398_v12  ;;  %v5591_v12 = vld [vmem:[#allocation8 + $0x1b8] sm:$0xf0] }
 0x1c1   :  { %v2333_v51 = vpop.f32.mrf.mxu3  ;;  %v2321_v1 = vadd.f32 %v2320_v24, %v2308_v14  ;;  %v2309_v30 = vpop.f32.mrf.mxu1  ;;  %v5941_v14 = vld [vmem:[#allocation8 + $0x468] sm:$0xf]  ;;  %v5594_v24 = vor.u32 %v6610_v63, %v5591_v12  ;;  %v5575_v29 = vld [vmem:[#allocation8 + $0x198] sm:$0xf0]  ;;  %v6596_v63 = vld [vmem:[#allocation8 + $0x134] sm:$0xf0]  ;;  %v5754_v12 = vor.u32 %v6650_v41, %v5751_v5 }
 0x1c2   :  { %3745 = vmatpush.bf16.msrb.mxu2 %v5482_v42  ;;  %v5621_v42 = vld [vmem:[#allocation8 + $0x1e8] sm:$0xf]  ;;  %v5578_v34 = vor.u32 %v6606_v28, %v5575_v29  ;;  %v6590_v28 = vld [vmem:[#allocation8 + $0x10c] sm:$0xf]  ;;  %v5671_v5 = vld [vmem:[#allocation8 + $0x258] sm:$0xf0] }
 0x1c3   :  { %v2334_v31 = vadd.f32 %v2333_v51, %v2321_v1  ;;  %v5622_v50 = vor.u32 %v6620_v43, %v5621_v42  ;;  %v5962_v1 = vor.u32 %v6702_v15, %v5959_v16  ;;  %v5925_v30 = vld [vmem:[#allocation8 + $0x448] sm:$0xf]  ;;  %v6692_v43 = vld [vmem:[#allocation8 + $0x434] sm:$0xf0]  ;;  %v6686_v15 = vld [vmem:[#allocation8 + $0x40c] sm:$0xf] }
 0x1c4   :  { %3673 = vmatpush.bf16.msra.mxu0 %v5382_v18  ;;  %v6696_v18 = vld [vmem:[#allocation8 + $0x454] sm:$0xf0]  ;;  %v5909_v42 = vld [vmem:[#allocation8 + $0x428] sm:$0xf]  ;;  %v5895_v16 = vld [vmem:[#allocation8 + $0x418] sm:$0xf0] }
 0x1c5   :  { %6810 = vtanh.f32 %v2334_v31  ;;  %v5926_v36 = vor.u32 %v6696_v18, %v5925_v30  ;;  %v5910_v48 = vor.u32 %v6692_v43, %v5909_v42  ;;  %v5898_v29 = vor.u32 %v6686_v15, %v5895_v16  ;;  %v5511_v18 = vld [vmem:[#allocation8 + $0x118] sm:$0xf0]  ;;  %v6638_v43 = vld [vmem:[#allocation8 + $0x28c] sm:$0xf] }
 0x1c6   :  { %3746 = vmatpush.bf16.msrb.mxu2 %v5466_v19  ;;  %v6119_v42 = vld [vmem:[#allocation8 + $0x5d8] sm:$0xf0]  ;;  %v6630_v41 = vld [vmem:[#allocation8 + $0x24c] sm:$0xf] }
 0x1c7   :  { %3674 = vmatmul.bf16.vlgmr.msra.gmra.mxu0 %v7139_v55 }
 0x1c8   :  { %3718 = vmatpush.bf16.msrb.mxu0 %v6006_v32  ;;  %v2322_v26 = vpop.f32.mrf.mxu2  ;;  %v5943_v32 = vld [vmem:[#allocation8 + $0x478] sm:$0xf0] }
 0x1c9   :  { %v2335_v3 = vpop.f32.mrf.mxu3 }
 0x1ca   :  { %3747 = vmatpush.bf16.msrb.mxu2 %v5450_v60  ;;  %v6614_v60 = vld [vmem:[#allocation8 + $0x1cc] sm:$0xf] }
 0x1cb   :  { %v6811_v19 = vpop.eup %6810  ;;  %v5610_v9 = vor.u32 %v6614_v60, %v5607_v0  ;;  %v6688_v60 = vld [vmem:[#allocation8 + $0x414] sm:$0xf0] }
 0x1cc   :  { %3719 = vmatpush.bf16.msrb.mxu0 %v5990_v37  ;;  %v7180_v22 = vpack.c.bf16 %v6811_v19, %v6811_v19  ;;  %v6602_v37 = vld [vmem:[#allocation8 + $0x16c] sm:$0xf]  ;;  %v6600_v19 = vld [vmem:[#allocation8 + $0x154] sm:$0xf0] }
 0x1cd   :  { %v5542_v53 = vor.u32 %v6600_v19, %v5541_v46  ;;  %v6101_v46 = vld [vmem:[#allocation8 + $0x5a8] sm:$0xf]  ;;  %v6738_v19 = vld [vmem:[#allocation8 + $0x5ac] sm:$0xf] }
 0x1ce   :  { %3748 = vmatpush.bf16.msrb.mxu2 %v5434_v56  ;;  %3583 = vmatmul.bf16.vlgmr.msra.gmra.mxu1 %v7180_v22  ;;  %v5958_v56 = vor.u32 %v6704_v4, %v5957_v2  ;;  %v5911_v4 = vld [vmem:[#allocation8 + $0x438] sm:$0xf0] }
 0x1cf   :  { %3661 = vmatmul.bf16.vlgmr.msrb.gmra.mxu3 %v7180_v22  ;;  %3679 = vmatpush.bf16.msra.mxu1 %v5622_v50  ;;  %v6598_v50 = vld [vmem:[#allocation8 + $0x14c] sm:$0xf] }
 0x1d0   :  { %3757 = vmatpush.bf16.msrb.mxu3 %v5626_v52  ;;  %3720 = vmatpush.bf16.msrb.mxu0 %v5974_v54  ;;  %v5543_v52 = vld [vmem:[#allocation8 + $0x158] sm:$0xf0] }
 0x1d2   :  { %3749 = vmatpush.bf16.msrb.mxu2 %v5418_v62  ;;  %v6700_v62 = vld [vmem:[#allocation8 + $0x474] sm:$0xf0] }
 0x1d3   :  { %3680 = vmatpush.bf16.msra.mxu1 %v5606_v8  ;;  %v5942_v51 = vor.u32 %v6700_v62, %v5941_v14  ;;  %v6594_v14 = vld [vmem:[#allocation8 + $0x12c] sm:$0xf]  ;;  %v5527_v62 = vld [vmem:[#allocation8 + $0x138] sm:$0xf0] }
 0x1d4   :  { %3758 = vmatpush.bf16.msrb.mxu3 %v5610_v9  ;;  %3721 = vmatpush.bf16.msrb.mxu0 %v5958_v56  ;;  %v5546_v9 = vor.u32 %v6598_v50, %v5543_v52  ;;  %v5894_v56 = vor.u32 %v6688_v60, %v5893_v7  ;;  %v6103_v50 = vld [vmem:[#allocation8 + $0x5b8] sm:$0xf0]  ;;  %v6634_v52 = vld [vmem:[#allocation8 + $0x26c] sm:$0xf]  ;;  %v6085_v60 = vld [vmem:[#allocation8 + $0x588] sm:$0xf] }
 0x1d5   :  { %v6106_v7 = vor.u32 %v6738_v19, %v6103_v50  ;;  %v6674_v50 = vld [vmem:[#allocation8 + $0x3ac] sm:$0xf] }
 0x1d6   :  { %3750 = vmatpush.bf16.msrb.mxu2 %v5402_v20  ;;  %v6698_v20 = vld [vmem:[#allocation8 + $0x46c] sm:$0xf] }
 0x1d7   :  { %3681 = vmatpush.bf16.msra.mxu1 %v5590_v23  ;;  %v5946_v3 = vor.u32 %v6698_v20, %v5943_v32  ;;  %v6646_v23 = vld [vmem:[#allocation8 + $0x2cc] sm:$0xf]  ;;  %v6748_v20 = vld [vmem:[#allocation8 + $0x5f4] sm:$0xf0] }
 0x1d8   :  { %v3519_v31 = vpop.f32.mrf.mxu0  ;;  %3759 = vmatpush.bf16.msrb.mxu3 %v5594_v24  ;;  %3722 = vmatpush.bf16.msrb.mxu0 %v5942_v51  ;;  %v5526_v24 = vor.u32 %v6596_v63, %v5525_v10  ;;  %v5530_v51 = vor.u32 %v6594_v14, %v5527_v62  ;;  %v6746_v32 = vld [vmem:[#allocation8 + $0x5ec] sm:$0xf]  ;;  %v5655_v62 = vld [vmem:[#allocation8 + $0x238] sm:$0xf0] }
 0x1d9   :  { %v3532_v33 = vpop.f32.mrf.mxu1  ;;  %v6730_v63 = vld [vmem:[#allocation8 + $0x56c] sm:$0xf] }
 0x1da   :  { %3751 = vmatpush.bf16.msrb.mxu2 %v5386_v38  ;;  %v6604_v38 = vld [vmem:[#allocation8 + $0x174] sm:$0xf0]  ;;  %v6626_v14 = vld [vmem:[#allocation8 + $0x22c] sm:$0xf] }
 0x1db   :  { %3682 = vmatpush.bf16.msra.mxu1 %v5574_v21  ;;  %v5558_v45 = vor.u32 %v6604_v38, %v5557_v35  ;;  %v6642_v21 = vld [vmem:[#allocation8 + $0x2ac] sm:$0xf] }
 0x1dc   :  { %3760 = vmatpush.bf16.msrb.mxu3 %v5578_v34  ;;  %3723 = vmatpush.bf16.msrb.mxu0 %v5926_v36  ;;  %v5719_v34 = vld [vmem:[#allocation8 + $0x2b8] sm:$0xf0]  ;;  %v5514_v36 = vor.u32 %v6590_v28, %v5511_v18  ;;  %v6622_v28 = vld [vmem:[#allocation8 + $0x20c] sm:$0xf]  ;;  %v6724_v18 = vld [vmem:[#allocation8 + $0x534] sm:$0xf0] }
 0x1dd   :  { %3752 = vmatmul.bf16.vlgmr.msrb.gmra.mxu2 %v7139_v55  ;;  %v2542_v55 = vperm.slane %v7185_v49, 0 }
 0x1de   :  { %3796 = vmatpush.bf16.msra.mxu2 %v6010_v40  ;;  %v5559_v40 = vld [vmem:[#allocation8 + $0x178] sm:$0xf0]  ;;  %3635 = vmatmul.bf16.vlgmr.msrb.gmra.mxu1 %v7148_v13 }
 0x1df   :  { %v3520_v6 = vadd.f32 %v3519_v31, %v2542_v55  ;;  %v5562_v47 = vor.u32 %v6602_v37, %v5559_v40  ;;  %3713 = vmatmul.bf16.vlgmr.msra.gmra.mxu3 %v7148_v13  ;;  %3683 = vmatpush.bf16.msra.mxu1 %v5558_v45  ;;  %v5735_v55 = vld [vmem:[#allocation8 + $0x2d8] sm:$0xf0]  ;;  %v6133_v31 = vld [vmem:[#allocation8 + $0x5e8] sm:$0xf]  ;;  %v6742_v40 = vld [vmem:[#allocation8 + $0x5cc] sm:$0xf] }
 0x1e0   :  { %v3545_v54 = vpop.f32.mrf.mxu2  ;;  %v3521_v2 = vpop.f32.mrf.mxu0  ;;  %3724 = vmatpush.bf16.msrb.mxu0 %v5910_v48  ;;  %v5738_v30 = vor.u32 %v6646_v23, %v5735_v55  ;;  %v6134_v35 = vor.u32 %v6748_v20, %v6133_v31  ;;  %v6117_v37 = vld [vmem:[#allocation8 + $0x5c8] sm:$0xf]  ;;  %v6122_v45 = vor.u32 %v6742_v40, %v6119_v42  ;;  %v5706_v48 = vor.u32 %v6638_v43, %v5703_v44  ;;  %v6728_v55 = vld [vmem:[#allocation8 + $0x554] sm:$0xf0]  ;;  %v5879_v40 = vld [vmem:[#allocation8 + $0x3f8] sm:$0xf0] }
 0x1e1   :  { %v3533_v26 = vadd.f32 %v3532_v33, %v3520_v6  ;;  %v3534_v8 = vpop.f32.mrf.mxu1  ;;  %3761 = vmatpush.bf16.msrb.mxu3 %v5562_v47  ;;  %v6135_v6 = vld [vmem:[#allocation8 + $0x5f8] sm:$0xf0]  ;;  %v5510_v33 = vor.u32 %v6592_v59, %v5509_v27  ;;  %v6740_v47 = vld [vmem:[#allocation8 + $0x5b4] sm:$0xf0]  ;;  %v6734_v2 = vld [vmem:[#allocation8 + $0x58c] sm:$0xf] }
 0x1e2   :  { %3797 = vmatpush.bf16.msra.mxu2 %v5994_v61  ;;  %v6690_v61 = vld [vmem:[#allocation8 + $0x42c] sm:$0xf]  ;;  %v6138_v38 = vor.u32 %v6746_v32, %v6135_v6  ;;  %v6053_v23 = vld [vmem:[#allocation8 + $0x548] sm:$0xf]  ;;  %v6055_v59 = vld [vmem:[#allocation8 + $0x558] sm:$0xf0] }
 0x1e3   :  { %v7188_v0 = vadd.f32 %v3545_v54, %v3533_v26  ;;  %3684 = vmatpush.bf16.msra.mxu1 %v5542_v53  ;;  %v6744_v26 = vld [vmem:[#allocation8 + $0x5d4] sm:$0xf0]  ;;  %v5687_v54 = vld [vmem:[#allocation8 + $0x278] sm:$0xf0]  ;;  %v6726_v27 = vld [vmem:[#allocation8 + $0x54c] sm:$0xf] }
 0x1e4   :  { %3725 = vmatpush.bf16.msrb.mxu0 %v5894_v56  ;;  %v6118_v25 = vor.u32 %v6744_v26, %v6117_v37  ;;  %v5674_v56 = vor.u32 %v6630_v41, %v5671_v5  ;;  %v6722_v32 = vld [vmem:[#allocation8 + $0x52c] sm:$0xf]  ;;  %v6039_v6 = vld [vmem:[#allocation8 + $0x538] sm:$0xf0] }
 0x1e5   :  { %3762 = vmatpush.bf16.msrb.mxu3 %v5546_v9  ;;  %v6069_v9 = vld [vmem:[#allocation8 + $0x568] sm:$0xf]  ;;  %v6023_v26 = vld [vmem:[#allocation8 + $0x518] sm:$0xf0]  ;;  %v6662_v5 = vld [vmem:[#allocation8 + $0x34c] sm:$0xf] }
 0x1e6   :  { %3798 = vmatpush.bf16.msra.mxu2 %v5978_v11  ;;  %v5914_v11 = vor.u32 %v6690_v61, %v5911_v4  ;;  %v5690_v61 = vor.u32 %v6634_v52, %v5687_v54  ;;  %v6087_v4 = vld [vmem:[#allocation8 + $0x598] sm:$0xf0] }
 0x1e7   :  { %3685 = vmatpush.bf16.msra.mxu1 %v5526_v24  ;;  %3726 = vmatmul.bf16.vlgmr.msrb.gmra.mxu0 %v7170_v17  ;;  %v6090_v53 = vor.u32 %v6734_v2, %v6087_v4  ;;  %v5847_v52 = vld [vmem:[#allocation8 + $0x3b8] sm:$0xf0]  ;;  %v6755_v4 = vld [vmem:[#allocation9 + $0x30] sm:$0xff] }
 0x1e8   :  { %3770 = vmatpush.bf16.msra.mxu0 %v5754_v12  ;;  %v5850_v54 = vor.u32 %v6674_v50, %v5847_v52  ;;  %v5815_v2 = vld [vmem:[#allocation8 + $0x378] sm:$0xf0] }
 0x1e9   :  { %3763 = vmatpush.bf16.msrb.mxu3 %v5530_v51  ;;  %v5658_v51 = vor.u32 %v6626_v14, %v5655_v62  ;;  %v6752_v14 = vld [vmem:[#allocation9 + $0x18] sm:$0xff] }
 0x1ea   :  { %3799 = vmatpush.bf16.msra.mxu2 %v5962_v1  ;;  %v3547_v1 = vpop.f32.mrf.mxu2  ;;  %v6768_v50 = vld [vmem:[#allocation9 + $0x98] sm:$0xff] }
 0x1eb   :  { %3686 = vmatpush.bf16.msra.mxu1 %v5510_v33  ;;  %v5639_v1 = vld [vmem:[#allocation8 + $0x218] sm:$0xf0]  ;;  %v2543_v33 = vperm.slane %v7185_v49, 1 }
 0x1ec   :  { %3771 = vmatpush.bf16.msra.mxu0 %v5738_v30  ;;  %v6037_v30 = vld [vmem:[#allocation8 + $0x528] sm:$0xf]  ;;  %v5642_v31 = vor.u32 %v6622_v28, %v5639_v1  ;;  %v6761_v1 = vld [vmem:[#allocation9 + $0x60] sm:$0xff] }
 0x1ed   :  { %3764 = vmatpush.bf16.msrb.mxu3 %v5514_v36  ;;  %v6021_v36 = vld [vmem:[#allocation8 + $0x508] sm:$0xf] }
 0x1ee   :  { %3800 = vmatpush.bf16.msra.mxu2 %v5946_v3  ;;  %v5722_v3 = vor.u32 %v6642_v21, %v5719_v34  ;;  %3687 = vmatmul.bf16.vlgmr.msra.gmra.mxu1 %v7141_v57  ;;  %v6038_v21 = vor.u32 %v6724_v18, %v6037_v30  ;;  %v6042_v34 = vor.u32 %v6722_v32, %v6039_v6  ;;  %v6762_v28 = vld [vmem:[#allocation9 + $0x68] sm:$0xff]  ;;  %v6759_v18 = vld [vmem:[#allocation9 + $0x50] sm:$0xff]  ;;  %v6757_v32 = vld [vmem:[#allocation9 + $0x40] sm:$0xff] }
 0x1ef   :  { %3731 = vmatpush.bf16.msrb.mxu1 %v6134_v35  ;;  %v6720_v35 = vld [vmem:[#allocation8 + $0x514] sm:$0xf0] }
 0x1f0   :  { %3772 = vmatpush.bf16.msra.mxu0 %v5722_v3  ;;  %3765 = vmatmul.bf16.vlgmr.msrb.gmra.mxu3 %v7141_v57  ;;  %v6732_v57 = vld [vmem:[#allocation8 + $0x574] sm:$0xf0]  ;;  %v6682_v3 = vld [vmem:[#allocation8 + $0x3ec] sm:$0xf]  ;;  %v6022_v42 = vor.u32 %v6720_v35, %v6021_v36 }
 0x1f1   :  { %3809 = vmatpush.bf16.msra.mxu3 %v6138_v38  ;;  %v3558_v10 = vpop.f32.mrf.mxu3  ;;  %v6070_v15 = vor.u32 %v6732_v57, %v6069_v9  ;;  %v6718_v38 = vld [vmem:[#allocation8 + $0x50c] sm:$0xf]  ;;  %v5783_v57 = vld [vmem:[#allocation8 + $0x338] sm:$0xf0] }
 0x1f2   :  { %3801 = vmatpush.bf16.msra.mxu2 %v5930_v58  ;;  %v6102_v58 = vor.u32 %v6740_v47, %v6101_v46  ;;  %v7197_v12 = vadd.f32 %v3558_v10, %v7188_v0  ;;  %v6058_v0 = vor.u32 %v6726_v27, %v6055_v59  ;;  %v6026_v44 = vor.u32 %v6718_v38, %v6023_v26  ;;  %v6678_v46 = vld [vmem:[#allocation8 + $0x3cc] sm:$0xf]  ;;  %v5863_v47 = vld [vmem:[#allocation8 + $0x3d8] sm:$0xf0]  ;;  %v6749_v59 = vld [vmem:[#allocation9] sm:$0xff] }
 0x1f3   :  { %3732 = vmatpush.bf16.msrb.mxu1 %v6118_v25  ;;  %v5882_v25 = vor.u32 %v6682_v3, %v5879_v40  ;;  %v5866_v19 = vor.u32 %v6678_v46, %v5863_v47  ;;  %v6658_v9 = vld [vmem:[#allocation8 + $0x32c] sm:$0xf]  ;;  %v6769_v46 = vld [vmem:[#allocation9 + $0xa0] sm:$0xff] }
 0x1f4   :  { %3773 = vmatpush.bf16.msra.mxu0 %v5706_v48  ;;  %v5786_v10 = vor.u32 %v6658_v9, %v5783_v57  ;;  %v6779_v9 = vld [vmem:[#allocation9 + $0xf0] sm:$0xff] }
 0x1f5   :  { %3810 = vmatpush.bf16.msra.mxu3 %v6122_v45 }
 0x1f6   :  { %3802 = vmatpush.bf16.msra.mxu2 %v5914_v11  ;;  %v6071_v11 = vld [vmem:[#allocation8 + $0x578] sm:$0xf0] }
 0x1f7   :  { %3733 = vmatpush.bf16.msrb.mxu1 %v6102_v58  ;;  %v6074_v16 = vor.u32 %v6730_v63, %v6071_v11  ;;  %v6670_v58 = vld [vmem:[#allocation8 + $0x38c] sm:$0xf]  ;;  %v5767_v11 = vld [vmem:[#allocation8 + $0x318] sm:$0xf0] }
 0x1f8   :  { %3774 = vmatpush.bf16.msra.mxu0 %v5690_v61  ;;  %v6666_v61 = vld [vmem:[#allocation8 + $0x36c] sm:$0xf] }
 0x1f9   :  { %3811 = vmatpush.bf16.msra.mxu3 %v6106_v7  ;;  %v3560_v20 = vpop.f32.mrf.mxu3  ;;  %v5831_v7 = vld [vmem:[#allocation8 + $0x398] sm:$0xf0]  ;;  %v5818_v41 = vor.u32 %v6666_v61, %v5815_v2  ;;  %v6654_v63 = vld [vmem:[#allocation8 + $0x30c] sm:$0xf] }
 0x1fa   :  { %3803 = vmatpush.bf16.msra.mxu2 %v5898_v29  ;;  %v6054_v29 = vor.u32 %v6728_v55, %v6053_v23  ;;  %v5770_v62 = vor.u32 %v6654_v63, %v5767_v11  ;;  %v6750_v55 = vld [vmem:[#allocation9 + $0x8] sm:$0xff] }
 0x1fb   :  { %v6758_v20 = vld [vmem:[#allocation9 + $0x48] sm:$0xff] }
 0x1fc   :  { %3775 = vmatpush.bf16.msra.mxu0 %v5674_v56  ;;  %v6753_v56 = vld [vmem:[#allocation9 + $0x20] sm:$0xff]  ;;  %v6766_v2 = vld [vmem:[#allocation9 + $0x88] sm:$0xff] }
 0x1fd   :  { %3804 = vmatmul.bf16.vlgmr.msra.gmra.mxu2 %v7170_v17  ;;  %v6736_v17 = vld [vmem:[#allocation8 + $0x594] sm:$0xf0]  ;;  %3812 = vmatpush.bf16.msra.mxu3 %v6090_v53  ;;  %v6754_v53 = vld [vmem:[#allocation9 + $0x28] sm:$0xff] }
 0x1fe   :  { %v6086_v8 = vor.u32 %v6736_v17, %v6085_v60  ;;  %v6756_v60 = vld [vmem:[#allocation9 + $0x38] sm:$0xff]  ;;  %v5834_v17 = vor.u32 %v6670_v58, %v5831_v7 }
 0x200   :  { %3734 = vmatpush.bf16.msrb.mxu1 %v6086_v8  ;;  %v3597_v24 = vpop.f32.mrf.mxu2  ;;  %3776 = vmatpush.bf16.msra.mxu0 %v5658_v51  ;;  %v5799_v8 = vld [vmem:[#allocation8 + $0x358] sm:$0xf0] }
 0x201   :  { %3813 = vmatpush.bf16.msra.mxu3 %v6074_v16  ;;  %v3598_v43 = vadd.f32 %v3597_v24, %v2543_v33  ;;  %v3610_v45 = vpop.f32.mrf.mxu3  ;;  %v6764_v16 = vld [vmem:[#allocation9 + $0x78] sm:$0xff]  ;;  %v6763_v24 = vld [vmem:[#allocation9 + $0x70] sm:$0xff] }
 0x203   :  { %v7201_v48 = vadd.f32 %v3610_v45, %v3598_v43  ;;  %v6771_v43 = vld [vmem:[#allocation9 + $0xb0] sm:$0xff] }
 0x204   :  { %3735 = vmatpush.bf16.msrb.mxu1 %v6070_v15  ;;  %3777 = vmatpush.bf16.msra.mxu0 %v5642_v31  ;;  %v6751_v15 = vld [vmem:[#allocation9 + $0x10] sm:$0xff] }
 0x205   :  { %3814 = vmatpush.bf16.msra.mxu3 %v6058_v0  ;;  %v6760_v0 = vld [vmem:[#allocation9 + $0x58] sm:$0xff] }
 0x207   :  { %3778 = vmatmul.bf16.vlgmr.msra.gmra.mxu0 %v7137_v39 }
 0x208   :  { %3736 = vmatpush.bf16.msrb.mxu1 %v6054_v29  ;;  %v3599_v37 = vpop.f32.mrf.mxu2  ;;  %4089 = vmatpush.bf16.msrb.mxu0 %v6756_v60  ;;  %v6767_v60 = vld [vmem:[#allocation9 + $0x90] sm:$0xff] }
 0x209   :  { %3815 = vmatpush.bf16.msra.mxu3 %v6042_v34  ;;  %v3612_v39 = vpop.f32.mrf.mxu3  ;;  %v6772_v37 = vld [vmem:[#allocation9 + $0xb8] sm:$0xff] }
 0x20a   :  { %4115 = vmatpush.bf16.msrb.mxu2 %v6772_v37 }
 0x20c   :  { %3737 = vmatpush.bf16.msrb.mxu1 %v6038_v21  ;;  %4090 = vmatpush.bf16.msrb.mxu0 %v6755_v4 }
 0x20d   :  { %3816 = vmatpush.bf16.msra.mxu3 %v6026_v44  ;;  %v6770_v44 = vld [vmem:[#allocation9 + $0xa8] sm:$0xff] }
 0x20e   :  { %4116 = vmatpush.bf16.msrb.mxu2 %v6771_v43 }
 0x210   :  { %3738 = vmatpush.bf16.msrb.mxu1 %v6022_v42  ;;  %3817 = vmatmul.bf16.vlgmr.msra.gmra.mxu3 %v7180_v22 }
 0x211   :  { %4091 = vmatpush.bf16.msrb.mxu0 %v6754_v53  ;;  %v6780_v53 = vld [vmem:[#allocation9 + $0xf8] sm:$0xff] }
 0x212   :  { %4117 = vmatpush.bf16.msrb.mxu2 %v6770_v44  ;;  %4128 = vmatpush.bf16.msrb.mxu3 %v6780_v53  ;;  %v6799_v44 = vld [vmem:[#allocation11 + $0xa] ss:$0 sm:$0xff] }
 0x213   :  { %3739 = vmatmul.bf16.vlgmr.msrb.gmra.mxu1 %v7180_v22  ;;  %v5802_v22 = vor.u32 %v6662_v5, %v5799_v8 }
 0x214   :  { %3783 = vmatpush.bf16.msra.mxu1 %v5882_v25 }
 0x215   :  { %4092 = vmatpush.bf16.msrb.mxu0 %v6753_v56  ;;  %v2544_v56 = vperm.slane %v7185_v49, 2 }
 0x216   :  { %4118 = vmatpush.bf16.msrb.mxu2 %v6769_v46  ;;  %4129 = vmatpush.bf16.msrb.mxu3 %v6779_v9 }
 0x218   :  { %3784 = vmatpush.bf16.msra.mxu1 %v5866_v19 }
 0x219   :  { %4093 = vmatpush.bf16.msrb.mxu0 %v6752_v14 }
 0x21a   :  { %4119 = vmatpush.bf16.msrb.mxu2 %v6768_v50 }
 0x21c   :  { %3785 = vmatpush.bf16.msra.mxu1 %v5850_v54 }
 0x21d   :  { %4094 = vmatpush.bf16.msrb.mxu0 %v6751_v15 }
 0x21e   :  { %4120 = vmatpush.bf16.msrb.mxu2 %v6767_v60  ;;  %v4142_v60 = vld [vmem:[%s7230_s5] sm:$0xff]  ;;  %s6996_s5 = smov [#allocation12]  }
 0x21f   :  { %vm4167_vm2 = vcmp.ge.s32.totalorder %v4142_v60, 0  ;;  %s4190_s29 = sshll.u32 %s6996_s5, 4  ;;  %s4191_s29 = int_to_ptr.vmem [resolvable:$true] %s4190_s29 }
 0x220   :  { %3786 = vmatpush.bf16.msra.mxu1 %v5834_v17 }
 0x221   :  { %4095 = vmatpush.bf16.msrb.mxu0 %v6750_v55 }
 0x222   :  { %4121 = vmatpush.bf16.msrb.mxu2 %v6766_v2 }
 0x223   :  { %v3571_v23 = vpop.f32.mrf.mxu0 }
 0x224   :  { %3787 = vmatpush.bf16.msra.mxu1 %v5818_v41  ;;  %v3572_v21 = vadd.f32 %v3571_v23, %v7197_v12  ;;  %v6765_v41 = vld [vmem:[#allocation9 + $0x80] sm:$0xff] }
 0x225   :  { %4096 = vmatpush.bf16.msrb.mxu0 %v6749_v59 }
 0x226   :  { %4122 = vmatpush.bf16.msrb.mxu2 %v6765_v41 }
 0x228   :  { %3788 = vmatpush.bf16.msra.mxu1 %v5802_v22 }
 0x22a   :  { %v3649_v51 = vpop.f32.mrf.mxu2 }
 0x22b   :  { %v3573_v27 = vpop.f32.mrf.mxu0 }
 0x22c   :  { %3789 = vmatpush.bf16.msra.mxu1 %v5786_v10  ;;  %v6778_v10 = vld [vmem:[#allocation9 + $0xe8] sm:$0xff] }
 0x22d   :  { %4130 = vmatpush.bf16.msrb.mxu3 %v6778_v10 }
 0x230   :  { %3790 = vmatpush.bf16.msra.mxu1 %v5770_v62  ;;  %v6777_v62 = vld [vmem:[#allocation9 + $0xe0] sm:$0xff] }
 0x231   :  { %4131 = vmatpush.bf16.msrb.mxu3 %v6777_v62 }
 0x232   :  { %v3651_v29 = vpop.f32.mrf.mxu2 }
 0x233   :  { %3791 = vmatmul.bf16.vlgmr.msra.gmra.mxu1 %v7148_v13  ;;  %v3623_v30 = vpop.f32.mrf.mxu0 }
 0x234   :  { %4102 = vmatpush.bf16.msrb.mxu1 %v6764_v16  ;;  %v3624_v45 = vadd.f32 %v3623_v30, %v7201_v48  ;;  %v6776_v16 = vld [vmem:[#allocation9 + $0xd8] sm:$0xff]  ;;  %v6773_v30 = vld [vmem:[#allocation9 + $0xc0] sm:$0xff] }
 0x235   :  { %4132 = vmatpush.bf16.msrb.mxu3 %v6776_v16 }
 0x238   :  { %4103 = vmatpush.bf16.msrb.mxu1 %v6763_v24 }
 0x23b   :  { %v3625_v13 = vpop.f32.mrf.mxu0 }
 0x23c   :  { %4104 = vmatpush.bf16.msrb.mxu1 %v6762_v28  ;;  %v6774_v28 = vld [vmem:[#allocation9 + $0xc8] sm:$0xff] }
 0x240   :  { %4105 = vmatpush.bf16.msrb.mxu1 %v6761_v1  ;;  %v7206_v31 = vpop.f32.mrf.mxu2 }
 0x244   :  { %4106 = vmatpush.bf16.msrb.mxu1 %v6760_v0  ;;  %v3675_v33 = vpop.f32.mrf.mxu0 }
 0x245   :  { %v3676_v11 = vadd.f32 %v3675_v33, %v2544_v56 }
 0x248   :  { %4107 = vmatpush.bf16.msrb.mxu1 %v6759_v18  ;;  %v3703_v6 = vpop.f32.mrf.mxu2 }
 0x24b   :  { %v3584_v34 = vpop.f32.mrf.mxu1 }
 0x24c   :  { %4108 = vmatpush.bf16.msrb.mxu1 %v6758_v20  ;;  %v3585_v36 = vadd.f32 %v3584_v34, %v3572_v21  ;;  %v3677_v38 = vpop.f32.mrf.mxu0 }
 0x24e   :  { %v3822_v35 = vmax.f32 %v3585_v36, 0.0 }
 0x250   :  { %4109 = vmatpush.bf16.msrb.mxu1 %v6757_v32  ;;  %v3826_v26 = vpack.c.bf16 %v3822_v35, %v3822_v35 }
 0x252   :  { %v3662_v3 = vpop.f32.mrf.mxu3  ;;  %4097 = vmatmul.bf16.vlgmr.msrb.gmra.mxu0 %v3826_v26 }
 0x253   :  { %v3586_v42 = vpop.f32.mrf.mxu1 }
 0x25a   :  { %v3664_v25 = vpop.f32.mrf.mxu3 }
 0x25b   :  { %v3636_v47 = vpop.f32.mrf.mxu1 }
 0x25c   :  { %v3637_v19 = vadd.f32 %v3636_v47, %v3624_v45 }
 0x25e   :  { %v3650_v52 = vadd.f32 %v3649_v51, %v3637_v19  ;;  %v6775_v51 = vld [vmem:[#allocation9 + $0xd0] sm:$0xff]  ;;  %v4143_v19 = vlaneseq }
 0x25f   :  { %4133 = vmatpush.bf16.msrb.mxu3 %v6775_v51 }
 0x260   :  { %v7209_v40 = vpop.f32.mrf.mxu2  ;;  %v3663_v54 = vadd.f32 %v3662_v3, %v3650_v52  ;;  %v4144_v50 = vand.u32 127, %v4143_v19 }
 0x262   :  { %v3714_v39 = vpop.f32.mrf.mxu3  ;;  %v3823_v58 = vmax.f32 %v3663_v54, 0.0  ;;  %vm4145_vm0 = vcmp.lt.s32.totalorder %v4144_v50, 2 }
 0x263   :  { %v3638_v7 = vpop.f32.mrf.mxu1  ;;  %4134 = vmatpush.bf16.msrb.mxu3 %v6774_v28 }
 0x264   :  { %v3827_v17 = vpack.c.bf16 %v3823_v58, %v3823_v58  ;;  %v3727_v61 = vpop.f32.mrf.mxu0 }
 0x266   :  { %4110 = vmatmul.bf16.vlgmr.msrb.gmra.mxu1 %v3827_v17 }
 0x267   :  { %4135 = vmatpush.bf16.msrb.mxu3 %v6773_v30 }
 0x268   :  { %v3755_v12 = vpop.f32.mrf.mxu2 }
 0x26a   :  { %v3716_v4 = vpop.f32.mrf.mxu3 }
 0x26b   :  { %v3688_v48 = vpop.f32.mrf.mxu1 }
 0x26c   :  { %v3729_v5 = vpop.f32.mrf.mxu0  ;;  %v3689_v15 = vadd.f32 %v3688_v48, %v3676_v11 }
 0x26d   :  { %v6995_v5 = vmov 0.0  }
 0x26e   :  { %v3702_v23 = vadd.f32 %v7206_v31, %v3689_v15  ;;  %v2545_v31 = vperm.slane %v7185_v49, 3 }
 0x270   :  { %v3715_v24 = vadd.f32 %v3714_v39, %v3702_v23  ;;  %v3754_v6 = vadd.f32 %v7209_v40, %v2545_v31  ;;  %v6994_v40 = vmov 0  }
 0x271   :  { %6798 = vset.pattern.permute.xlu0 %v6994_v40 }
 0x272   :  { %v3728_v27 = vadd.f32 %v3727_v61, %v3715_v24 }
 0x273   :  { %v3766_v22 = vpop.f32.mrf.mxu3  ;;  %v3690_v57 = vpop.f32.mrf.mxu1 }
 0x274   :  { %v3767_v33 = vadd.f32 %v3766_v22, %v3754_v6 }
 0x27b   :  { %v3768_v14 = vpop.f32.mrf.mxu3 }
 0x280   :  { %v3805_v8 = vpop.f32.mrf.mxu2 }
 0x284   :  { %v3779_v55 = vpop.f32.mrf.mxu0 }
 0x285   :  { %v3780_v21 = vadd.f32 %v3779_v55, %v3767_v33 }
 0x288   :  { %v3807_v63 = vpop.f32.mrf.mxu2 }
 0x289   :  { %v6268_v63 = vsel %vm4167_vm2, 1.0, %v6995_v5 }
 0x28c   :  { %v3781_v29 = vpop.f32.mrf.mxu0 }
 0x290   :  { %v3740_v59 = vpop.f32.mrf.mxu1 }
 0x291   :  { %v3741_v1 = vadd.f32 %v3740_v59, %v3728_v27 }
 0x293   :  { %v3824_v0 = vmax.f32 %v3741_v1, 0.0  ;;  %v3818_v13 = vpop.f32.mrf.mxu3 }
 0x295   :  { %v3828_v18 = vpack.c.bf16 %v3824_v0, %v3824_v0 }
 0x297   :  { %4123 = vmatmul.bf16.vlgmr.msrb.gmra.mxu2 %v3828_v18 }
 0x298   :  { %v3742_v20 = vpop.f32.mrf.mxu1 }
 0x29b   :  { %v3820_v32 = vpop.f32.mrf.mxu3 }
 0x2b0   :  { %v3792_v34 = vpop.f32.mrf.mxu1 }
 0x2b1   :  { %v3793_v36 = vadd.f32 %v3792_v34, %v3780_v21 }
 0x2b3   :  { %v3806_v35 = vadd.f32 %v3805_v8, %v3793_v36 }
 0x2b5   :  { %v3819_v38 = vadd.f32 %v3818_v13, %v3806_v35 }
 0x2b7   :  { %v3825_v37 = vmax.f32 %v3819_v38, 0.0 }
 0x2b8   :  { %v3794_v26 = vpop.f32.mrf.mxu1 }
 0x2b9   :  { %v3829_v3 = vpack.c.bf16 %v3825_v37, %v3825_v37 }
 0x2bb   :  { %4136 = vmatmul.bf16.vlgmr.msrb.gmra.mxu3 %v3829_v3 }
 0x2cf   :  { %v4098_v42 = vpop.f32.mrf.mxu0 }
 0x2d0   :  { %v4099_v25 = vadd.f32 %v6799_v44, %v4098_v42 }
 0x2d7   :  { %v4100_v43 = vpop.f32.mrf.mxu0 }
 0x2e3   :  { %v4111_v45 = vpop.f32.mrf.mxu1 }
 0x2e4   :  { %v4112_v12 = vadd.f32 %v4111_v45, %v4099_v25 }
 0x2eb   :  { %v4113_v46 = vpop.f32.mrf.mxu1 }
 0x31a   :  { %v4124_v49 = vpop.f32.mrf.mxu2 }
 0x31b   :  { %v4125_v52 = vadd.f32 %v4124_v49, %v4112_v12 }
 0x322   :  { %v4126_v47 = vpop.f32.mrf.mxu2 }
 0x33e   :  { %v4137_v54 = vpop.f32.mrf.mxu3 }
 0x33f   :  { %v4138_v39 = vadd.f32 %v4137_v54, %v4125_v52 }
 0x341   :  { %4141 = vst [vmem:[#allocation12] sm:$0xff] %v4138_v39  ;;  %v4146_v58 = vsel %vm4145_vm0, %v4138_v39, -1e+30 }
 0x342   :  { %4147 = vmax.xlane.f32.xlu0 %v4146_v58  ;;  %4195 = dma.vmem_to_hbm [thread:$0]  %s4191_s29, 128, %s4193_s9, [#allocation4]  }
 0x346   :  { %v4139_v7 = vpop.f32.mrf.mxu3 }
 0x356   :  { %4159 = vperm.xlu0 %6798, %v4142_v60  }
 0x3b5   :  { %v4148_v17 = vpop.xlane.xlu0 %4147 }
 0x3b6   :  { %v4149_v61 = vsub.f32 %v4146_v58, %v4148_v17 }
 0x3b8   :  { %v4150_v2 = vmul.f32 1.442695, %v4149_v61 }
 0x3ba   :  { %6812 = vpow2.f32 %v4150_v2 }
 0x3c0   :  { %v6813_v4 = vpop.eup %6812 }
 0x3c1   :  { %v4152_v48 = vsel %vm4145_vm0, %v6813_v4, 0.0 }
 0x3c2   :  { %4153 = vadd.xlane.f32.xlu1 %v4152_v48 }
 0x3c8   :  { %v4160_v41 = vpop.permute.xlu0 %4159 }
 0x3c9   :  { %vm4161_vm1 = vcmp.eq.s32.totalorder %v4144_v50, %v4160_v41 }
 0x3ca   :  { %v6267_v8 = vsel %vm4161_vm1, 1.0, %v6995_v5 }
 0x3cb   :  { %v4164_v53 = vmul.f32 %v6267_v8, %v4138_v39 }
 0x3cd   :  { %4165 = vadd.xlane.f32.xlu1 %v4164_v53 }
 0x435   :  { %v4154_v22 = vpop.xlane.xlu1 %4153 }
 0x436   :  { %6814 = vlog2.f32 %v4154_v22 }
 0x43c   :  { %v6815_v9 = vpop.eup %6814 }
 0x43d   :  { %v4156_v57 = vmul.f32 0.6931472, %v6815_v9 }
 0x43f   :  { %v4157_v56 = vadd.f32 %v4156_v57, %v4148_v17 }
 0x440   :  { %v4166_v10 = vpop.xlane.xlu1 %4165 }
 0x441   :  { %v4170_v11 = vsub.f32 %v4157_v56, %v4166_v10 }
 0x443   :  { %v4171_v14 = vmul.f32 %v6268_v63, %v4170_v11 }
 0x445   :  { %v4173_v62 = vsel %vm4172_vm3, %v4171_v14, 0.0 }
 0x446   :  { %4174 = vadd.xlane.f32.xlu2 %v4173_v62 }
 0x4b9   :  { %v4175_v15 = vpop.xlane.xlu2 %4174 }
 0x4ba   :  { %v4176_v16 = vrot.slane %v4175_v15, 4 }
 0x4bc   :  { %v4177_v23 = vadd.f32 %v4176_v16, %v4175_v15 }
 0x4be   :  { %v4178_v55 = vrot.slane %v4177_v23, 2 }
 0x4c0   :  { %v4179_v24 = vadd.f32 %v4178_v55, %v4177_v23 }
 0x4c2   :  { %v4180_v51 = vrot.slane %v4179_v24, 1 }
 0x4c4   :  { %v4181_v27 = vadd.f32 %v4180_v51, %v4179_v24 }
 0x4c6   :  { %6781 = vpush %v4181_v27 }
 0x4f7   :  { %s6782_s13 = spop %6781 }
 0x4f8   :  { %4184 = sst [smem:[#allocation13]] %s6782_s13 }
 0x4f9   :  { %4204 = dma.smem_to_hbm %s6997_s14, 16, %s4202_s12, [#allocation5]  }
 0x4fa   :  { %6979 = dma.done.wait [#allocation4], 128  }
 0x4fb   :  { %6980 = vsyncadd [#allocation4], 4294967168 }
 0x4fc   :  { %6981 = dma.done.wait [#allocation5], 16  }
 0x4fd   :  { %6982 = vsyncadd [#allocation5], 4294967280 }
 0x4fe   :  { %4213 = sfence }
 0x4ff   :  { %4214 = vsyncpa [#allocation3], 1 }
 0x500   :  { %4215 = vsyncpa [#allocation7], 1 }
 0x501   :  { %4216 = vsyncpa [#allocation10], 1 }
 0x502   :  { %4217 = vsyncpa [#allocation4], 1 }
 0x503   :  { %4218 = vsyncpa [#allocation5], 1 }

</bundles_post_ra>
